<compile_context>
chip_gen: v6e
topology: v6e:2x2x1
jax: 0.10.0
libtpu: 0.0.40
codegen_flags: <defaults>
</compile_context>

<pallas_src>
import jax
import jax.numpy as jnp
from jax import lax
from jax.experimental import pallas as pl
from jax.experimental.pallas import tpu as pltpu

# ---- static model dims (derived from the PyTorch module) --------------------
C_IN, L_IN = 12, 126          # input channels / length
C1, K1 = 3, 15                # conv1
C2, K2 = 6, 15                # conv2
L1 = L_IN - K1 + 1            # 112
P1 = L1 // 2                  # 56
L2 = P1 - K2 + 1              # 42
P2 = L2 // 2                  # 21
F_IN = C2 * P2                # 126
F_OUT = 6

XDIM = C_IN * L_IN            # 1512 flattened input features, row-major (c, l)
P1DIM = C1 * P1               # 168  pooled conv1 features (channel-major)
Y1DIM = 2 * P1DIM             # 336  conv1 outputs, [even | odd] pooling halves
FPAD = 128                    # pooled conv2 features padded 126 -> 128
Y2DIM = 2 * FPAD              # 256  conv2 outputs, [even | odd] halves (padded)
B_TILE_MAX = 512              # samples per grid step (fits comfortably in VMEM)


def _round_up(a, m):
    return ((a + m - 1) // m) * m


def net_kernel(x_ref, w1_ref, b1_ref, w2_ref, b2_ref, w3_ref, b3_ref, o_ref):
    x = x_ref[...]                                                     # (BT, 1512)

    # conv1 + bias + ReLU as ONE MXU matmul against the Toeplitz weight.
    y1 = jnp.dot(x, w1_ref[...], preferred_element_type=jnp.float32) + b1_ref[...]
    y1 = jnp.maximum(y1, 0.0)                                          # (BT, 336)
    # MaxPool1d(2,2): even/odd output positions are the two column halves.
    p1 = jnp.maximum(y1[:, :P1DIM], y1[:, P1DIM:])                     # (BT, 168)

    # conv2 + bias + ReLU (output halves padded to 128 cols -> aligned slices).
    y2 = jnp.dot(p1, w2_ref[...], preferred_element_type=jnp.float32) + b2_ref[...]
    y2 = jnp.maximum(y2, 0.0)                                          # (BT, 256)
    p2 = jnp.maximum(y2[:, :FPAD], y2[:, FPAD:])                       # (BT, 128)

    # flatten is free (columns already channel-major c*21 + l) + Linear.
    out = jnp.dot(p2, w3_ref[...], preferred_element_type=jnp.float32) + b3_ref[...]
    o_ref[...] = out.astype(o_ref.dtype)                               # (BT, 6)


def _pack_params(w1, b1, w2, b2, w3, b3):
    """Pre-pack conv weights as Toeplitz matmul weights (done once, in plain JAX)."""
    f32 = jnp.float32
    w1, w2, w3 = w1.astype(f32), w2.astype(f32), w3.astype(f32)
    b1, b2, b3 = b1.astype(f32), b2.astype(f32), b3.astype(f32)

    # conv1: y1[b, q] = sum_{c,j} x[b, c*L_IN + j] * W1T[c*L_IN + j, q]
    # column order q = parity*C1*P1 + o*P1 + l'   (conv position l = 2*l' + parity)
    j = jnp.arange(L_IN)
    l = jnp.arange(L1)
    tap = j[None, :] - l[:, None]                                  # (L1, L_IN)
    valid = (tap >= 0) & (tap < K1)
    w_g = w1[:, :, jnp.where(valid, tap, 0)] * valid[None, None].astype(f32)
    w_g = jnp.transpose(w_g, (1, 3, 0, 2))                         # (C_IN, L_IN, C1, L1)
    w_g = w_g.reshape(XDIM, C1, P1, 2)                             # L1 -> (P1, parity)
    w1t = jnp.transpose(w_g, (0, 3, 1, 2)).reshape(XDIM, Y1DIM)    # (1512, 336)
    b1r = jnp.tile(jnp.repeat(b1, P1), 2).reshape(1, Y1DIM)

    # conv2: same trick, each pooling half padded 126 -> 128 columns.
    j2 = jnp.arange(P1)
    l2 = jnp.arange(L2)
    tap2 = j2[None, :] - l2[:, None]                               # (L2, P1)
    valid2 = (tap2 >= 0) & (tap2 < K2)
    w2g = w2[:, :, jnp.where(valid2, tap2, 0)] * valid2[None, None].astype(f32)
    w2g = jnp.transpose(w2g, (1, 3, 0, 2))                         # (C1, P1, C2, L2)
    w2g = w2g.reshape(P1DIM, C2, P2, 2)
    w2g = jnp.transpose(w2g, (0, 3, 1, 2)).reshape(P1DIM, 2, F_IN)
    w2t = jnp.pad(w2g, ((0, 0), (0, 0), (0, FPAD - F_IN))).reshape(P1DIM, Y2DIM)
    b2r = jnp.tile(jnp.pad(jnp.repeat(b2, P2), (0, FPAD - F_IN)), 2).reshape(1, Y2DIM)

    # fc: pad flattened features 126 -> 128 (pad cols of p2 are exactly 0), pre-T.
    w3t = jnp.pad(w3, ((0, 0), (0, FPAD - F_IN))).T                # (128, 6)
    b3r = b3.reshape(1, F_OUT)
    return w1t, b1r, w2t, b2r, w3t, b3r


def net_forward(x, params):
    """x: (N, 12, 126) float32 -> (N, 6) float32."""
    w1, b1, w2, b2, w3, b3 = params
    n = x.shape[0]
    bt = min(B_TILE_MAX, _round_up(max(n, 1), 128))   # batch tile, lane-friendly
    n_pad = _round_up(n, bt)

    x2d = x.astype(jnp.float32).reshape(n, XDIM)      # free row-major reshape
    if n_pad != n:
        x2d = jnp.pad(x2d, ((0, n_pad - n), (0, 0)))

    w1t, b1r, w2t, b2r, w3t, b3r = _pack_params(w1, b1, w2, b2, w3, b3)

    def const(shape):
        return pl.BlockSpec(shape, lambda i: (0,) * len(shape))

    out = pl.pallas_call(
        net_kernel,
        out_shape=jax.ShapeDtypeStruct((n_pad, F_OUT), jnp.float32),
        grid_spec=pltpu.PrefetchScalarGridSpec(
            num_scalar_prefetch=0,
            grid=(n_pad // bt,),
            in_specs=[
                pl.BlockSpec((bt, XDIM), lambda i: (i, 0)),   # x batch tile
                const((XDIM, Y1DIM)),                         # conv1 Toeplitz weight
                const((1, Y1DIM)),                            # conv1 bias row
                const((P1DIM, Y2DIM)),                        # conv2 Toeplitz weight
                const((1, Y2DIM)),                            # conv2 bias row
                const((FPAD, F_OUT)),                         # fc weight (padded, pre-T)
                const((1, F_OUT)),                            # fc bias row
            ],
            out_specs=pl.BlockSpec((bt, F_OUT), lambda i: (i, 0)),
        ),
        compiler_params=pltpu.CompilerParams(
            dimension_semantics=("parallel",),                # multi-tile -> both v7x TCs
            vmem_limit_bytes=32 * 1024 * 1024,                # ~13 MiB used; safe on v5e/v6e/v7x
        ),
    )(x2d, w1t, b1r, w2t, b2r, w3t, b3r)
    return out[:n]


def reference_forward(x, params):
    """Pure-JAX reference mirroring the PyTorch forward."""
    w1, b1, w2, b2, w3, b3 = params
    dn = ("NCH", "OIH", "NCH")

    def pool(v):  # MaxPool1d(2, 2)
        n, c, l = v.shape
        return jnp.max(v[:, :, : (l // 2) * 2].reshape(n, c, l // 2, 2), axis=-1)

    y = lax.conv_general_dilated(x, w1, (1,), "VALID", dimension_numbers=dn)
    y = pool(jax.nn.relu(y + b1[None, :, None]))
    y = lax.conv_general_dilated(y, w2, (1,), "VALID", dimension_numbers=dn)
    y = pool(jax.nn.relu(y + b2[None, :, None]))
    y = y.reshape(-1, F_IN)
    return y @ w3.T + b3


def init_params(key):
    ks = jax.random.split(key, 6)
    w1 = jax.random.normal(ks[0], (C1, C_IN, K1), jnp.float32) * 0.1
    b1 = jax.random.normal(ks[1], (C1,), jnp.float32) * 0.1
    w2 = jax.random.normal(ks[2], (C2, C1, K2), jnp.float32) * 0.1
    b2 = jax.random.normal(ks[3], (C2,), jnp.float32) * 0.1
    w3 = jax.random.normal(ks[4], (F_OUT, F_IN), jnp.float32) * 0.1
    b3 = jax.random.normal(ks[5], (F_OUT,), jnp.float32) * 0.1
    return (w1, b1, w2, b2, w3, b3)


if __name__ == "__main__":
    key = jax.random.PRNGKey(0)
    kx, kp = jax.random.split(key)
    batch = 2
    x = jax.random.normal(kx, (batch, C_IN, L_IN), jnp.float32)
    params = init_params(kp)

    out = jax.block_until_ready(net_forward(x, params))
    ref = reference_forward(x, params)

    assert out.shape == (batch, F_OUT)
    assert jnp.allclose(out, ref, atol=2e-4, rtol=2e-4), "mismatch vs reference"

    print("KERNEL_OK")
</pallas_src>

<mosaic_0001>
module attributes {stable_mosaic.version = 11 : i64} {
  func.func @net_kernel(%arg0: i32, %arg1: memref<128x1512xf32, #tpu.memory_space<vmem>>, %arg2: memref<1512x336xf32, #tpu.memory_space<vmem>>, %arg3: memref<1x336xf32, #tpu.memory_space<vmem>>, %arg4: memref<168x256xf32, #tpu.memory_space<vmem>>, %arg5: memref<1x256xf32, #tpu.memory_space<vmem>>, %arg6: memref<128x6xf32, #tpu.memory_space<vmem>>, %arg7: memref<1x6xf32, #tpu.memory_space<vmem>>, %arg8: memref<128x6xf32, #tpu.memory_space<vmem>>) attributes {dimension_semantics = [#tpu.dimension_semantics<parallel>], iteration_bounds = array<i64: 1>, scalar_prefetch = 0 : i64, scratch_operands = 0 : i64, tpu.core_type = #tpu.core_type<tc>, window_params = [{transform_indices = @transform_0, window_bounds = array<i64: 128, 1512>}, {pipeline_mode = #tpu.pipeline_mode<synchronous>, transform_indices = @transform_1, window_bounds = array<i64: 1512, 336>}, {pipeline_mode = #tpu.pipeline_mode<synchronous>, transform_indices = @transform_2, window_bounds = array<i64: 1, 336>}, {pipeline_mode = #tpu.pipeline_mode<synchronous>, transform_indices = @transform_3, window_bounds = array<i64: 168, 256>}, {pipeline_mode = #tpu.pipeline_mode<synchronous>, transform_indices = @transform_4, window_bounds = array<i64: 1, 256>}, {pipeline_mode = #tpu.pipeline_mode<synchronous>, transform_indices = @transform_5, window_bounds = array<i64: 128, 6>}, {pipeline_mode = #tpu.pipeline_mode<synchronous>, transform_indices = @transform_6, window_bounds = array<i64: 1, 6>}, {transform_indices = @transform_7, window_bounds = array<i64: 128, 6>}]} {
    %c0 = arith.constant 0 : index
    %c0_0 = arith.constant 0 : index
    %0 = vector.load %arg1[%c0, %c0_0] : memref<128x1512xf32, #tpu.memory_space<vmem>>, vector<128x1512xf32>
    %c0_1 = arith.constant 0 : index
    %c0_2 = arith.constant 0 : index
    %1 = vector.load %arg2[%c0_1, %c0_2] : memref<1512x336xf32, #tpu.memory_space<vmem>>, vector<1512x336xf32>
    %cst = arith.constant dense<0.000000e+00> : vector<128x336xf32>
    %2 = tpu.matmul %0, %1, %cst {dimension_numbers = #tpu.dot_dimension_numbers<[1], [0], [0], [1], [0, 0, 1, 1], [], []>} : vector<128x1512xf32>, vector<1512x336xf32>, vector<128x336xf32> -> vector<128x336xf32>
    %c0_3 = arith.constant 0 : index
    %c0_4 = arith.constant 0 : index
    %3 = vector.load %arg3[%c0_3, %c0_4] : memref<1x336xf32, #tpu.memory_space<vmem>>, vector<1x336xf32>
    %4 = vector.broadcast %3 : vector<1x336xf32> to vector<128x336xf32>
    %5 = arith.addf %2, %4 : vector<128x336xf32>
    %cst_5 = arith.constant 0.000000e+00 : f32
    %6 = vector.broadcast %cst_5 : f32 to vector<128x336xf32>
    %7 = arith.maximumf %5, %6 : vector<128x336xf32>
    %8 = vector.extract_strided_slice %7 {offsets = [0, 0], sizes = [128, 168], strides = [1, 1]} : vector<128x336xf32> to vector<128x168xf32>
    %9 = vector.extract_strided_slice %7 {offsets = [0, 168], sizes = [128, 168], strides = [1, 1]} : vector<128x336xf32> to vector<128x168xf32>
    %10 = arith.maximumf %8, %9 : vector<128x168xf32>
    %c0_6 = arith.constant 0 : index
    %c0_7 = arith.constant 0 : index
    %11 = vector.load %arg4[%c0_6, %c0_7] : memref<168x256xf32, #tpu.memory_space<vmem>>, vector<168x256xf32>
    %cst_8 = arith.constant dense<0.000000e+00> : vector<128x256xf32>
    %12 = tpu.matmul %10, %11, %cst_8 {dimension_numbers = #tpu.dot_dimension_numbers<[1], [0], [0], [1], [0, 0, 1, 1], [], []>} : vector<128x168xf32>, vector<168x256xf32>, vector<128x256xf32> -> vector<128x256xf32>
    %c0_9 = arith.constant 0 : index
    %c0_10 = arith.constant 0 : index
    %13 = vector.load %arg5[%c0_9, %c0_10] : memref<1x256xf32, #tpu.memory_space<vmem>>, vector<1x256xf32>
    %14 = vector.broadcast %13 : vector<1x256xf32> to vector<128x256xf32>
    %15 = arith.addf %12, %14 : vector<128x256xf32>
    %cst_11 = arith.constant 0.000000e+00 : f32
    %16 = vector.broadcast %cst_11 : f32 to vector<128x256xf32>
    %17 = arith.maximumf %15, %16 : vector<128x256xf32>
    %18 = vector.extract_strided_slice %17 {offsets = [0, 0], sizes = [128, 128], strides = [1, 1]} : vector<128x256xf32> to vector<128x128xf32>
    %19 = vector.extract_strided_slice %17 {offsets = [0, 128], sizes = [128, 128], strides = [1, 1]} : vector<128x256xf32> to vector<128x128xf32>
    %20 = arith.maximumf %18, %19 : vector<128x128xf32>
    %c0_12 = arith.constant 0 : index
    %c0_13 = arith.constant 0 : index
    %21 = vector.load %arg6[%c0_12, %c0_13] : memref<128x6xf32, #tpu.memory_space<vmem>>, vector<128x6xf32>
    %cst_14 = arith.constant dense<0.000000e+00> : vector<128x6xf32>
    %22 = tpu.matmul %20, %21, %cst_14 {dimension_numbers = #tpu.dot_dimension_numbers<[1], [0], [0], [1], [0, 0, 1, 1], [], []>} : vector<128x128xf32>, vector<128x6xf32>, vector<128x6xf32> -> vector<128x6xf32>
    %c0_15 = arith.constant 0 : index
    %c0_16 = arith.constant 0 : index
    %23 = vector.load %arg7[%c0_15, %c0_16] : memref<1x6xf32, #tpu.memory_space<vmem>>, vector<1x6xf32>
    %24 = vector.broadcast %23 : vector<1x6xf32> to vector<128x6xf32>
    %25 = arith.addf %22, %24 : vector<128x6xf32>
    %c0_17 = arith.constant 0 : index
    %c0_18 = arith.constant 0 : index
    %26 = vector.load %arg8[%c0_17, %c0_18] : memref<128x6xf32, #tpu.memory_space<vmem>>, vector<128x6xf32>
    tpu.vector_store %arg8[%c0_17, %c0_18], %25 {strides = array<i32>} : memref<128x6xf32, #tpu.memory_space<vmem>>, vector<128x6xf32>,
    return
  }
  func.func @transform_0(%arg0: i32) -> (i32, i32) {
    %c0_i32 = arith.constant 0 : i32
    %c0_i32_0 = arith.constant 0 : i32
    return %arg0, %c0_i32 : i32, i32
  }
  func.func @transform_1(%arg0: i32) -> (i32, i32) {
    %c0_i32 = arith.constant 0 : i32
    %c0_i32_0 = arith.constant 0 : i32
    %c0_i32_1 = arith.constant 0 : i32
    return %c0_i32, %c0_i32_0 : i32, i32
  }
  func.func @transform_2(%arg0: i32) -> (i32, i32) {
    %c0_i32 = arith.constant 0 : i32
    %c0_i32_0 = arith.constant 0 : i32
    %c0_i32_1 = arith.constant 0 : i32
    return %c0_i32, %c0_i32_0 : i32, i32
  }
  func.func @transform_3(%arg0: i32) -> (i32, i32) {
    %c0_i32 = arith.constant 0 : i32
    %c0_i32_0 = arith.constant 0 : i32
    %c0_i32_1 = arith.constant 0 : i32
    return %c0_i32, %c0_i32_0 : i32, i32
  }
  func.func @transform_4(%arg0: i32) -> (i32, i32) {
    %c0_i32 = arith.constant 0 : i32
    %c0_i32_0 = arith.constant 0 : i32
    %c0_i32_1 = arith.constant 0 : i32
    return %c0_i32, %c0_i32_0 : i32, i32
  }
  func.func @transform_5(%arg0: i32) -> (i32, i32) {
    %c0_i32 = arith.constant 0 : i32
    %c0_i32_0 = arith.constant 0 : i32
    %c0_i32_1 = arith.constant 0 : i32
    return %c0_i32, %c0_i32_0 : i32, i32
  }
  func.func @transform_6(%arg0: i32) -> (i32, i32) {
    %c0_i32 = arith.constant 0 : i32
    %c0_i32_0 = arith.constant 0 : i32
    %c0_i32_1 = arith.constant 0 : i32
    return %c0_i32, %c0_i32_0 : i32, i32
  }
  func.func @transform_7(%arg0: i32) -> (i32, i32) {
    %c0_i32 = arith.constant 0 : i32
    %c0_i32_0 = arith.constant 0 : i32
    return %arg0, %c0_i32 : i32, i32
  }
}

</mosaic_0001>

<bundles_post_ra>
// kernel: tpu_custom_call.1
= control target key start
LH: loop header
LB: loop body
LE: loop exit
PB: predicated region body
PF: predicated region fallthrough
CT: control target
= control target key end

     0   :  { %vm802_vm0 = vcmask 850944   ;;  %s4146_s14 = smov 88   ;;  %vm2831_vm1 = vcmask 719872   ;;  %vm2966_vm2 = vcmask 326656   ;;  %vm3392_vm3 = vcmask 48128   ;;  %s8213_s1 = inlined_call_operand.vmem [shape: f32[1512,336], index: 1, kind: input, shape index: {}]   ;;  %s8214_s0 = inlined_call_operand.vmem [shape: f32[128,1512], index: 0, kind: input, shape index: {}]   ;;  %s8215_s2 = inlined_call_operand.vmem [shape: f32[1,336], index: 2, kind: input, shape index: {}]   ;;  %s8216_s3 = inlined_call_operand.vmem [shape: f32[168,256], index: 3, kind: input, shape index: {}]   ;;  %s8217_s5 = inlined_call_operand.vmem [shape: f32[128,6], index: 5, kind: input, shape index: {}]   ;;  %s8218_s4 = inlined_call_operand.vmem [shape: f32[1,256], index: 4, kind: input, shape index: {}]   ;;  %s8219_s6 = inlined_call_operand.vmem [shape: f32[1,6], index: 6, kind: input, shape index: {}]   ;;  %s8220_s7 = inlined_call_operand.vmem [shape: f32[128,6], index: 7, kind: output, shape index: {}]  }
   0x1   :  { %v264_v0 = vld [vmem:[%s8213_s1 + $0x170] sm:$0xff]  ;;  %v263_v1 = vld [vmem:[%s8213_s1 + $0x168] sm:$0xff]  ;;  %v261_v2 = vld [vmem:[%s8213_s1 + $0x158] sm:$0xff] }
   0x2   :  { %851 = vmatprep.subr.mxu0 %v264_v0  ;;  %v360_v3 = vld [vmem:[%s8213_s1 + $0x470] sm:$0xff]  ;;  %v359_v5 = vld [vmem:[%s8213_s1 + $0x468] sm:$0xff]  ;;  %v258_v6 = vld [vmem:[%s8213_s1 + $0x140] sm:$0xff] }
   0x3   :  { %v260_v4 = vld [vmem:[%s8213_s1 + $0x150] sm:$0xff]  ;;  %852 = vmatpush1.msra.mxu0 %v263_v1  ;;  %1012 = vmatprep.subr.mxu1 %v360_v3  ;;  %v357_v7 = vld [vmem:[%s8213_s1 + $0x458] sm:$0xff]  ;;  %v354_v10 = vld [vmem:[%s8213_s1 + $0x440] sm:$0xff] }
   0x4   :  { %853 = vmatprep.subr.mxu0 %v261_v2  ;;  %1013 = vmatpush1.msra.mxu1 %v359_v5  ;;  %v257_v8 = vld [vmem:[%s8213_s1 + $0x138] sm:$0xff]  ;;  %v356_v9 = vld [vmem:[%s8213_s1 + $0x450] sm:$0xff]  ;;  %v255_v11 = vld [vmem:[%s8213_s1 + $0x128] sm:$0xff] }
   0x5   :  { %854 = vmatpush1.msra.mxu0 %v260_v4  ;;  %1014 = vmatprep.subr.mxu1 %v357_v7  ;;  %v353_v12 = vld [vmem:[%s8213_s1 + $0x438] sm:$0xff]  ;;  %v254_v13 = vld [vmem:[%s8213_s1 + $0x120] sm:$0xff]  ;;  %v351_v14 = vld [vmem:[%s8213_s1 + $0x428] sm:$0xff] }
   0x6   :  { %855 = vmatprep.subr.mxu0 %v258_v6  ;;  %1015 = vmatpush1.msra.mxu1 %v356_v9  ;;  %v252_v15 = vld [vmem:[%s8213_s1 + $0x110] sm:$0xff]  ;;  %v350_v16 = vld [vmem:[%s8213_s1 + $0x420] sm:$0xff]  ;;  %v251_v17 = vld [vmem:[%s8213_s1 + $0x108] sm:$0xff] }
   0x7   :  { %856 = vmatpush1.msra.mxu0 %v257_v8  ;;  %1016 = vmatprep.subr.mxu1 %v354_v10  ;;  %v348_v18 = vld [vmem:[%s8213_s1 + $0x410] sm:$0xff]  ;;  %v249_v19 = vld [vmem:[%s8213_s1 + $0xf8] sm:$0xff]  ;;  %v347_v20 = vld [vmem:[%s8213_s1 + $0x408] sm:$0xff] }
   0x8   :  { %857 = vmatprep.subr.mxu0 %v255_v11  ;;  %1017 = vmatpush1.msra.mxu1 %v353_v12  ;;  %v248_v21 = vld [vmem:[%s8213_s1 + $0xf0] sm:$0xff]  ;;  %v345_v22 = vld [vmem:[%s8213_s1 + $0x3f8] sm:$0xff]  ;;  %v246_v23 = vld [vmem:[%s8213_s1 + $0xe0] sm:$0xff] }
   0x9   :  { %858 = vmatpush1.msra.mxu0 %v254_v13  ;;  %1018 = vmatprep.subr.mxu1 %v351_v14  ;;  %v344_v24 = vld [vmem:[%s8213_s1 + $0x3f0] sm:$0xff]  ;;  %v245_v25 = vld [vmem:[%s8213_s1 + $0xd8] sm:$0xff]  ;;  %v342_v26 = vld [vmem:[%s8213_s1 + $0x3e0] sm:$0xff] }
   0xa   :  { %859 = vmatprep.subr.mxu0 %v252_v15  ;;  %1019 = vmatpush1.msra.mxu1 %v350_v16  ;;  %v243_v27 = vld [vmem:[%s8213_s1 + $0xc8] sm:$0xff]  ;;  %v341_v28 = vld [vmem:[%s8213_s1 + $0x3d8] sm:$0xff]  ;;  %v242_v29 = vld [vmem:[%s8213_s1 + $0xc0] sm:$0xff] }
   0xb   :  { %860 = vmatpush1.msra.mxu0 %v251_v17  ;;  %1020 = vmatprep.subr.mxu1 %v348_v18  ;;  %v339_v30 = vld [vmem:[%s8213_s1 + $0x3c8] sm:$0xff]  ;;  %v240_v31 = vld [vmem:[%s8213_s1 + $0xb0] sm:$0xff]  ;;  %v338_v32 = vld [vmem:[%s8213_s1 + $0x3c0] sm:$0xff] }
   0xc   :  { %861 = vmatprep.subr.mxu0 %v249_v19  ;;  %1021 = vmatpush1.msra.mxu1 %v347_v20  ;;  %v239_v33 = vld [vmem:[%s8213_s1 + $0xa8] sm:$0xff]  ;;  %v336_v34 = vld [vmem:[%s8213_s1 + $0x3b0] sm:$0xff]  ;;  %v237_v35 = vld [vmem:[%s8213_s1 + $0x98] sm:$0xff] }
   0xd   :  { %862 = vmatpush1.msra.mxu0 %v248_v21  ;;  %1022 = vmatprep.subr.mxu1 %v345_v22  ;;  %v335_v36 = vld [vmem:[%s8213_s1 + $0x3a8] sm:$0xff]  ;;  %v236_v37 = vld [vmem:[%s8213_s1 + $0x90] sm:$0xff]  ;;  %v333_v38 = vld [vmem:[%s8213_s1 + $0x398] sm:$0xff] }
   0xe   :  { %863 = vmatprep.subr.mxu0 %v246_v23  ;;  %1023 = vmatpush1.msra.mxu1 %v344_v24  ;;  %v234_v39 = vld [vmem:[%s8213_s1 + $0x80] sm:$0xff]  ;;  %v332_v40 = vld [vmem:[%s8213_s1 + $0x390] sm:$0xff]  ;;  %v233_v41 = vld [vmem:[%s8213_s1 + $0x78] sm:$0xff] }
   0xf   :  { %864 = vmatpush1.msra.mxu0 %v245_v25  ;;  %1024 = vmatprep.subr.mxu1 %v342_v26  ;;  %v330_v42 = vld [vmem:[%s8213_s1 + $0x380] sm:$0xff]  ;;  %v231_v43 = vld [vmem:[%s8213_s1 + $0x68] sm:$0xff]  ;;  %v329_v44 = vld [vmem:[%s8213_s1 + $0x378] sm:$0xff] }
  0x10   :  { %865 = vmatprep.subr.mxu0 %v243_v27  ;;  %1025 = vmatpush1.msra.mxu1 %v341_v28  ;;  %v230_v45 = vld [vmem:[%s8213_s1 + $0x60] sm:$0xff]  ;;  %v327_v46 = vld [vmem:[%s8213_s1 + $0x368] sm:$0xff]  ;;  %v228_v47 = vld [vmem:[%s8213_s1 + $0x50] sm:$0xff] }
  0x11   :  { %866 = vmatpush1.msra.mxu0 %v242_v29  ;;  %1026 = vmatprep.subr.mxu1 %v339_v30  ;;  %v326_v48 = vld [vmem:[%s8213_s1 + $0x360] sm:$0xff]  ;;  %v227_v49 = vld [vmem:[%s8213_s1 + $0x48] sm:$0xff]  ;;  %v324_v50 = vld [vmem:[%s8213_s1 + $0x350] sm:$0xff] }
  0x12   :  { %867 = vmatprep.subr.mxu0 %v240_v31  ;;  %1027 = vmatpush1.msra.mxu1 %v338_v32  ;;  %v225_v51 = vld [vmem:[%s8213_s1 + $0x38] sm:$0xff]  ;;  %v323_v52 = vld [vmem:[%s8213_s1 + $0x348] sm:$0xff]  ;;  %v224_v53 = vld [vmem:[%s8213_s1 + $0x30] sm:$0xff] }
  0x13   :  { %868 = vmatpush1.msra.mxu0 %v239_v33  ;;  %1028 = vmatprep.subr.mxu1 %v336_v34  ;;  %v321_v54 = vld [vmem:[%s8213_s1 + $0x338] sm:$0xff]  ;;  %v222_v55 = vld [vmem:[%s8213_s1 + $0x20] sm:$0xff]  ;;  %v320_v56 = vld [vmem:[%s8213_s1 + $0x330] sm:$0xff] }
  0x14   :  { %869 = vmatprep.subr.mxu0 %v237_v35  ;;  %1029 = vmatpush1.msra.mxu1 %v335_v36  ;;  %v221_v57 = vld [vmem:[%s8213_s1 + $0x18] sm:$0xff]  ;;  %v318_v58 = vld [vmem:[%s8213_s1 + $0x320] sm:$0xff]  ;;  %v219_v59 = vld [vmem:[%s8213_s1 + $0x8] sm:$0xff] }
  0x15   :  { %870 = vmatpush1.msra.mxu0 %v236_v37  ;;  %1030 = vmatprep.subr.mxu1 %v333_v38  ;;  %v317_v60 = vld [vmem:[%s8213_s1 + $0x318] sm:$0xff]  ;;  %v218_v61 = vld [vmem:[%s8213_s1] sm:$0xff]  ;;  %v315_v62 = vld [vmem:[%s8213_s1 + $0x308] sm:$0xff] }
  0x16   :  { %871 = vmatprep.subr.mxu0 %v234_v39  ;;  %1031 = vmatpush1.msra.mxu1 %v332_v40  ;;  %v312_v63 = vld [vmem:[%s8213_s1 + $0x2f0] sm:$0xff]  ;;  %v314_v0 = vld [vmem:[%s8213_s1 + $0x300] sm:$0xff]  ;;  %v311_v1 = vld [vmem:[%s8213_s1 + $0x2e8] sm:$0xff] }
  0x17   :  { %872 = vmatpush1.msra.mxu0 %v233_v41  ;;  %1032 = vmatprep.subr.mxu1 %v330_v42  ;;  %v408_v2 = vld [vmem:[%s8213_s1 + $0x5f0] sm:$0xff]  ;;  %v309_v3 = vld [vmem:[%s8213_s1 + $0x2d8] sm:$0xff]  ;;  %v407_v4 = vld [vmem:[%s8213_s1 + $0x5e8] sm:$0xff] }
  0x18   :  { %873 = vmatprep.subr.mxu0 %v231_v43  ;;  %1033 = vmatpush1.msra.mxu1 %v329_v44  ;;  %v308_v5 = vld [vmem:[%s8213_s1 + $0x2d0] sm:$0xff]  ;;  %v405_v6 = vld [vmem:[%s8213_s1 + $0x5d8] sm:$0xff]  ;;  %v306_v7 = vld [vmem:[%s8213_s1 + $0x2c0] sm:$0xff] }
  0x19   :  { %874 = vmatpush1.msra.mxu0 %v230_v45  ;;  %1034 = vmatprep.subr.mxu1 %v327_v46  ;;  %v404_v8 = vld [vmem:[%s8213_s1 + $0x5d0] sm:$0xff]  ;;  %v305_v9 = vld [vmem:[%s8213_s1 + $0x2b8] sm:$0xff]  ;;  %v402_v10 = vld [vmem:[%s8213_s1 + $0x5c0] sm:$0xff] }
  0x1a   :  { %875 = vmatprep.subr.mxu0 %v228_v47  ;;  %1035 = vmatpush1.msra.mxu1 %v326_v48  ;;  %v303_v11 = vld [vmem:[%s8213_s1 + $0x2a8] sm:$0xff]  ;;  %v401_v12 = vld [vmem:[%s8213_s1 + $0x5b8] sm:$0xff]  ;;  %v302_v13 = vld [vmem:[%s8213_s1 + $0x2a0] sm:$0xff] }
  0x1b   :  { %876 = vmatpush1.msra.mxu0 %v227_v49  ;;  %1036 = vmatprep.subr.mxu1 %v324_v50  ;;  %v399_v14 = vld [vmem:[%s8213_s1 + $0x5a8] sm:$0xff]  ;;  %v300_v15 = vld [vmem:[%s8213_s1 + $0x290] sm:$0xff]  ;;  %v398_v16 = vld [vmem:[%s8213_s1 + $0x5a0] sm:$0xff] }
  0x1c   :  { %877 = vmatprep.subr.mxu0 %v225_v51  ;;  %1037 = vmatpush1.msra.mxu1 %v323_v52  ;;  %v299_v17 = vld [vmem:[%s8213_s1 + $0x288] sm:$0xff]  ;;  %v396_v18 = vld [vmem:[%s8213_s1 + $0x590] sm:$0xff]  ;;  %v297_v19 = vld [vmem:[%s8213_s1 + $0x278] sm:$0xff] }
  0x1d   :  { %878 = vmatpush1.msra.mxu0 %v224_v53  ;;  %1038 = vmatprep.subr.mxu1 %v321_v54  ;;  %v395_v20 = vld [vmem:[%s8213_s1 + $0x588] sm:$0xff]  ;;  %v296_v21 = vld [vmem:[%s8213_s1 + $0x270] sm:$0xff]  ;;  %v393_v22 = vld [vmem:[%s8213_s1 + $0x578] sm:$0xff] }
  0x1e   :  { %879 = vmatprep.subr.mxu0 %v222_v55  ;;  %1039 = vmatpush1.msra.mxu1 %v320_v56  ;;  %v294_v23 = vld [vmem:[%s8213_s1 + $0x260] sm:$0xff]  ;;  %v392_v24 = vld [vmem:[%s8213_s1 + $0x570] sm:$0xff]  ;;  %v293_v25 = vld [vmem:[%s8213_s1 + $0x258] sm:$0xff] }
  0x1f   :  { %880 = vmatpush1.msra.mxu0 %v221_v57  ;;  %1040 = vmatprep.subr.mxu1 %v318_v58  ;;  %v390_v26 = vld [vmem:[%s8213_s1 + $0x560] sm:$0xff]  ;;  %v291_v27 = vld [vmem:[%s8213_s1 + $0x248] sm:$0xff]  ;;  %v389_v28 = vld [vmem:[%s8213_s1 + $0x558] sm:$0xff] }
  0x20   :  { %881 = vmatprep.subr.mxu0 %v219_v59  ;;  %1041 = vmatpush1.msra.mxu1 %v317_v60  ;;  %v290_v29 = vld [vmem:[%s8213_s1 + $0x240] sm:$0xff]  ;;  %v387_v30 = vld [vmem:[%s8213_s1 + $0x548] sm:$0xff]  ;;  %v288_v31 = vld [vmem:[%s8213_s1 + $0x230] sm:$0xff] }
  0x21   :  { %882 = vmatpush1.msra.mxu0 %v218_v61  ;;  %1042 = vmatprep.subr.mxu1 %v315_v62  ;;  %v386_v32 = vld [vmem:[%s8213_s1 + $0x540] sm:$0xff]  ;;  %v287_v33 = vld [vmem:[%s8213_s1 + $0x228] sm:$0xff]  ;;  %v384_v34 = vld [vmem:[%s8213_s1 + $0x530] sm:$0xff] }
  0x22   :  { %883 = vmatprep.subr.mxu0 %v312_v63  ;;  %1043 = vmatpush1.msra.mxu1 %v314_v0  ;;  %v285_v35 = vld [vmem:[%s8213_s1 + $0x218] sm:$0xff]  ;;  %v383_v36 = vld [vmem:[%s8213_s1 + $0x528] sm:$0xff]  ;;  %v284_v37 = vld [vmem:[%s8213_s1 + $0x210] sm:$0xff] }
  0x23   :  { %884 = vmatpush2.msra.mxu0 %v311_v1  ;;  %1044 = vmatprep.subr.mxu1 %v408_v2  ;;  %v381_v38 = vld [vmem:[%s8213_s1 + $0x518] sm:$0xff]  ;;  %v282_v39 = vld [vmem:[%s8213_s1 + $0x200] sm:$0xff]  ;;  %v380_v40 = vld [vmem:[%s8213_s1 + $0x510] sm:$0xff] }
  0x24   :  { %885 = vmatprep.subr.mxu0 %v309_v3  ;;  %1045 = vmatpush2.msra.mxu1 %v407_v4  ;;  %v281_v41 = vld [vmem:[%s8213_s1 + $0x1f8] sm:$0xff]  ;;  %v378_v42 = vld [vmem:[%s8213_s1 + $0x500] sm:$0xff]  ;;  %v279_v43 = vld [vmem:[%s8213_s1 + $0x1e8] sm:$0xff] }
  0x25   :  { %886 = vmatpush2.msra.mxu0 %v308_v5  ;;  %1046 = vmatprep.subr.mxu1 %v405_v6  ;;  %v377_v44 = vld [vmem:[%s8213_s1 + $0x4f8] sm:$0xff]  ;;  %v278_v45 = vld [vmem:[%s8213_s1 + $0x1e0] sm:$0xff]  ;;  %v375_v46 = vld [vmem:[%s8213_s1 + $0x4e8] sm:$0xff] }
  0x26   :  { %887 = vmatprep.subr.mxu0 %v306_v7  ;;  %1047 = vmatpush2.msra.mxu1 %v404_v8  ;;  %v276_v47 = vld [vmem:[%s8213_s1 + $0x1d0] sm:$0xff]  ;;  %v374_v48 = vld [vmem:[%s8213_s1 + $0x4e0] sm:$0xff]  ;;  %v275_v49 = vld [vmem:[%s8213_s1 + $0x1c8] sm:$0xff] }
  0x27   :  { %888 = vmatpush2.msra.mxu0 %v305_v9  ;;  %1048 = vmatprep.subr.mxu1 %v402_v10  ;;  %v372_v50 = vld [vmem:[%s8213_s1 + $0x4d0] sm:$0xff]  ;;  %v273_v51 = vld [vmem:[%s8213_s1 + $0x1b8] sm:$0xff]  ;;  %v371_v52 = vld [vmem:[%s8213_s1 + $0x4c8] sm:$0xff] }
  0x28   :  { %889 = vmatprep.subr.mxu0 %v303_v11  ;;  %1049 = vmatpush2.msra.mxu1 %v401_v12  ;;  %v272_v53 = vld [vmem:[%s8213_s1 + $0x1b0] sm:$0xff]  ;;  %v369_v54 = vld [vmem:[%s8213_s1 + $0x4b8] sm:$0xff]  ;;  %v270_v55 = vld [vmem:[%s8213_s1 + $0x1a0] sm:$0xff] }
  0x29   :  { %890 = vmatpush2.msra.mxu0 %v302_v13  ;;  %1050 = vmatprep.subr.mxu1 %v399_v14  ;;  %v368_v56 = vld [vmem:[%s8213_s1 + $0x4b0] sm:$0xff]  ;;  %v269_v57 = vld [vmem:[%s8213_s1 + $0x198] sm:$0xff]  ;;  %v366_v58 = vld [vmem:[%s8213_s1 + $0x4a0] sm:$0xff] }
  0x2a   :  { %891 = vmatprep.subr.mxu0 %v300_v15  ;;  %1051 = vmatpush2.msra.mxu1 %v398_v16  ;;  %v267_v59 = vld [vmem:[%s8213_s1 + $0x188] sm:$0xff]  ;;  %v266_v61 = vld [vmem:[%s8213_s1 + $0x180] sm:$0xff]  ;;  %v365_v62 = vld [vmem:[%s8213_s1 + $0x498] sm:$0xff] }
  0x2b   :  { %892 = vmatpush2.msra.mxu0 %v299_v17  ;;  %1052 = vmatprep.subr.mxu1 %v396_v18  ;;  %v27_v60 = vld [vmem:[%s8214_s0 + $0x8] sm:$0xff]  ;;  %v26_v63 = vld [vmem:[%s8214_s0] sm:$0xff]  ;;  %v456_v1 = vld [vmem:[%s8213_s1 + $0x770] sm:$0xff] }
  0x2c   :  { %893 = vmatprep.subr.mxu0 %v297_v19  ;;  %1053 = vmatpush2.msra.mxu1 %v395_v20  ;;  %v363_v0 = vld [vmem:[%s8213_s1 + $0x488] sm:$0xff]  ;;  %v362_v2 = vld [vmem:[%s8213_s1 + $0x480] sm:$0xff]  ;;  %v29_v3 = vld [vmem:[%s8214_s0 + $0x18] sm:$0xff] }
  0x2d   :  { %894 = vmatpush2.msra.mxu0 %v296_v21  ;;  %1054 = vmatprep.subr.mxu1 %v393_v22  ;;  %v455_v4 = vld [vmem:[%s8213_s1 + $0x768] sm:$0xff]  ;;  %v28_v5 = vld [vmem:[%s8214_s0 + $0x10] sm:$0xff]  ;;  %v453_v6 = vld [vmem:[%s8213_s1 + $0x758] sm:$0xff] }
  0x2e   :  { %895 = vmatprep.subr.mxu0 %v294_v23  ;;  %1055 = vmatpush2.msra.mxu1 %v392_v24  ;;  %v552_v7 = vld [vmem:[%s8213_s1 + $0xa70] sm:$0xff]  ;;  %v39_v8 = vld [vmem:[%s8214_s0 + $0x68] sm:$0xff]  ;;  %v38_v11 = vld [vmem:[%s8214_s0 + $0x60] sm:$0xff] }
  0x2f   :  { %896 = vmatpush2.msra.mxu0 %v293_v25  ;;  %1056 = vmatprep.subr.mxu1 %v390_v26  ;;  %v452_v9 = vld [vmem:[%s8213_s1 + $0x750] sm:$0xff]  ;;  %v551_v10 = vld [vmem:[%s8213_s1 + $0xa68] sm:$0xff]  ;;  %v450_v12 = vld [vmem:[%s8213_s1 + $0x740] sm:$0xff] }
  0x30   :  { %897 = vmatprep.subr.mxu0 %v291_v27  ;;  %1057 = vmatpush2.msra.mxu1 %v389_v28  ;;  %v549_v13 = vld [vmem:[%s8213_s1 + $0xa58] sm:$0xff]  ;;  %v548_v16 = vld [vmem:[%s8213_s1 + $0xa50] sm:$0xff]  ;;  %v447_v18 = vld [vmem:[%s8213_s1 + $0x728] sm:$0xff] }
  0x31   :  { %898 = vmatpush2.msra.mxu0 %v290_v29  ;;  %1058 = vmatprep.subr.mxu1 %v387_v30  ;;  %v41_v14 = vld [vmem:[%s8214_s0 + $0x78] sm:$0xff]  ;;  %v40_v17 = vld [vmem:[%s8214_s0 + $0x70] sm:$0xff]  ;;  %v546_v19 = vld [vmem:[%s8213_s1 + $0xa40] sm:$0xff] }
  0x32   :  { %899 = vmatprep.subr.mxu0 %v288_v31  ;;  %1059 = vmatpush2.msra.mxu1 %v386_v32  ;;  %v449_v15 = vld [vmem:[%s8213_s1 + $0x738] sm:$0xff]  ;;  %v51_v20 = vld [vmem:[%s8214_s0 + $0xc8] sm:$0xff]  ;;  %v446_v21 = vld [vmem:[%s8213_s1 + $0x720] sm:$0xff] }
  0x33   :  { %900 = vmatpush2.msra.mxu0 %v287_v33  ;;  %1060 = vmatprep.subr.mxu1 %v384_v34  ;;  %v545_v22 = vld [vmem:[%s8213_s1 + $0xa38] sm:$0xff]  ;;  %v50_v23 = vld [vmem:[%s8214_s0 + $0xc0] sm:$0xff]  ;;  %v444_v24 = vld [vmem:[%s8213_s1 + $0x710] sm:$0xff] }
  0x34   :  { %901 = vmatprep.subr.mxu0 %v285_v35  ;;  %1061 = vmatpush2.msra.mxu1 %v383_v36  ;;  %v543_v25 = vld [vmem:[%s8213_s1 + $0xa28] sm:$0xff]  ;;  %v53_v26 = vld [vmem:[%s8214_s0 + $0xd8] sm:$0xff]  ;;  %v542_v28 = vld [vmem:[%s8213_s1 + $0xa20] sm:$0xff] }
  0x35   :  { %902 = vmatpush2.msra.mxu0 %v284_v37  ;;  %1062 = vmatprep.subr.mxu1 %v381_v38  ;;  %v443_v27 = vld [vmem:[%s8213_s1 + $0x708] sm:$0xff]  ;;  %v52_v29 = vld [vmem:[%s8214_s0 + $0xd0] sm:$0xff]  ;;  %v441_v30 = vld [vmem:[%s8213_s1 + $0x6f8] sm:$0xff] }
  0x36   :  { %903 = vmatprep.subr.mxu0 %v282_v39  ;;  %1063 = vmatpush2.msra.mxu1 %v380_v40  ;;  %v540_v31 = vld [vmem:[%s8213_s1 + $0xa10] sm:$0xff]  ;;  %v63_v32 = vld [vmem:[%s8214_s0 + $0x128] sm:$0xff]  ;;  %v62_v35 = vld [vmem:[%s8214_s0 + $0x120] sm:$0xff] }
  0x37   :  { %904 = vmatpush2.msra.mxu0 %v281_v41  ;;  %1064 = vmatprep.subr.mxu1 %v378_v42  ;;  %v440_v33 = vld [vmem:[%s8213_s1 + $0x6f0] sm:$0xff]  ;;  %v539_v34 = vld [vmem:[%s8213_s1 + $0xa08] sm:$0xff]  ;;  %v438_v36 = vld [vmem:[%s8213_s1 + $0x6e0] sm:$0xff] }
  0x38   :  { %905 = vmatprep.subr.mxu0 %v279_v43  ;;  %1065 = vmatpush2.msra.mxu1 %v377_v44  ;;  %v537_v37 = vld [vmem:[%s8213_s1 + $0x9f8] sm:$0xff]  ;;  %v536_v40 = vld [vmem:[%s8213_s1 + $0x9f0] sm:$0xff]  ;;  %v435_v42 = vld [vmem:[%s8213_s1 + $0x6c8] sm:$0xff] }
  0x39   :  { %906 = vmatpush2.msra.mxu0 %v278_v45  ;;  %1066 = vmatprep.subr.mxu1 %v375_v46  ;;  %v65_v38 = vld [vmem:[%s8214_s0 + $0x138] sm:$0xff]  ;;  %v64_v41 = vld [vmem:[%s8214_s0 + $0x130] sm:$0xff]  ;;  %v534_v43 = vld [vmem:[%s8213_s1 + $0x9e0] sm:$0xff] }
  0x3a   :  { %907 = vmatprep.subr.mxu0 %v276_v47  ;;  %1067 = vmatpush2.msra.mxu1 %v374_v48  ;;  %v437_v39 = vld [vmem:[%s8213_s1 + $0x6d8] sm:$0xff]  ;;  %v75_v44 = vld [vmem:[%s8214_s0 + $0x188] sm:$0xff]  ;;  %v434_v45 = vld [vmem:[%s8213_s1 + $0x6c0] sm:$0xff] }
  0x3b   :  { %908 = vmatpush2.msra.mxu0 %v275_v49  ;;  %1068 = vmatprep.subr.mxu1 %v372_v50  ;;  %v533_v46 = vld [vmem:[%s8213_s1 + $0x9d8] sm:$0xff]  ;;  %v74_v47 = vld [vmem:[%s8214_s0 + $0x180] sm:$0xff]  ;;  %v432_v48 = vld [vmem:[%s8213_s1 + $0x6b0] sm:$0xff] }
  0x3c   :  { %909 = vmatprep.subr.mxu0 %v273_v51  ;;  %1069 = vmatpush2.msra.mxu1 %v371_v52  ;;  %v531_v49 = vld [vmem:[%s8213_s1 + $0x9c8] sm:$0xff]  ;;  %v77_v50 = vld [vmem:[%s8214_s0 + $0x198] sm:$0xff]  ;;  %v530_v52 = vld [vmem:[%s8213_s1 + $0x9c0] sm:$0xff] }
  0x3d   :  { %910 = vmatpush2.msra.mxu0 %v272_v53  ;;  %1070 = vmatprep.subr.mxu1 %v369_v54  ;;  %v431_v51 = vld [vmem:[%s8213_s1 + $0x6a8] sm:$0xff]  ;;  %v76_v53 = vld [vmem:[%s8214_s0 + $0x190] sm:$0xff]  ;;  %v429_v54 = vld [vmem:[%s8213_s1 + $0x698] sm:$0xff] }
  0x3e   :  { %911 = vmatprep.subr.mxu0 %v270_v55  ;;  %1071 = vmatpush2.msra.mxu1 %v368_v56  ;;  %v528_v55 = vld [vmem:[%s8213_s1 + $0x9b0] sm:$0xff]  ;;  %v87_v56 = vld [vmem:[%s8214_s0 + $0x1e8] sm:$0xff] }
  0x3f   :  { %912 = vmatpush2.msra.mxu0 %v269_v57  ;;  %1072 = vmatprep.subr.mxu1 %v366_v58  ;;  %v428_v57 = vld [vmem:[%s8213_s1 + $0x690] sm:$0xff]  ;;  %v527_v58 = vld [vmem:[%s8213_s1 + $0x9a8] sm:$0xff] }
  0x40   :  { %913 = vmatprep.subr.mxu0 %v267_v59  ;;  %915 = vmatprep.mubr.f32.mxu0 %v27_v60  ;;  %v86_v59 = vld [vmem:[%s8214_s0 + $0x1e0] sm:$0xff] }
  0x41   :  { %914 = vmatpush2.msra.mxu0 %v266_v61  ;;  %1073 = vmatpush2.msra.mxu1 %v365_v62  ;;  %v426_v60 = vld [vmem:[%s8213_s1 + $0x680] sm:$0xff]  ;;  %v525_v61 = vld [vmem:[%s8213_s1 + $0x998] sm:$0xff] }
  0x42   :  { %916 = vmatmul.mubr.f32.vlgmr.msra.gmra.mxu0 %v26_v63  ;;  %1074 = vmatprep.subr.mxu1 %v363_v0  ;;  %v89_v62 = vld [vmem:[%s8214_s0 + $0x1f8] sm:$0xff]  ;;  %v524_v0 = vld [vmem:[%s8213_s1 + $0x990] sm:$0xff] }
  0x43   :  { %1173 = vmatprep.subr.mxu0 %v456_v1  ;;  %1075 = vmatpush2.msra.mxu1 %v362_v2  ;;  %v425_v63 = vld [vmem:[%s8213_s1 + $0x678] sm:$0xff]  ;;  %v88_v1 = vld [vmem:[%s8214_s0 + $0x1f0] sm:$0xff]  ;;  %v423_v2 = vld [vmem:[%s8213_s1 + $0x668] sm:$0xff] }
  0x44   :  { %1076 = vmatprep.mubr.f32.mxu1 %v29_v3  ;;  %1174 = vmatpush1.msra.mxu0 %v455_v4  ;;  %v522_v3 = vld [vmem:[%s8213_s1 + $0x980] sm:$0xff]  ;;  %v99_v4 = vld [vmem:[%s8214_s0 + $0x248] sm:$0xff] }
  0x45   :  { %1077 = vmatmul.mubr.f32.vlgmr.msra.gmra.mxu1 %v28_v5  ;;  %1175 = vmatprep.subr.mxu0 %v453_v6  ;;  %v422_v5 = vld [vmem:[%s8213_s1 + $0x660] sm:$0xff]  ;;  %v521_v6 = vld [vmem:[%s8213_s1 + $0x978] sm:$0xff] }
  0x46   :  { %1334 = vmatprep.subr.mxu1 %v552_v7  ;;  %921 = vmatprep.mubr.f32.mxu0 %v39_v8  ;;  %v98_v7 = vld [vmem:[%s8214_s0 + $0x240] sm:$0xff]  ;;  %v420_v8 = vld [vmem:[%s8213_s1 + $0x650] sm:$0xff] }
  0x47   :  { %1176 = vmatpush1.msra.mxu0 %v452_v9  ;;  %1335 = vmatpush1.msra.mxu1 %v551_v10  ;;  %v519_v9 = vld [vmem:[%s8213_s1 + $0x968] sm:$0xff]  ;;  %v101_v10 = vld [vmem:[%s8214_s0 + $0x258] sm:$0xff] }
  0x48   :  { %922 = vmatmul.mubr.f32.gmra.mxu0 %v38_v11  ;;  %1177 = vmatprep.subr.mxu0 %v450_v12  ;;  %v419_v11 = vld [vmem:[%s8213_s1 + $0x648] sm:$0xff]  ;;  %v518_v12 = vld [vmem:[%s8213_s1 + $0x960] sm:$0xff] }
  0x49   :  { %1336 = vmatprep.subr.mxu1 %v549_v13  ;;  %1082 = vmatprep.mubr.f32.mxu1 %v41_v14  ;;  %v100_v13 = vld [vmem:[%s8214_s0 + $0x250] sm:$0xff]  ;;  %v417_v14 = vld [vmem:[%s8213_s1 + $0x638] sm:$0xff] }
  0x4a   :  { %1178 = vmatpush1.msra.mxu0 %v449_v15  ;;  %1337 = vmatpush1.msra.mxu1 %v548_v16  ;;  %v516_v15 = vld [vmem:[%s8213_s1 + $0x950] sm:$0xff]  ;;  %v111_v16 = vld [vmem:[%s8214_s0 + $0x2a8] sm:$0xff] }
  0x4b   :  { %1083 = vmatmul.mubr.f32.gmra.mxu1 %v40_v17  ;;  %1179 = vmatprep.subr.mxu0 %v447_v18  ;;  %v416_v17 = vld [vmem:[%s8213_s1 + $0x630] sm:$0xff]  ;;  %v515_v18 = vld [vmem:[%s8213_s1 + $0x948] sm:$0xff] }
  0x4c   :  { %1338 = vmatprep.subr.mxu1 %v546_v19  ;;  %927 = vmatprep.mubr.f32.mxu0 %v51_v20  ;;  %v110_v19 = vld [vmem:[%s8214_s0 + $0x2a0] sm:$0xff] }
  0x4d   :  { %1180 = vmatpush1.msra.mxu0 %v446_v21  ;;  %1339 = vmatpush1.msra.mxu1 %v545_v22  ;;  %v414_v20 = vld [vmem:[%s8213_s1 + $0x620] sm:$0xff]  ;;  %v513_v21 = vld [vmem:[%s8213_s1 + $0x938] sm:$0xff] }
  0x4e   :  { %928 = vmatmul.mubr.f32.gmra.mxu0 %v50_v23  ;;  %1181 = vmatprep.subr.mxu0 %v444_v24  ;;  %v113_v22 = vld [vmem:[%s8214_s0 + $0x2b8] sm:$0xff]  ;;  %v512_v24 = vld [vmem:[%s8213_s1 + $0x930] sm:$0xff] }
  0x4f   :  { %1340 = vmatprep.subr.mxu1 %v543_v25  ;;  %1088 = vmatprep.mubr.f32.mxu1 %v53_v26  ;;  %v413_v23 = vld [vmem:[%s8213_s1 + $0x618] sm:$0xff]  ;;  %v112_v25 = vld [vmem:[%s8214_s0 + $0x2b0] sm:$0xff]  ;;  %v411_v26 = vld [vmem:[%s8213_s1 + $0x608] sm:$0xff] }
  0x50   :  { %1182 = vmatpush1.msra.mxu0 %v443_v27  ;;  %1341 = vmatpush1.msra.mxu1 %v542_v28  ;;  %v510_v27 = vld [vmem:[%s8213_s1 + $0x920] sm:$0xff]  ;;  %v123_v28 = vld [vmem:[%s8214_s0 + $0x308] sm:$0xff] }
  0x51   :  { %1089 = vmatmul.mubr.f32.gmra.mxu1 %v52_v29  ;;  %1183 = vmatprep.subr.mxu0 %v441_v30  ;;  %v410_v29 = vld [vmem:[%s8213_s1 + $0x600] sm:$0xff]  ;;  %v509_v30 = vld [vmem:[%s8213_s1 + $0x918] sm:$0xff] }
  0x52   :  { %1342 = vmatprep.subr.mxu1 %v540_v31  ;;  %933 = vmatprep.mubr.f32.mxu0 %v63_v32  ;;  %v122_v31 = vld [vmem:[%s8214_s0 + $0x300] sm:$0xff]  ;;  %v504_v32 = vld [vmem:[%s8213_s1 + $0x8f0] sm:$0xff] }
  0x53   :  { %1184 = vmatpush1.msra.mxu0 %v440_v33  ;;  %1343 = vmatpush1.msra.mxu1 %v539_v34  ;;  %v507_v33 = vld [vmem:[%s8213_s1 + $0x908] sm:$0xff]  ;;  %v125_v34 = vld [vmem:[%s8214_s0 + $0x318] sm:$0xff] }
  0x54   :  { %934 = vmatmul.mubr.f32.gmra.mxu0 %v62_v35  ;;  %1185 = vmatprep.subr.mxu0 %v438_v36  ;;  %v503_v35 = vld [vmem:[%s8213_s1 + $0x8e8] sm:$0xff]  ;;  %v506_v36 = vld [vmem:[%s8213_s1 + $0x900] sm:$0xff] }
  0x55   :  { %1344 = vmatprep.subr.mxu1 %v537_v37  ;;  %1094 = vmatprep.mubr.f32.mxu1 %v65_v38  ;;  %v124_v37 = vld [vmem:[%s8214_s0 + $0x310] sm:$0xff]  ;;  %v501_v38 = vld [vmem:[%s8213_s1 + $0x8d8] sm:$0xff] }
  0x56   :  { %1186 = vmatpush1.msra.mxu0 %v437_v39  ;;  %1345 = vmatpush1.msra.mxu1 %v536_v40  ;;  %v600_v39 = vld [vmem:[%s8213_s1 + $0xbf0] sm:$0xff]  ;;  %v135_v40 = vld [vmem:[%s8214_s0 + $0x368] sm:$0xff] }
  0x57   :  { %1095 = vmatmul.mubr.f32.gmra.mxu1 %v64_v41  ;;  %1187 = vmatprep.subr.mxu0 %v435_v42  ;;  %v500_v41 = vld [vmem:[%s8213_s1 + $0x8d0] sm:$0xff]  ;;  %v599_v42 = vld [vmem:[%s8213_s1 + $0xbe8] sm:$0xff] }
  0x58   :  { %1346 = vmatprep.subr.mxu1 %v534_v43  ;;  %939 = vmatprep.mubr.f32.mxu0 %v75_v44  ;;  %v134_v43 = vld [vmem:[%s8214_s0 + $0x360] sm:$0xff] }
  0x59   :  { %1188 = vmatpush1.msra.mxu0 %v434_v45  ;;  %1347 = vmatpush1.msra.mxu1 %v533_v46  ;;  %v498_v44 = vld [vmem:[%s8213_s1 + $0x8c0] sm:$0xff]  ;;  %v597_v45 = vld [vmem:[%s8213_s1 + $0xbd8] sm:$0xff] }
  0x5a   :  { %940 = vmatmul.mubr.f32.gmra.mxu0 %v74_v47  ;;  %1189 = vmatprep.subr.mxu0 %v432_v48  ;;  %v137_v46 = vld [vmem:[%s8214_s0 + $0x378] sm:$0xff]  ;;  %v596_v48 = vld [vmem:[%s8213_s1 + $0xbd0] sm:$0xff] }
  0x5b   :  { %1348 = vmatprep.subr.mxu1 %v531_v49  ;;  %1100 = vmatprep.mubr.f32.mxu1 %v77_v50  ;;  %v497_v47 = vld [vmem:[%s8213_s1 + $0x8b8] sm:$0xff]  ;;  %v136_v49 = vld [vmem:[%s8214_s0 + $0x370] sm:$0xff]  ;;  %v495_v50 = vld [vmem:[%s8213_s1 + $0x8a8] sm:$0xff] }
  0x5c   :  { %1190 = vmatpush1.msra.mxu0 %v431_v51  ;;  %1349 = vmatpush1.msra.mxu1 %v530_v52  ;;  %v594_v51 = vld [vmem:[%s8213_s1 + $0xbc0] sm:$0xff]  ;;  %v147_v52 = vld [vmem:[%s8214_s0 + $0x3c8] sm:$0xff] }
  0x5d   :  { %1101 = vmatmul.mubr.f32.gmra.mxu1 %v76_v53  ;;  %1191 = vmatprep.subr.mxu0 %v429_v54  ;;  %v494_v53 = vld [vmem:[%s8213_s1 + $0x8a0] sm:$0xff]  ;;  %v593_v54 = vld [vmem:[%s8213_s1 + $0xbb8] sm:$0xff] }
  0x5e   :  { %1350 = vmatprep.subr.mxu1 %v528_v55  ;;  %945 = vmatprep.mubr.f32.mxu0 %v87_v56  ;;  %v146_v55 = vld [vmem:[%s8214_s0 + $0x3c0] sm:$0xff]  ;;  %v492_v56 = vld [vmem:[%s8213_s1 + $0x890] sm:$0xff] }
  0x5f   :  { %1192 = vmatpush1.msra.mxu0 %v428_v57  ;;  %1351 = vmatpush1.msra.mxu1 %v527_v58  ;;  %v591_v57 = vld [vmem:[%s8213_s1 + $0xba8] sm:$0xff]  ;;  %v149_v58 = vld [vmem:[%s8214_s0 + $0x3d8] sm:$0xff] }
  0x60   :  { %946 = vmatmul.mubr.f32.gmra.mxu0 %v86_v59  ;;  %1193 = vmatprep.subr.mxu0 %v426_v60  ;;  %v491_v59 = vld [vmem:[%s8213_s1 + $0x888] sm:$0xff]  ;;  %v590_v60 = vld [vmem:[%s8213_s1 + $0xba0] sm:$0xff] }
  0x61   :  { %1352 = vmatprep.subr.mxu1 %v525_v61  ;;  %1106 = vmatprep.mubr.f32.mxu1 %v89_v62  ;;  %v148_v61 = vld [vmem:[%s8214_s0 + $0x3d0] sm:$0xff]  ;;  %v489_v62 = vld [vmem:[%s8213_s1 + $0x878] sm:$0xff] }
  0x62   :  { %1194 = vmatpush1.msra.mxu0 %v425_v63  ;;  %1353 = vmatpush1.msra.mxu1 %v524_v0  ;;  %v588_v63 = vld [vmem:[%s8213_s1 + $0xb90] sm:$0xff]  ;;  %v159_v0 = vld [vmem:[%s8214_s0 + $0x428] sm:$0xff] }
  0x63   :  { %1107 = vmatmul.mubr.f32.gmra.mxu1 %v88_v1  ;;  %1195 = vmatprep.subr.mxu0 %v423_v2  ;;  %v488_v1 = vld [vmem:[%s8213_s1 + $0x870] sm:$0xff]  ;;  %v587_v2 = vld [vmem:[%s8213_s1 + $0xb88] sm:$0xff] }
  0x64   :  { %1354 = vmatprep.subr.mxu1 %v522_v3  ;;  %951 = vmatprep.mubr.f32.mxu0 %v99_v4  ;;  %v158_v3 = vld [vmem:[%s8214_s0 + $0x420] sm:$0xff] }
  0x65   :  { %1196 = vmatpush1.msra.mxu0 %v422_v5  ;;  %1355 = vmatpush1.msra.mxu1 %v521_v6  ;;  %v486_v4 = vld [vmem:[%s8213_s1 + $0x860] sm:$0xff]  ;;  %v585_v5 = vld [vmem:[%s8213_s1 + $0xb78] sm:$0xff] }
  0x66   :  { %952 = vmatmul.mubr.f32.gmra.mxu0 %v98_v7  ;;  %1197 = vmatprep.subr.mxu0 %v420_v8  ;;  %v161_v6 = vld [vmem:[%s8214_s0 + $0x438] sm:$0xff]  ;;  %v584_v8 = vld [vmem:[%s8213_s1 + $0xb70] sm:$0xff] }
  0x67   :  { %1356 = vmatprep.subr.mxu1 %v519_v9  ;;  %1112 = vmatprep.mubr.f32.mxu1 %v101_v10  ;;  %v485_v7 = vld [vmem:[%s8213_s1 + $0x858] sm:$0xff]  ;;  %v160_v9 = vld [vmem:[%s8214_s0 + $0x430] sm:$0xff]  ;;  %v483_v10 = vld [vmem:[%s8213_s1 + $0x848] sm:$0xff] }
  0x68   :  { %1198 = vmatpush1.msra.mxu0 %v419_v11  ;;  %1357 = vmatpush1.msra.mxu1 %v518_v12  ;;  %v582_v11 = vld [vmem:[%s8213_s1 + $0xb60] sm:$0xff]  ;;  %v171_v12 = vld [vmem:[%s8214_s0 + $0x488] sm:$0xff] }
  0x69   :  { %1113 = vmatmul.mubr.f32.gmra.mxu1 %v100_v13  ;;  %1199 = vmatprep.subr.mxu0 %v417_v14  ;;  %v482_v13 = vld [vmem:[%s8213_s1 + $0x840] sm:$0xff]  ;;  %v581_v14 = vld [vmem:[%s8213_s1 + $0xb58] sm:$0xff] }
  0x6a   :  { %1358 = vmatprep.subr.mxu1 %v516_v15  ;;  %957 = vmatprep.mubr.f32.mxu0 %v111_v16  ;;  %v170_v15 = vld [vmem:[%s8214_s0 + $0x480] sm:$0xff]  ;;  %v480_v16 = vld [vmem:[%s8213_s1 + $0x830] sm:$0xff] }
  0x6b   :  { %1200 = vmatpush1.msra.mxu0 %v416_v17  ;;  %1359 = vmatpush1.msra.mxu1 %v515_v18  ;;  %v579_v17 = vld [vmem:[%s8213_s1 + $0xb48] sm:$0xff]  ;;  %v173_v18 = vld [vmem:[%s8214_s0 + $0x498] sm:$0xff] }
  0x6c   :  { %958 = vmatmul.mubr.f32.gmra.mxu0 %v110_v19  ;;  %1201 = vmatprep.subr.mxu0 %v414_v20  ;;  %v479_v19 = vld [vmem:[%s8213_s1 + $0x828] sm:$0xff]  ;;  %v578_v20 = vld [vmem:[%s8213_s1 + $0xb40] sm:$0xff] }
  0x6d   :  { %1360 = vmatprep.subr.mxu1 %v513_v21  ;;  %1118 = vmatprep.mubr.f32.mxu1 %v113_v22  ;;  %v172_v21 = vld [vmem:[%s8214_s0 + $0x490] sm:$0xff]  ;;  %v477_v22 = vld [vmem:[%s8213_s1 + $0x818] sm:$0xff] }
  0x6e   :  { %1202 = vmatpush1.msra.mxu0 %v413_v23  ;;  %1361 = vmatpush1.msra.mxu1 %v512_v24  ;;  %v576_v23 = vld [vmem:[%s8213_s1 + $0xb30] sm:$0xff]  ;;  %v183_v24 = vld [vmem:[%s8214_s0 + $0x4e8] sm:$0xff] }
  0x6f   :  { %1119 = vmatmul.mubr.f32.gmra.mxu1 %v112_v25  ;;  %1203 = vmatprep.subr.mxu0 %v411_v26  ;;  %v476_v25 = vld [vmem:[%s8213_s1 + $0x810] sm:$0xff]  ;;  %v575_v26 = vld [vmem:[%s8213_s1 + $0xb28] sm:$0xff] }
  0x70   :  { %1362 = vmatprep.subr.mxu1 %v510_v27  ;;  %963 = vmatprep.mubr.f32.mxu0 %v123_v28  ;;  %v182_v27 = vld [vmem:[%s8214_s0 + $0x4e0] sm:$0xff] }
  0x71   :  { %1204 = vmatpush1.msra.mxu0 %v410_v29  ;;  %1363 = vmatpush1.msra.mxu1 %v509_v30  ;;  %v474_v28 = vld [vmem:[%s8213_s1 + $0x800] sm:$0xff]  ;;  %v573_v29 = vld [vmem:[%s8213_s1 + $0xb18] sm:$0xff] }
  0x72   :  { %964 = vmatmul.mubr.f32.gmra.mxu0 %v122_v31  ;;  %1205 = vmatprep.subr.mxu0 %v504_v32  ;;  %v185_v30 = vld [vmem:[%s8214_s0 + $0x4f8] sm:$0xff]  ;;  %v572_v32 = vld [vmem:[%s8213_s1 + $0xb10] sm:$0xff] }
  0x73   :  { %1364 = vmatprep.subr.mxu1 %v507_v33  ;;  %1124 = vmatprep.mubr.f32.mxu1 %v125_v34  ;;  %v473_v31 = vld [vmem:[%s8213_s1 + $0x7f8] sm:$0xff]  ;;  %v184_v33 = vld [vmem:[%s8214_s0 + $0x4f0] sm:$0xff]  ;;  %v471_v34 = vld [vmem:[%s8213_s1 + $0x7e8] sm:$0xff] }
  0x74   :  { %1206 = vmatpush2.msra.mxu0 %v503_v35  ;;  %1365 = vmatpush1.msra.mxu1 %v506_v36  ;;  %v570_v35 = vld [vmem:[%s8213_s1 + $0xb00] sm:$0xff]  ;;  %v195_v36 = vld [vmem:[%s8214_s0 + $0x548] sm:$0xff] }
  0x75   :  { %1125 = vmatmul.mubr.f32.gmra.mxu1 %v124_v37  ;;  %1207 = vmatprep.subr.mxu0 %v501_v38  ;;  %v470_v37 = vld [vmem:[%s8213_s1 + $0x7e0] sm:$0xff]  ;;  %v569_v38 = vld [vmem:[%s8213_s1 + $0xaf8] sm:$0xff] }
  0x76   :  { %1366 = vmatprep.subr.mxu1 %v600_v39  ;;  %969 = vmatprep.mubr.f32.mxu0 %v135_v40  ;;  %v194_v39 = vld [vmem:[%s8214_s0 + $0x540] sm:$0xff]  ;;  %v468_v40 = vld [vmem:[%s8213_s1 + $0x7d0] sm:$0xff] }
  0x77   :  { %1208 = vmatpush2.msra.mxu0 %v500_v41  ;;  %1367 = vmatpush2.msra.mxu1 %v599_v42  ;;  %v567_v41 = vld [vmem:[%s8213_s1 + $0xae8] sm:$0xff]  ;;  %v197_v42 = vld [vmem:[%s8214_s0 + $0x558] sm:$0xff] }
  0x78   :  { %970 = vmatmul.mubr.f32.gmra.mxu0 %v134_v43  ;;  %1209 = vmatprep.subr.mxu0 %v498_v44  ;;  %v467_v43 = vld [vmem:[%s8213_s1 + $0x7c8] sm:$0xff]  ;;  %v566_v44 = vld [vmem:[%s8213_s1 + $0xae0] sm:$0xff] }
  0x79   :  { %1368 = vmatprep.subr.mxu1 %v597_v45  ;;  %1130 = vmatprep.mubr.f32.mxu1 %v137_v46  ;;  %v196_v45 = vld [vmem:[%s8214_s0 + $0x550] sm:$0xff]  ;;  %v465_v46 = vld [vmem:[%s8213_s1 + $0x7b8] sm:$0xff] }
  0x7a   :  { %1210 = vmatpush2.msra.mxu0 %v497_v47  ;;  %1369 = vmatpush2.msra.mxu1 %v596_v48  ;;  %v564_v47 = vld [vmem:[%s8213_s1 + $0xad0] sm:$0xff]  ;;  %v207_v48 = vld [vmem:[%s8214_s0 + $0x5a8] sm:$0xff] }
  0x7b   :  { %1131 = vmatmul.mubr.f32.gmra.mxu1 %v136_v49  ;;  %1211 = vmatprep.subr.mxu0 %v495_v50  ;;  %v464_v49 = vld [vmem:[%s8213_s1 + $0x7b0] sm:$0xff]  ;;  %v563_v50 = vld [vmem:[%s8213_s1 + $0xac8] sm:$0xff] }
  0x7c   :  { %1370 = vmatprep.subr.mxu1 %v594_v51  ;;  %975 = vmatprep.mubr.f32.mxu0 %v147_v52  ;;  %v206_v51 = vld [vmem:[%s8214_s0 + $0x5a0] sm:$0xff] }
  0x7d   :  { %1212 = vmatpush2.msra.mxu0 %v494_v53  ;;  %1371 = vmatpush2.msra.mxu1 %v593_v54  ;;  %v462_v52 = vld [vmem:[%s8213_s1 + $0x7a0] sm:$0xff]  ;;  %v561_v53 = vld [vmem:[%s8213_s1 + $0xab8] sm:$0xff] }
  0x7e   :  { %976 = vmatmul.mubr.f32.gmra.mxu0 %v146_v55  ;;  %1213 = vmatprep.subr.mxu0 %v492_v56  ;;  %v209_v54 = vld [vmem:[%s8214_s0 + $0x5b8] sm:$0xff]  ;;  %v560_v56 = vld [vmem:[%s8213_s1 + $0xab0] sm:$0xff] }
  0x7f   :  { %1372 = vmatprep.subr.mxu1 %v591_v57  ;;  %1136 = vmatprep.mubr.f32.mxu1 %v149_v58  ;;  %v461_v55 = vld [vmem:[%s8213_s1 + $0x798] sm:$0xff]  ;;  %v208_v57 = vld [vmem:[%s8214_s0 + $0x5b0] sm:$0xff]  ;;  %v459_v58 = vld [vmem:[%s8213_s1 + $0x788] sm:$0xff] }
  0x80   :  { %1214 = vmatpush2.msra.mxu0 %v491_v59  ;;  %1373 = vmatpush2.msra.mxu1 %v590_v60  ;;  %v558_v59 = vld [vmem:[%s8213_s1 + $0xaa0] sm:$0xff] }
  0x81   :  { %1137 = vmatmul.mubr.f32.gmra.mxu1 %v148_v61  ;;  %1215 = vmatprep.subr.mxu0 %v489_v62  ;;  %v458_v60 = vld [vmem:[%s8213_s1 + $0x780] sm:$0xff]  ;;  %v31_v61 = vld [vmem:[%s8214_s0 + $0x28] sm:$0xff]  ;;  %v557_v62 = vld [vmem:[%s8213_s1 + $0xa98] sm:$0xff] }
  0x82   :  { %1374 = vmatprep.subr.mxu1 %v588_v63  ;;  %981 = vmatprep.mubr.f32.mxu0 %v159_v0  ;;  %v30_v63 = vld [vmem:[%s8214_s0 + $0x20] sm:$0xff]  ;;  %v555_v0 = vld [vmem:[%s8213_s1 + $0xa88] sm:$0xff] }
  0x83   :  { %1216 = vmatpush2.msra.mxu0 %v488_v1  ;;  %1375 = vmatpush2.msra.mxu1 %v587_v2  ;;  %v648_v1 = vld [vmem:[%s8213_s1 + $0xd70] sm:$0xff]  ;;  %v554_v2 = vld [vmem:[%s8213_s1 + $0xa80] sm:$0xff] }
  0x84   :  { %982 = vmatmul.mubr.f32.gmra.mxu0 %v158_v3  ;;  %1217 = vmatprep.subr.mxu0 %v486_v4  ;;  %v33_v3 = vld [vmem:[%s8214_s0 + $0x38] sm:$0xff]  ;;  %v647_v4 = vld [vmem:[%s8213_s1 + $0xd68] sm:$0xff] }
  0x85   :  { %1376 = vmatprep.subr.mxu1 %v585_v5  ;;  %1142 = vmatprep.mubr.f32.mxu1 %v161_v6  ;;  %v32_v5 = vld [vmem:[%s8214_s0 + $0x30] sm:$0xff]  ;;  %v645_v6 = vld [vmem:[%s8213_s1 + $0xd58] sm:$0xff] }
  0x86   :  { %1218 = vmatpush2.msra.mxu0 %v485_v7  ;;  %1377 = vmatpush2.msra.mxu1 %v584_v8  ;;  %v43_v7 = vld [vmem:[%s8214_s0 + $0x88] sm:$0xff]  ;;  %v644_v8 = vld [vmem:[%s8213_s1 + $0xd50] sm:$0xff] }
  0x87   :  { %1143 = vmatmul.mubr.f32.gmra.mxu1 %v160_v9  ;;  %1219 = vmatprep.subr.mxu0 %v483_v10  ;;  %v42_v9 = vld [vmem:[%s8214_s0 + $0x80] sm:$0xff] }
  0x88   :  { %1378 = vmatprep.subr.mxu1 %v582_v11  ;;  %987 = vmatprep.mubr.f32.mxu0 %v171_v12  ;;  %v642_v10 = vld [vmem:[%s8213_s1 + $0xd40] sm:$0xff]  ;;  %v45_v11 = vld [vmem:[%s8214_s0 + $0x98] sm:$0xff] }
  0x89   :  { %1220 = vmatpush2.msra.mxu0 %v482_v13  ;;  %1379 = vmatpush2.msra.mxu1 %v581_v14  ;;  %v641_v12 = vld [vmem:[%s8213_s1 + $0xd38] sm:$0xff]  ;;  %v44_v13 = vld [vmem:[%s8214_s0 + $0x90] sm:$0xff]  ;;  %v639_v14 = vld [vmem:[%s8213_s1 + $0xd28] sm:$0xff] }
  0x8a   :  { %988 = vmatmul.mubr.f32.gmra.mxu0 %v170_v15  ;;  %1221 = vmatprep.subr.mxu0 %v480_v16  ;;  %v744_v15 = vld [vmem:[%s8213_s1 + $0x1070] sm:$0xff]  ;;  %v55_v16 = vld [vmem:[%s8214_s0 + $0xe8] sm:$0xff] }
  0x8b   :  { %1380 = vmatprep.subr.mxu1 %v579_v17  ;;  %1148 = vmatprep.mubr.f32.mxu1 %v173_v18  ;;  %v638_v17 = vld [vmem:[%s8213_s1 + $0xd20] sm:$0xff]  ;;  %v743_v18 = vld [vmem:[%s8213_s1 + $0x1068] sm:$0xff] }
  0x8c   :  { %1222 = vmatpush2.msra.mxu0 %v479_v19  ;;  %1381 = vmatpush2.msra.mxu1 %v578_v20  ;;  %v54_v19 = vld [vmem:[%s8214_s0 + $0xe0] sm:$0xff]  ;;  %v636_v20 = vld [vmem:[%s8213_s1 + $0xd10] sm:$0xff] }
  0x8d   :  { %1149 = vmatmul.mubr.f32.gmra.mxu1 %v172_v21  ;;  %1223 = vmatprep.subr.mxu0 %v477_v22  ;;  %v57_v21 = vld [vmem:[%s8214_s0 + $0xf8] sm:$0xff]  ;;  %v635_v22 = vld [vmem:[%s8213_s1 + $0xd08] sm:$0xff] }
  0x8e   :  { %1382 = vmatprep.subr.mxu1 %v576_v23  ;;  %993 = vmatprep.mubr.f32.mxu0 %v183_v24  ;;  %v741_v23 = vld [vmem:[%s8213_s1 + $0x1058] sm:$0xff]  ;;  %v56_v24 = vld [vmem:[%s8214_s0 + $0xf0] sm:$0xff] }
  0x8f   :  { %1224 = vmatpush2.msra.mxu0 %v476_v25  ;;  %1383 = vmatpush2.msra.mxu1 %v575_v26  ;;  %v633_v25 = vld [vmem:[%s8213_s1 + $0xcf8] sm:$0xff]  ;;  %v740_v26 = vld [vmem:[%s8213_s1 + $0x1050] sm:$0xff] }
  0x90   :  { %994 = vmatmul.mubr.f32.gmra.mxu0 %v182_v27  ;;  %1225 = vmatprep.subr.mxu0 %v474_v28  ;;  %v67_v27 = vld [vmem:[%s8214_s0 + $0x148] sm:$0xff]  ;;  %v632_v28 = vld [vmem:[%s8213_s1 + $0xcf0] sm:$0xff] }
  0x91   :  { %1384 = vmatprep.subr.mxu1 %v573_v29  ;;  %1154 = vmatprep.mubr.f32.mxu1 %v185_v30  ;;  %v738_v29 = vld [vmem:[%s8213_s1 + $0x1040] sm:$0xff] }
  0x92   :  { %1226 = vmatpush2.msra.mxu0 %v473_v31  ;;  %1385 = vmatpush2.msra.mxu1 %v572_v32  ;;  %v66_v30 = vld [vmem:[%s8214_s0 + $0x140] sm:$0xff]  ;;  %v737_v32 = vld [vmem:[%s8213_s1 + $0x1038] sm:$0xff] }
  0x93   :  { %1155 = vmatmul.mubr.f32.gmra.mxu1 %v184_v33  ;;  %1227 = vmatprep.subr.mxu0 %v471_v34  ;;  %v630_v31 = vld [vmem:[%s8213_s1 + $0xce0] sm:$0xff]  ;;  %v69_v33 = vld [vmem:[%s8214_s0 + $0x158] sm:$0xff] }
  0x94   :  { %1386 = vmatprep.subr.mxu1 %v570_v35  ;;  %999 = vmatprep.mubr.f32.mxu0 %v195_v36  ;;  %v629_v34 = vld [vmem:[%s8213_s1 + $0xcd8] sm:$0xff]  ;;  %v735_v35 = vld [vmem:[%s8213_s1 + $0x1028] sm:$0xff]  ;;  %v68_v36 = vld [vmem:[%s8214_s0 + $0x150] sm:$0xff] }
  0x95   :  { %1228 = vmatpush2.msra.mxu0 %v470_v37  ;;  %1387 = vmatpush2.msra.mxu1 %v569_v38  ;;  %v627_v37 = vld [vmem:[%s8213_s1 + $0xcc8] sm:$0xff]  ;;  %v734_v38 = vld [vmem:[%s8213_s1 + $0x1020] sm:$0xff] }
  0x96   :  { %1000 = vmatmul.mubr.f32.gmra.mxu0 %v194_v39  ;;  %1229 = vmatprep.subr.mxu0 %v468_v40  ;;  %v79_v39 = vld [vmem:[%s8214_s0 + $0x1a8] sm:$0xff]  ;;  %v626_v40 = vld [vmem:[%s8213_s1 + $0xcc0] sm:$0xff] }
  0x97   :  { %1388 = vmatprep.subr.mxu1 %v567_v41  ;;  %1160 = vmatprep.mubr.f32.mxu1 %v197_v42  ;;  %v732_v41 = vld [vmem:[%s8213_s1 + $0x1010] sm:$0xff]  ;;  %v78_v42 = vld [vmem:[%s8214_s0 + $0x1a0] sm:$0xff] }
  0x98   :  { %1230 = vmatpush2.msra.mxu0 %v467_v43  ;;  %1389 = vmatpush2.msra.mxu1 %v566_v44  ;;  %v624_v43 = vld [vmem:[%s8213_s1 + $0xcb0] sm:$0xff]  ;;  %v731_v44 = vld [vmem:[%s8213_s1 + $0x1008] sm:$0xff] }
  0x99   :  { %1161 = vmatmul.mubr.f32.gmra.mxu1 %v196_v45  ;;  %1231 = vmatprep.subr.mxu0 %v465_v46  ;;  %v81_v45 = vld [vmem:[%s8214_s0 + $0x1b8] sm:$0xff]  ;;  %v623_v46 = vld [vmem:[%s8213_s1 + $0xca8] sm:$0xff] }
  0x9a   :  { %1390 = vmatprep.subr.mxu1 %v564_v47  ;;  %1005 = vmatprep.mubr.f32.mxu0 %v207_v48  ;;  %v80_v47 = vld [vmem:[%s8214_s0 + $0x1b0] sm:$0xff]  ;;  %v621_v48 = vld [vmem:[%s8213_s1 + $0xc98] sm:$0xff] }
  0x9b   :  { %1232 = vmatpush2.msra.mxu0 %v464_v49  ;;  %1391 = vmatpush2.msra.mxu1 %v563_v50  ;;  %v729_v49 = vld [vmem:[%s8213_s1 + $0xff8] sm:$0xff]  ;;  %v91_v50 = vld [vmem:[%s8214_s0 + $0x208] sm:$0xff] }
  0x9c   :  { %1006 = vmatmul.mubr.f32.gmra.mxu0 %v206_v51  ;;  %1233 = vmatprep.subr.mxu0 %v462_v52  ;;  %v620_v51 = vld [vmem:[%s8213_s1 + $0xc90] sm:$0xff] }
  0x9d   :  { %1392 = vmatprep.subr.mxu1 %v561_v53  ;;  %1166 = vmatprep.mubr.f32.mxu1 %v209_v54  ;;  %v728_v52 = vld [vmem:[%s8213_s1 + $0xff0] sm:$0xff]  ;;  %v90_v53 = vld [vmem:[%s8214_s0 + $0x200] sm:$0xff] }
  0x9e   :  { %1234 = vmatpush2.msra.mxu0 %v461_v55  ;;  %1393 = vmatpush2.msra.mxu1 %v560_v56  ;;  %v618_v54 = vld [vmem:[%s8213_s1 + $0xc80] sm:$0xff]  ;;  %v93_v56 = vld [vmem:[%s8214_s0 + $0x218] sm:$0xff] }
  0x9f   :  { %1167 = vmatmul.mubr.f32.gmra.mxu1 %v208_v57  ;;  %1235 = vmatprep.subr.mxu0 %v459_v58  ;;  %v726_v55 = vld [vmem:[%s8213_s1 + $0xfe0] sm:$0xff]  ;;  %v617_v57 = vld [vmem:[%s8213_s1 + $0xc78] sm:$0xff] }
  0xa0   :  { %1394 = vmatprep.subr.mxu1 %v558_v59  ;;  %1236 = vmatpush2.msra.mxu0 %v458_v60  ;;  %v725_v58 = vld [vmem:[%s8213_s1 + $0xfd8] sm:$0xff]  ;;  %v92_v59 = vld [vmem:[%s8214_s0 + $0x210] sm:$0xff]  ;;  %v615_v60 = vld [vmem:[%s8213_s1 + $0xc68] sm:$0xff] }
  0xa1   :  { %1237 = vmatprep.mubr.f32.mxu0 %v31_v61  ;;  %1395 = vmatpush2.msra.mxu1 %v557_v62  ;;  %v723_v61 = vld [vmem:[%s8213_s1 + $0xfc8] sm:$0xff] }
  0xa2   :  { %1238 = vmatmul.mubr.f32.vlgmr.msra.gmra.mxu0 %v30_v63  ;;  %1396 = vmatprep.subr.mxu1 %v555_v0  ;;  %v103_v62 = vld [vmem:[%s8214_s0 + $0x268] sm:$0xff]  ;;  %v614_v63 = vld [vmem:[%s8213_s1 + $0xc60] sm:$0xff] }
  0xa3   :  { %1495 = vmatprep.subr.mxu0 %v648_v1  ;;  %1397 = vmatpush2.msra.mxu1 %v554_v2  ;;  %v722_v0 = vld [vmem:[%s8213_s1 + $0xfc0] sm:$0xff]  ;;  %v612_v2 = vld [vmem:[%s8213_s1 + $0xc50] sm:$0xff] }
  0xa4   :  { %1398 = vmatprep.mubr.f32.mxu1 %v33_v3  ;;  %1496 = vmatpush1.msra.mxu0 %v647_v4  ;;  %v102_v1 = vld [vmem:[%s8214_s0 + $0x260] sm:$0xff]  ;;  %v720_v3 = vld [vmem:[%s8213_s1 + $0xfb0] sm:$0xff]  ;;  %v105_v4 = vld [vmem:[%s8214_s0 + $0x278] sm:$0xff] }
  0xa5   :  { %1399 = vmatmul.mubr.f32.vlgmr.msra.gmra.mxu1 %v32_v5  ;;  %1497 = vmatprep.subr.mxu0 %v645_v6  ;;  %v611_v5 = vld [vmem:[%s8213_s1 + $0xc48] sm:$0xff] }
  0xa6   :  { %1243 = vmatprep.mubr.f32.mxu0 %v43_v7  ;;  %1498 = vmatpush1.msra.mxu0 %v644_v8  ;;  %v719_v6 = vld [vmem:[%s8213_s1 + $0xfa8] sm:$0xff]  ;;  %v104_v7 = vld [vmem:[%s8214_s0 + $0x270] sm:$0xff]  ;;  %v609_v8 = vld [vmem:[%s8213_s1 + $0xc38] sm:$0xff] }
  0xa7   :  { %1244 = vmatmul.mubr.f32.gmra.mxu0 %v42_v9  ;;  %1499 = vmatprep.subr.mxu0 %v642_v10  ;;  %v717_v9 = vld [vmem:[%s8213_s1 + $0xf98] sm:$0xff]  ;;  %v115_v10 = vld [vmem:[%s8214_s0 + $0x2c8] sm:$0xff] }
  0xa8   :  { %1404 = vmatprep.mubr.f32.mxu1 %v45_v11  ;;  %1500 = vmatpush1.msra.mxu0 %v641_v12  ;;  %v608_v11 = vld [vmem:[%s8213_s1 + $0xc30] sm:$0xff] }
  0xa9   :  { %1405 = vmatmul.mubr.f32.gmra.mxu1 %v44_v13  ;;  %1501 = vmatprep.subr.mxu0 %v639_v14  ;;  %v716_v12 = vld [vmem:[%s8213_s1 + $0xf90] sm:$0xff]  ;;  %v114_v13 = vld [vmem:[%s8214_s0 + $0x2c0] sm:$0xff] }
  0xaa   :  { %1656 = vmatprep.subr.mxu1 %v744_v15  ;;  %1249 = vmatprep.mubr.f32.mxu0 %v55_v16  ;;  %v606_v14 = vld [vmem:[%s8213_s1 + $0xc20] sm:$0xff]  ;;  %v117_v16 = vld [vmem:[%s8214_s0 + $0x2d8] sm:$0xff] }
  0xab   :  { %1502 = vmatpush1.msra.mxu0 %v638_v17  ;;  %1657 = vmatpush1.msra.mxu1 %v743_v18  ;;  %v714_v15 = vld [vmem:[%s8213_s1 + $0xf80] sm:$0xff]  ;;  %v605_v17 = vld [vmem:[%s8213_s1 + $0xc18] sm:$0xff] }
  0xac   :  { %1250 = vmatmul.mubr.f32.gmra.mxu0 %v54_v19  ;;  %1503 = vmatprep.subr.mxu0 %v636_v20  ;;  %v713_v18 = vld [vmem:[%s8213_s1 + $0xf78] sm:$0xff]  ;;  %v116_v19 = vld [vmem:[%s8214_s0 + $0x2d0] sm:$0xff]  ;;  %v603_v20 = vld [vmem:[%s8213_s1 + $0xc08] sm:$0xff] }
  0xad   :  { %1410 = vmatprep.mubr.f32.mxu1 %v57_v21  ;;  %1504 = vmatpush1.msra.mxu0 %v635_v22  ;;  %v711_v21 = vld [vmem:[%s8213_s1 + $0xf68] sm:$0xff] }
  0xae   :  { %1658 = vmatprep.subr.mxu1 %v741_v23  ;;  %1411 = vmatmul.mubr.f32.gmra.mxu1 %v56_v24  ;;  %v127_v22 = vld [vmem:[%s8214_s0 + $0x328] sm:$0xff]  ;;  %v602_v23 = vld [vmem:[%s8213_s1 + $0xc00] sm:$0xff] }
  0xaf   :  { %1505 = vmatprep.subr.mxu0 %v633_v25  ;;  %1659 = vmatpush1.msra.mxu1 %v740_v26  ;;  %v710_v24 = vld [vmem:[%s8213_s1 + $0xf60] sm:$0xff]  ;;  %v696_v26 = vld [vmem:[%s8213_s1 + $0xef0] sm:$0xff] }
  0xb0   :  { %1255 = vmatprep.mubr.f32.mxu0 %v67_v27  ;;  %1506 = vmatpush1.msra.mxu0 %v632_v28  ;;  %v126_v25 = vld [vmem:[%s8214_s0 + $0x320] sm:$0xff]  ;;  %v708_v27 = vld [vmem:[%s8213_s1 + $0xf50] sm:$0xff]  ;;  %v129_v28 = vld [vmem:[%s8214_s0 + $0x338] sm:$0xff] }
  0xb1   :  { %1660 = vmatprep.subr.mxu1 %v738_v29  ;;  %1256 = vmatmul.mubr.f32.gmra.mxu0 %v66_v30  ;;  %v695_v29 = vld [vmem:[%s8213_s1 + $0xee8] sm:$0xff] }
  0xb2   :  { %1507 = vmatprep.subr.mxu0 %v630_v31  ;;  %1661 = vmatpush1.msra.mxu1 %v737_v32  ;;  %v707_v30 = vld [vmem:[%s8213_s1 + $0xf48] sm:$0xff]  ;;  %v128_v31 = vld [vmem:[%s8214_s0 + $0x330] sm:$0xff]  ;;  %v693_v32 = vld [vmem:[%s8213_s1 + $0xed8] sm:$0xff] }
  0xb3   :  { %1416 = vmatprep.mubr.f32.mxu1 %v69_v33  ;;  %1508 = vmatpush1.msra.mxu0 %v629_v34  ;;  %v705_v33 = vld [vmem:[%s8213_s1 + $0xf38] sm:$0xff]  ;;  %v139_v34 = vld [vmem:[%s8214_s0 + $0x388] sm:$0xff] }
  0xb4   :  { %1662 = vmatprep.subr.mxu1 %v735_v35  ;;  %1417 = vmatmul.mubr.f32.gmra.mxu1 %v68_v36  ;;  %v692_v35 = vld [vmem:[%s8213_s1 + $0xed0] sm:$0xff] }
  0xb5   :  { %1509 = vmatprep.subr.mxu0 %v627_v37  ;;  %1663 = vmatpush1.msra.mxu1 %v734_v38  ;;  %v704_v36 = vld [vmem:[%s8213_s1 + $0xf30] sm:$0xff]  ;;  %v138_v37 = vld [vmem:[%s8214_s0 + $0x380] sm:$0xff] }
  0xb6   :  { %1261 = vmatprep.mubr.f32.mxu0 %v79_v39  ;;  %1510 = vmatpush1.msra.mxu0 %v626_v40  ;;  %v690_v38 = vld [vmem:[%s8213_s1 + $0xec0] sm:$0xff]  ;;  %v141_v40 = vld [vmem:[%s8214_s0 + $0x398] sm:$0xff] }
  0xb7   :  { %1664 = vmatprep.subr.mxu1 %v732_v41  ;;  %1262 = vmatmul.mubr.f32.gmra.mxu0 %v78_v42  ;;  %v702_v39 = vld [vmem:[%s8213_s1 + $0xf20] sm:$0xff]  ;;  %v689_v41 = vld [vmem:[%s8213_s1 + $0xeb8] sm:$0xff] }
  0xb8   :  { %1511 = vmatprep.subr.mxu0 %v624_v43  ;;  %1665 = vmatpush1.msra.mxu1 %v731_v44  ;;  %v701_v42 = vld [vmem:[%s8213_s1 + $0xf18] sm:$0xff]  ;;  %v140_v43 = vld [vmem:[%s8214_s0 + $0x390] sm:$0xff]  ;;  %v687_v44 = vld [vmem:[%s8213_s1 + $0xea8] sm:$0xff] }
  0xb9   :  { %1422 = vmatprep.mubr.f32.mxu1 %v81_v45  ;;  %1512 = vmatpush1.msra.mxu0 %v623_v46  ;;  %v699_v45 = vld [vmem:[%s8213_s1 + $0xf08] sm:$0xff] }
  0xba   :  { %1423 = vmatmul.mubr.f32.gmra.mxu1 %v80_v47  ;;  %1513 = vmatprep.subr.mxu0 %v621_v48  ;;  %v151_v46 = vld [vmem:[%s8214_s0 + $0x3e8] sm:$0xff]  ;;  %v686_v47 = vld [vmem:[%s8213_s1 + $0xea0] sm:$0xff] }
  0xbb   :  { %1666 = vmatprep.subr.mxu1 %v729_v49  ;;  %1267 = vmatprep.mubr.f32.mxu0 %v91_v50  ;;  %v698_v48 = vld [vmem:[%s8213_s1 + $0xf00] sm:$0xff]  ;;  %v684_v50 = vld [vmem:[%s8213_s1 + $0xe90] sm:$0xff] }
  0xbc   :  { %1514 = vmatpush1.msra.mxu0 %v620_v51  ;;  %1667 = vmatpush1.msra.mxu1 %v728_v52  ;;  %v150_v49 = vld [vmem:[%s8214_s0 + $0x3e0] sm:$0xff]  ;;  %v783_v51 = vld [vmem:[%s8213_s1 + $0x11a8] sm:$0xff]  ;;  %v153_v52 = vld [vmem:[%s8214_s0 + $0x3f8] sm:$0xff] }
  0xbd   :  { %1268 = vmatmul.mubr.f32.gmra.mxu0 %v90_v53  ;;  %1515 = vmatprep.subr.mxu0 %v618_v54  ;;  %v683_v53 = vld [vmem:[%s8213_s1 + $0xe88] sm:$0xff]  ;;  %v782_v54 = vld [vmem:[%s8213_s1 + $0x11a0] sm:$0xff] }
  0xbe   :  { %1668 = vmatprep.subr.mxu1 %v726_v55  ;;  %1428 = vmatprep.mubr.f32.mxu1 %v93_v56  ;;  %v152_v55 = vld [vmem:[%s8214_s0 + $0x3f0] sm:$0xff]  ;;  %v681_v56 = vld [vmem:[%s8213_s1 + $0xe78] sm:$0xff] }
  0xbf   :  { %1516 = vmatpush1.msra.mxu0 %v617_v57  ;;  %1669 = vmatpush1.msra.mxu1 %v725_v58  ;;  %v780_v57 = vld [vmem:[%s8213_s1 + $0x1190] sm:$0xff]  ;;  %v163_v58 = vld [vmem:[%s8214_s0 + $0x448] sm:$0xff] }
  0xc0   :  { %1429 = vmatmul.mubr.f32.gmra.mxu1 %v92_v59  ;;  %1517 = vmatprep.subr.mxu0 %v615_v60  ;;  %v680_v59 = vld [vmem:[%s8213_s1 + $0xe70] sm:$0xff]  ;;  %v779_v60 = vld [vmem:[%s8213_s1 + $0x1188] sm:$0xff] }
  0xc1   :  { %1670 = vmatprep.subr.mxu1 %v723_v61  ;;  %1273 = vmatprep.mubr.f32.mxu0 %v103_v62  ;;  %v162_v61 = vld [vmem:[%s8214_s0 + $0x440] sm:$0xff] }
  0xc2   :  { %1518 = vmatpush1.msra.mxu0 %v614_v63  ;;  %1671 = vmatpush1.msra.mxu1 %v722_v0  ;;  %v678_v62 = vld [vmem:[%s8213_s1 + $0xe60] sm:$0xff]  ;;  %v777_v63 = vld [vmem:[%s8213_s1 + $0x1178] sm:$0xff] }
  0xc3   :  { %1274 = vmatmul.mubr.f32.gmra.mxu0 %v102_v1  ;;  %1519 = vmatprep.subr.mxu0 %v612_v2  ;;  %v165_v0 = vld [vmem:[%s8214_s0 + $0x458] sm:$0xff]  ;;  %v776_v2 = vld [vmem:[%s8213_s1 + $0x1170] sm:$0xff] }
  0xc4   :  { %1672 = vmatprep.subr.mxu1 %v720_v3  ;;  %1434 = vmatprep.mubr.f32.mxu1 %v105_v4  ;;  %v677_v1 = vld [vmem:[%s8213_s1 + $0xe58] sm:$0xff]  ;;  %v164_v3 = vld [vmem:[%s8214_s0 + $0x450] sm:$0xff]  ;;  %v675_v4 = vld [vmem:[%s8213_s1 + $0xe48] sm:$0xff] }
  0xc5   :  { %1520 = vmatpush1.msra.mxu0 %v611_v5  ;;  %1673 = vmatpush1.msra.mxu1 %v719_v6  ;;  %v774_v5 = vld [vmem:[%s8213_s1 + $0x1160] sm:$0xff]  ;;  %v175_v6 = vld [vmem:[%s8214_s0 + $0x4a8] sm:$0xff] }
  0xc6   :  { %1435 = vmatmul.mubr.f32.gmra.mxu1 %v104_v7  ;;  %1521 = vmatprep.subr.mxu0 %v609_v8  ;;  %v674_v7 = vld [vmem:[%s8213_s1 + $0xe40] sm:$0xff]  ;;  %v773_v8 = vld [vmem:[%s8213_s1 + $0x1158] sm:$0xff] }
  0xc7   :  { %1674 = vmatprep.subr.mxu1 %v717_v9  ;;  %1279 = vmatprep.mubr.f32.mxu0 %v115_v10  ;;  %v174_v9 = vld [vmem:[%s8214_s0 + $0x4a0] sm:$0xff]  ;;  %v672_v10 = vld [vmem:[%s8213_s1 + $0xe30] sm:$0xff] }
  0xc8   :  { %1522 = vmatpush1.msra.mxu0 %v608_v11  ;;  %1675 = vmatpush1.msra.mxu1 %v716_v12  ;;  %v771_v11 = vld [vmem:[%s8213_s1 + $0x1148] sm:$0xff]  ;;  %v177_v12 = vld [vmem:[%s8214_s0 + $0x4b8] sm:$0xff] }
  0xc9   :  { %1280 = vmatmul.mubr.f32.gmra.mxu0 %v114_v13  ;;  %1523 = vmatprep.subr.mxu0 %v606_v14  ;;  %v671_v13 = vld [vmem:[%s8213_s1 + $0xe28] sm:$0xff]  ;;  %v770_v14 = vld [vmem:[%s8213_s1 + $0x1140] sm:$0xff] }
  0xca   :  { %1676 = vmatprep.subr.mxu1 %v714_v15  ;;  %1440 = vmatprep.mubr.f32.mxu1 %v117_v16  ;;  %v176_v15 = vld [vmem:[%s8214_s0 + $0x4b0] sm:$0xff]  ;;  %v669_v16 = vld [vmem:[%s8213_s1 + $0xe18] sm:$0xff] }
  0xcb   :  { %1524 = vmatpush1.msra.mxu0 %v605_v17  ;;  %1677 = vmatpush1.msra.mxu1 %v713_v18  ;;  %v768_v17 = vld [vmem:[%s8213_s1 + $0x1130] sm:$0xff]  ;;  %v187_v18 = vld [vmem:[%s8214_s0 + $0x508] sm:$0xff] }
  0xcc   :  { %1441 = vmatmul.mubr.f32.gmra.mxu1 %v116_v19  ;;  %1525 = vmatprep.subr.mxu0 %v603_v20  ;;  %v668_v19 = vld [vmem:[%s8213_s1 + $0xe10] sm:$0xff]  ;;  %v767_v20 = vld [vmem:[%s8213_s1 + $0x1128] sm:$0xff] }
  0xcd   :  { %1678 = vmatprep.subr.mxu1 %v711_v21  ;;  %1285 = vmatprep.mubr.f32.mxu0 %v127_v22  ;;  %v186_v21 = vld [vmem:[%s8214_s0 + $0x500] sm:$0xff] }
  0xce   :  { %1526 = vmatpush1.msra.mxu0 %v602_v23  ;;  %1679 = vmatpush1.msra.mxu1 %v710_v24  ;;  %v666_v22 = vld [vmem:[%s8213_s1 + $0xe00] sm:$0xff]  ;;  %v765_v23 = vld [vmem:[%s8213_s1 + $0x1118] sm:$0xff] }
  0xcf   :  { %1286 = vmatmul.mubr.f32.gmra.mxu0 %v126_v25  ;;  %1527 = vmatprep.subr.mxu0 %v696_v26  ;;  %v189_v24 = vld [vmem:[%s8214_s0 + $0x518] sm:$0xff]  ;;  %v764_v26 = vld [vmem:[%s8213_s1 + $0x1110] sm:$0xff] }
  0xd0   :  { %1680 = vmatprep.subr.mxu1 %v708_v27  ;;  %1446 = vmatprep.mubr.f32.mxu1 %v129_v28  ;;  %v665_v25 = vld [vmem:[%s8213_s1 + $0xdf8] sm:$0xff]  ;;  %v188_v27 = vld [vmem:[%s8214_s0 + $0x510] sm:$0xff]  ;;  %v663_v28 = vld [vmem:[%s8213_s1 + $0xde8] sm:$0xff] }
  0xd1   :  { %1528 = vmatpush2.msra.mxu0 %v695_v29  ;;  %1681 = vmatpush1.msra.mxu1 %v707_v30  ;;  %v762_v29 = vld [vmem:[%s8213_s1 + $0x1100] sm:$0xff]  ;;  %v199_v30 = vld [vmem:[%s8214_s0 + $0x568] sm:$0xff] }
  0xd2   :  { %1447 = vmatmul.mubr.f32.gmra.mxu1 %v128_v31  ;;  %1529 = vmatprep.subr.mxu0 %v693_v32  ;;  %v662_v31 = vld [vmem:[%s8213_s1 + $0xde0] sm:$0xff]  ;;  %v761_v32 = vld [vmem:[%s8213_s1 + $0x10f8] sm:$0xff] }
  0xd3   :  { %1682 = vmatprep.subr.mxu1 %v705_v33  ;;  %1291 = vmatprep.mubr.f32.mxu0 %v139_v34  ;;  %v198_v33 = vld [vmem:[%s8214_s0 + $0x560] sm:$0xff]  ;;  %v660_v34 = vld [vmem:[%s8213_s1 + $0xdd0] sm:$0xff] }
  0xd4   :  { %1530 = vmatpush2.msra.mxu0 %v692_v35  ;;  %1683 = vmatpush1.msra.mxu1 %v704_v36  ;;  %v759_v35 = vld [vmem:[%s8213_s1 + $0x10e8] sm:$0xff]  ;;  %v201_v36 = vld [vmem:[%s8214_s0 + $0x578] sm:$0xff] }
  0xd5   :  { %1292 = vmatmul.mubr.f32.gmra.mxu0 %v138_v37  ;;  %1531 = vmatprep.subr.mxu0 %v690_v38  ;;  %v659_v37 = vld [vmem:[%s8213_s1 + $0xdc8] sm:$0xff]  ;;  %v758_v38 = vld [vmem:[%s8213_s1 + $0x10e0] sm:$0xff] }
  0xd6   :  { %1684 = vmatprep.subr.mxu1 %v702_v39  ;;  %1452 = vmatprep.mubr.f32.mxu1 %v141_v40  ;;  %v200_v39 = vld [vmem:[%s8214_s0 + $0x570] sm:$0xff]  ;;  %v657_v40 = vld [vmem:[%s8213_s1 + $0xdb8] sm:$0xff] }
  0xd7   :  { %1532 = vmatpush2.msra.mxu0 %v689_v41  ;;  %1685 = vmatpush1.msra.mxu1 %v701_v42  ;;  %v787_v41 = vlaneseq  ;;  %v756_v42 = vld [vmem:[%s8213_s1 + $0x10d0] sm:$0xff] }
  0xd8   :  { %1453 = vmatmul.mubr.f32.gmra.mxu1 %v140_v43  ;;  %1533 = vmatprep.subr.mxu0 %v687_v44  ;;  %v211_v43 = vld [vmem:[%s8214_s0 + $0x5c8] sm:$0xff]  ;;  %v656_v44 = vld [vmem:[%s8213_s1 + $0xdb0] sm:$0xff] }
  0xd9   :  { %1686 = vmatprep.subr.mxu1 %v699_v45  ;;  %1297 = vmatprep.mubr.f32.mxu0 %v151_v46  ;;  %v755_v45 = vld [vmem:[%s8213_s1 + $0x10c8] sm:$0xff]  ;;  %v210_v46 = vld [vmem:[%s8214_s0 + $0x5c0] sm:$0xff] }
  0xda   :  { %1534 = vmatpush2.msra.mxu0 %v686_v47  ;;  %1687 = vmatpush1.msra.mxu1 %v698_v48  ;;  %v654_v47 = vld [vmem:[%s8213_s1 + $0xda0] sm:$0xff]  ;;  %v753_v48 = vld [vmem:[%s8213_s1 + $0x10b8] sm:$0xff] }
  0xdb   :  { %1298 = vmatmul.mubr.f32.gmra.mxu0 %v150_v49  ;;  %1535 = vmatprep.subr.mxu0 %v684_v50  ;;  %v213_v49 = vld [vmem:[%s8214_s0 + $0x5d8] sm:$0xff]  ;;  %v5678_v50 = vshrl.u32 %v787_v41, 7  ;;  %v82_v41 = vld [vmem:[%s8214_s0 + $0x1c0] sm:$0xff] }
  0xdc   :  { %1694 = vmatprep.subr.mxu1 %v783_v51  ;;  %1458 = vmatprep.mubr.f32.mxu1 %v153_v52  ;;  %v653_v51 = vld [vmem:[%s8213_s1 + $0xd98] sm:$0xff]  ;;  %v752_v52 = vld [vmem:[%s8213_s1 + $0x10b0] sm:$0xff] }
  0xdd   :  { %1536 = vmatpush2.msra.mxu0 %v683_v53  ;;  %1695 = vmatpush2.msra.mxu1 %v782_v54  ;;  %8230 = vst [vmem:[#allocation2_spill] sm:$0xff] %v5678_v50  ;;  %v212_v53 = vld [vmem:[%s8214_s0 + $0x5d0] sm:$0xff]  ;;  %v651_v54 = vld [vmem:[%s8213_s1 + $0xd88] sm:$0xff] }
  0xde   :  { %1459 = vmatmul.mubr.f32.gmra.mxu1 %v152_v55  ;;  %1537 = vmatprep.subr.mxu0 %v681_v56  ;;  %v750_v55 = vld [vmem:[%s8213_s1 + $0x10a0] sm:$0xff] }
  0xdf   :  { %1696 = vmatprep.subr.mxu1 %v780_v57  ;;  %1303 = vmatprep.mubr.f32.mxu0 %v163_v58  ;;  %v650_v56 = vld [vmem:[%s8213_s1 + $0xd80] sm:$0xff]  ;;  %v35_v57 = vld [vmem:[%s8214_s0 + $0x48] sm:$0xff]  ;;  %v749_v58 = vld [vmem:[%s8213_s1 + $0x1098] sm:$0xff] }
  0xe0   :  { %1538 = vmatpush2.msra.mxu0 %v680_v59  ;;  %1697 = vmatpush2.msra.mxu1 %v779_v60  ;;  %v8222_v59 = vsub.s32 0, %v5678_v50  ;;  %v34_v60 = vld [vmem:[%s8214_s0 + $0x40] sm:$0xff] }
  0xe1   :  { %1304 = vmatmul.mubr.f32.gmra.mxu0 %v162_v61  ;;  %1539 = vmatprep.subr.mxu0 %v678_v62  ;;  %v747_v61 = vld [vmem:[%s8213_s1 + $0x1088] sm:$0xff]  ;;  %v5714_v62 = vld [vmem:[%s8215_s2] sm:$0x7] }
  0xe2   :  { %1698 = vmatprep.subr.mxu1 %v777_v63  ;;  %1464 = vmatprep.mubr.f32.mxu1 %v165_v0  ;;  %v313_v63 = vld [vmem:[%s8213_s1 + $0x2f8] sm:$0xff]  ;;  %v746_v0 = vld [vmem:[%s8213_s1 + $0x1080] sm:$0xff] }
  0xe3   :  { %1540 = vmatpush2.msra.mxu0 %v677_v1  ;;  %1699 = vmatpush2.msra.mxu1 %v776_v2  ;;  %v37_v1 = vld [vmem:[%s8214_s0 + $0x58] sm:$0xff] }
  0xe4   :  { %1465 = vmatmul.mubr.f32.gmra.mxu1 %v164_v3  ;;  %1541 = vmatprep.subr.mxu0 %v675_v4  ;;  %v265_v2 = vld [vmem:[%s8213_s1 + $0x178] sm:$0xff]  ;;  %v36_v3 = vld [vmem:[%s8214_s0 + $0x50] sm:$0xff]  ;;  %v47_v4 = vld [vmem:[%s8214_s0 + $0xa8] sm:$0xff] }
  0xe5   :  { %1700 = vmatprep.subr.mxu1 %v774_v5  ;;  %1309 = vmatprep.mubr.f32.mxu0 %v175_v6  ;;  %v5737_v5 = vrot.slane %v5714_v62, %v8222_v59  ;;  %v46_v6 = vld [vmem:[%s8214_s0 + $0xa0] sm:$0xff] }
  0xe6   :  { %1542 = vmatpush2.msra.mxu0 %v674_v7  ;;  %1701 = vmatpush2.msra.mxu1 %v773_v8  ;;  %v310_v7 = vld [vmem:[%s8213_s1 + $0x2e0] sm:$0xff]  ;;  %v49_v8 = vld [vmem:[%s8214_s0 + $0xb8] sm:$0xff] }
  0xe7   :  { %1310 = vmatmul.mubr.f32.gmra.mxu0 %v174_v9  ;;  %1543 = vmatprep.subr.mxu0 %v672_v10  ;;  %v262_v9 = vld [vmem:[%s8213_s1 + $0x160] sm:$0xff]  ;;  %v409_v10 = vld [vmem:[%s8213_s1 + $0x5f8] sm:$0xff] }
  0xe8   :  { %1702 = vmatprep.subr.mxu1 %v771_v11  ;;  %1470 = vmatprep.mubr.f32.mxu1 %v177_v12  ;;  %v59_v11 = vld [vmem:[%s8214_s0 + $0x108] sm:$0xff] }
  0xe9   :  { %1544 = vmatpush2.msra.mxu0 %v671_v13  ;;  %1703 = vmatpush2.msra.mxu1 %v770_v14  ;;  %v48_v13 = vld [vmem:[%s8214_s0 + $0xb0] sm:$0xff]  ;;  %v307_v14 = vld [vmem:[%s8213_s1 + $0x2c8] sm:$0xff] }
  0xea   :  { %1471 = vmatmul.mubr.f32.gmra.mxu1 %v176_v15  ;;  %1545 = vmatprep.subr.mxu0 %v669_v16  ;;  %v361_v16 = vld [vmem:[%s8213_s1 + $0x478] sm:$0xff] }
  0xeb   :  { %1704 = vmatprep.subr.mxu1 %v768_v17  ;;  %1315 = vmatprep.mubr.f32.mxu0 %v187_v18  ;;  %v58_v17 = vld [vmem:[%s8214_s0 + $0x100] sm:$0xff] }
  0xec   :  { %1546 = vmatpush2.msra.mxu0 %v668_v19  ;;  %1705 = vmatpush2.msra.mxu1 %v767_v20  ;;  %v61_v19 = vld [vmem:[%s8214_s0 + $0x118] sm:$0xff]  ;;  %v259_v20 = vld [vmem:[%s8213_s1 + $0x148] sm:$0xff] }
  0xed   :  { %1316 = vmatmul.mubr.f32.gmra.mxu0 %v186_v21  ;;  %1547 = vmatprep.subr.mxu0 %v666_v22  ;;  %v406_v22 = vld [vmem:[%s8213_s1 + $0x5e0] sm:$0xff] }
  0xee   :  { %1706 = vmatprep.subr.mxu1 %v765_v23  ;;  %1476 = vmatprep.mubr.f32.mxu1 %v189_v24  ;;  %v71_v23 = vld [vmem:[%s8214_s0 + $0x168] sm:$0xff] }
  0xef   :  { %1548 = vmatpush2.msra.mxu0 %v665_v25  ;;  %1707 = vmatpush2.msra.mxu1 %v764_v26  ;;  %v60_v25 = vld [vmem:[%s8214_s0 + $0x110] sm:$0xff] }
  0xf0   :  { %1477 = vmatmul.mubr.f32.gmra.mxu1 %v188_v27  ;;  %1549 = vmatprep.subr.mxu0 %v663_v28  ;;  %v304_v26 = vld [vmem:[%s8213_s1 + $0x2b0] sm:$0xff]  ;;  %v358_v28 = vld [vmem:[%s8213_s1 + $0x460] sm:$0xff] }
  0xf1   :  { %1708 = vmatprep.subr.mxu1 %v762_v29  ;;  %1321 = vmatprep.mubr.f32.mxu0 %v199_v30  ;;  %v70_v29 = vld [vmem:[%s8214_s0 + $0x160] sm:$0xff] }
  0xf2   :  { %1550 = vmatpush2.msra.mxu0 %v662_v31  ;;  %1709 = vmatpush2.msra.mxu1 %v761_v32  ;;  %v73_v31 = vld [vmem:[%s8214_s0 + $0x178] sm:$0xff]  ;;  %v256_v32 = vld [vmem:[%s8213_s1 + $0x130] sm:$0xff] }
  0xf3   :  { %1322 = vmatmul.mubr.f32.gmra.mxu0 %v198_v33  ;;  %1551 = vmatprep.subr.mxu0 %v660_v34  ;;  %v403_v34 = vld [vmem:[%s8213_s1 + $0x5c8] sm:$0xff] }
  0xf4   :  { %1710 = vmatprep.subr.mxu1 %v759_v35  ;;  %1482 = vmatprep.mubr.f32.mxu1 %v201_v36  ;;  %v83_v35 = vld [vmem:[%s8214_s0 + $0x1c8] sm:$0xff] }
  0xf5   :  { %1552 = vmatpush2.msra.mxu0 %v659_v37  ;;  %1711 = vmatpush2.msra.mxu1 %v758_v38  ;;  %v72_v37 = vld [vmem:[%s8214_s0 + $0x170] sm:$0xff]  ;;  %v301_v38 = vld [vmem:[%s8213_s1 + $0x298] sm:$0xff] }
  0xf6   :  { %1483 = vmatmul.mubr.f32.gmra.mxu1 %v200_v39  ;;  %1553 = vmatprep.subr.mxu0 %v657_v40  ;;  %v355_v40 = vld [vmem:[%s8213_s1 + $0x448] sm:$0xff] }
  0xf7   :  { %1712 = vmatprep.subr.mxu1 %v756_v42  ;;  %1327 = vmatprep.mubr.f32.mxu0 %v211_v43  ;;  %v85_v43 = vld [vmem:[%s8214_s0 + $0x1d8] sm:$0xff] }
  0xf8   :  { %1554 = vmatpush2.msra.mxu0 %v656_v44  ;;  %1713 = vmatpush2.msra.mxu1 %v755_v45  ;;  %v253_v44 = vld [vmem:[%s8213_s1 + $0x118] sm:$0xff] }
  0xf9   :  { %1328 = vmatmul.mubr.f32.gmra.mxu0 %v210_v46  ;;  %1555 = vmatprep.subr.mxu0 %v654_v47  ;;  %v400_v46 = vld [vmem:[%s8213_s1 + $0x5b0] sm:$0xff]  ;;  %v95_v47 = vld [vmem:[%s8214_s0 + $0x228] sm:$0xff] }
  0xfa   :  { %1714 = vmatprep.subr.mxu1 %v753_v48  ;;  %1488 = vmatprep.mubr.f32.mxu1 %v213_v49  ;;  %v84_v49 = vld [vmem:[%s8214_s0 + $0x1d0] sm:$0xff] }
  0xfb   :  { %1556 = vmatpush2.msra.mxu0 %v653_v51  ;;  %1715 = vmatpush2.msra.mxu1 %v752_v52  ;;  %v298_v51 = vld [vmem:[%s8213_s1 + $0x280] sm:$0xff] }
  0xfc   :  { %1489 = vmatmul.mubr.f32.gmra.mxu1 %v212_v53  ;;  %1557 = vmatprep.subr.mxu0 %v651_v54  ;;  %v352_v53 = vld [vmem:[%s8213_s1 + $0x430] sm:$0xff]  ;;  %v94_v54 = vld [vmem:[%s8214_s0 + $0x220] sm:$0xff] }
  0xfd   :  { %1716 = vmatprep.subr.mxu1 %v750_v55  ;;  %1558 = vmatpush2.msra.mxu0 %v650_v56  ;;  %v97_v56 = vld [vmem:[%s8214_s0 + $0x238] sm:$0xff] }
  0xfe   :  { %1559 = vmatprep.mubr.f32.mxu0 %v35_v57  ;;  %1717 = vmatpush2.msra.mxu1 %v749_v58  ;;  %v250_v57 = vld [vmem:[%s8213_s1 + $0x100] sm:$0xff] }
  0xff   :  { %1560 = vmatmul.mubr.f32.vlgmr.msra.gmra.mxu0 %v34_v60  ;;  %1718 = vmatprep.subr.mxu1 %v747_v61  ;;  %v397_v60 = vld [vmem:[%s8213_s1 + $0x598] sm:$0xff]  ;;  %v107_v61 = vld [vmem:[%s8214_s0 + $0x288] sm:$0xff] }
 0x100   :  { %3462 = vmatprep.subr.mxu0 %v313_v63  ;;  %1719 = vmatpush2.msra.mxu1 %v746_v0  ;;  %v96_v0 = vld [vmem:[%s8214_s0 + $0x230] sm:$0xff] }
 0x101   :  { %3413 = vmatprep.mubr.msk.f32.mxu1 %vm802_vm0, %v37_v1  ;;  %3463 = vmatpush3.msra.mxu0 %v265_v2  ;;  %v295_v1 = vld [vmem:[%s8213_s1 + $0x268] sm:$0xff] }
 0x102   :  { %1721 = vmatmul.mubr.f32.vlgmr.msra.gmra.mxu1 %v36_v3  ;;  %1565 = vmatprep.mubr.f32.mxu0 %v47_v4  ;;  %v917_v12 = vpop.f32.mrf.mxu0  ;;  %v349_v3 = vld [vmem:[%s8213_s1 + $0x418] sm:$0xff]  ;;  %v106_v4 = vld [vmem:[%s8214_s0 + $0x280] sm:$0xff] }
 0x103   :  { %1566 = vmatmul.mubr.f32.gmra.mxu0 %v46_v6  ;;  %3464 = vmatprep.subr.mxu0 %v310_v7  ;;  %v918_v15 = vadd.f32 %v917_v12, %v5737_v5  ;;  %v109_v7 = vld [vmem:[%s8214_s0 + $0x298] sm:$0xff] }
 0x104   :  { %3414 = vmatprep.mubr.msk.f32.mxu1 %vm802_vm0, %v49_v8  ;;  %3465 = vmatpush3.msra.mxu0 %v262_v9  ;;  %v5772_v18 = vpop.f32.mrf.mxu0  ;;  %v247_v8 = vld [vmem:[%s8213_s1 + $0xe8] sm:$0xff] }
 0x105   :  { %3542 = vmatprep.subr.mxu1 %v409_v10  ;;  %1571 = vmatprep.mubr.f32.mxu0 %v59_v11  ;;  %v1078_v21 = vpop.f32.mrf.mxu1  ;;  %v394_v10 = vld [vmem:[%s8213_s1 + $0x580] sm:$0xff]  ;;  %v119_v11 = vld [vmem:[%s8214_s0 + $0x2e8] sm:$0xff] }
 0x106   :  { %1727 = vmatmul.mubr.f32.gmra.mxu1 %v48_v13  ;;  %3466 = vmatprep.subr.mxu0 %v307_v14  ;;  %v5786_v24 = vadd.f32 %v1078_v21, %v918_v15  ;;  %v108_v13 = vld [vmem:[%s8214_s0 + $0x290] sm:$0xff] }
 0x107   :  { %3543 = vmatpush3.msra.mxu1 %v361_v16  ;;  %1572 = vmatmul.mubr.f32.gmra.mxu0 %v58_v17  ;;  %v5794_v27 = vpop.f32.mrf.mxu1  ;;  %v292_v14 = vld [vmem:[%s8213_s1 + $0x250] sm:$0xff]  ;;  %v346_v16 = vld [vmem:[%s8213_s1 + $0x400] sm:$0xff] }
 0x108   :  { %3415 = vmatprep.mubr.msk.f32.mxu1 %vm802_vm0, %v61_v19  ;;  %3467 = vmatpush3.msra.mxu0 %v259_v20  ;;  %v923_v30 = vpop.f32.mrf.mxu0  ;;  %v118_v17 = vld [vmem:[%s8214_s0 + $0x2e0] sm:$0xff]  ;;  %v121_v20 = vld [vmem:[%s8214_s0 + $0x2f8] sm:$0xff]  ;;  %v244_v21 = vld [vmem:[%s8213_s1 + $0xd0] sm:$0xff] }
 0x109   :  { %3544 = vmatprep.subr.mxu1 %v406_v22  ;;  %1577 = vmatprep.mubr.f32.mxu0 %v71_v23  ;;  %v924_v33 = vadd.f32 %v923_v30, %v5737_v5  ;;  %v391_v23 = vld [vmem:[%s8213_s1 + $0x568] sm:$0xff] }
 0x10a   :  { %1733 = vmatmul.mubr.f32.gmra.mxu1 %v60_v25  ;;  %3468 = vmatprep.subr.mxu0 %v304_v26  ;;  %v5816_v36 = vpop.f32.mrf.mxu0  ;;  %v131_v25 = vld [vmem:[%s8214_s0 + $0x348] sm:$0xff] }
 0x10b   :  { %3545 = vmatpush3.msra.mxu1 %v358_v28  ;;  %1578 = vmatmul.mubr.f32.gmra.mxu0 %v70_v29  ;;  %v1084_v39 = vpop.f32.mrf.mxu1  ;;  %v120_v28 = vld [vmem:[%s8214_s0 + $0x2f0] sm:$0xff]  ;;  %v289_v29 = vld [vmem:[%s8213_s1 + $0x238] sm:$0xff] }
 0x10c   :  { %3416 = vmatprep.mubr.msk.f32.mxu1 %vm802_vm0, %v73_v31  ;;  %3469 = vmatpush3.msra.mxu0 %v256_v32  ;;  %v5831_v42 = vadd.f32 %v1084_v39, %v924_v33  ;;  %v343_v31 = vld [vmem:[%s8213_s1 + $0x3e8] sm:$0xff]  ;;  %v130_v32 = vld [vmem:[%s8214_s0 + $0x340] sm:$0xff] }
 0x10d   :  { %3546 = vmatprep.subr.mxu1 %v403_v34  ;;  %1583 = vmatprep.mubr.f32.mxu0 %v83_v35  ;;  %v5839_v45 = vpop.f32.mrf.mxu1  ;;  %v133_v34 = vld [vmem:[%s8214_s0 + $0x358] sm:$0xff]  ;;  %v143_v39 = vld [vmem:[%s8214_s0 + $0x3a8] sm:$0xff] }
 0x10e   :  { %1739 = vmatmul.mubr.f32.gmra.mxu1 %v72_v37  ;;  %3470 = vmatprep.subr.mxu0 %v301_v38  ;;  %v929_v48 = vpop.f32.mrf.mxu0  ;;  %v241_v35 = vld [vmem:[%s8213_s1 + $0xb8] sm:$0xff]  ;;  %v388_v38 = vld [vmem:[%s8213_s1 + $0x550] sm:$0xff] }
 0x10f   :  { %3547 = vmatpush3.msra.mxu1 %v355_v40  ;;  %1584 = vmatmul.mubr.f32.gmra.mxu0 %v82_v41  ;;  %v930_v52 = vadd.f32 %v929_v48, %v5737_v5  ;;  %v132_v41 = vld [vmem:[%s8214_s0 + $0x350] sm:$0xff] }
 0x110   :  { %3417 = vmatprep.mubr.msk.f32.mxu1 %vm802_vm0, %v85_v43  ;;  %3471 = vmatpush3.msra.mxu0 %v253_v44  ;;  %v5861_v55 = vpop.f32.mrf.mxu0  ;;  %v286_v43 = vld [vmem:[%s8213_s1 + $0x220] sm:$0xff] }
 0x111   :  { %3548 = vmatprep.subr.mxu1 %v400_v46  ;;  %1589 = vmatprep.mubr.f32.mxu0 %v95_v47  ;;  %v1090_v58 = vpop.f32.mrf.mxu1  ;;  %v340_v46 = vld [vmem:[%s8213_s1 + $0x3d0] sm:$0xff]  ;;  %v142_v47 = vld [vmem:[%s8214_s0 + $0x3a0] sm:$0xff] }
 0x112   :  { %1745 = vmatmul.mubr.f32.gmra.mxu1 %v84_v49  ;;  %3472 = vmatprep.subr.mxu0 %v298_v51  ;;  %v5875_v63 = vadd.f32 %v1090_v58, %v930_v52  ;;  %v145_v49 = vld [vmem:[%s8214_s0 + $0x3b8] sm:$0xff]  ;;  %v238_v51 = vld [vmem:[%s8213_s1 + $0xa0] sm:$0xff]  ;;  %v283_v58 = vld [vmem:[%s8213_s1 + $0x208] sm:$0xff] }
 0x113   :  { %3549 = vmatpush3.msra.mxu1 %v352_v53  ;;  %1590 = vmatmul.mubr.f32.gmra.mxu0 %v94_v54  ;;  %v5883_v2 = vpop.f32.mrf.mxu1  ;;  %v385_v53 = vld [vmem:[%s8213_s1 + $0x538] sm:$0xff]  ;;  %v155_v54 = vld [vmem:[%s8214_s0 + $0x408] sm:$0xff] }
 0x114   :  { %3418 = vmatprep.mubr.msk.f32.mxu1 %vm802_vm0, %v97_v56  ;;  %3473 = vmatpush3.msra.mxu0 %v250_v57  ;;  %v935_v6 = vpop.f32.mrf.mxu0  ;;  %v144_v57 = vld [vmem:[%s8214_s0 + $0x3b0] sm:$0xff] }
 0x115   :  { %3550 = vmatprep.subr.mxu1 %v397_v60  ;;  %1595 = vmatprep.mubr.f32.mxu0 %v107_v61  ;;  %v936_v9 = vadd.f32 %v935_v6, %v5737_v5  ;;  %v337_v61 = vld [vmem:[%s8213_s1 + $0x3b8] sm:$0xff] }
 0x116   :  { %1751 = vmatmul.mubr.f32.gmra.mxu1 %v96_v0  ;;  %3474 = vmatprep.subr.mxu0 %v295_v1  ;;  %v5905_v12 = vpop.f32.mrf.mxu0  ;;  %v154_v0 = vld [vmem:[%s8214_s0 + $0x400] sm:$0xff] }
 0x117   :  { %3551 = vmatpush3.msra.mxu1 %v349_v3  ;;  %1596 = vmatmul.mubr.f32.gmra.mxu0 %v106_v4  ;;  %v1096_v15 = vpop.f32.mrf.mxu1  ;;  %v157_v3 = vld [vmem:[%s8214_s0 + $0x418] sm:$0xff]  ;;  %v235_v4 = vld [vmem:[%s8213_s1 + $0x88] sm:$0xff] }
 0x118   :  { %3419 = vmatprep.mubr.msk.f32.mxu1 %vm802_vm0, %v109_v7  ;;  %3475 = vmatpush3.msra.mxu0 %v247_v8  ;;  %v5920_v19 = vadd.f32 %v1096_v15, %v936_v9  ;;  %v382_v7 = vld [vmem:[%s8213_s1 + $0x520] sm:$0xff]  ;;  %v167_v8 = vld [vmem:[%s8214_s0 + $0x468] sm:$0xff] }
 0x119   :  { %3552 = vmatprep.subr.mxu1 %v394_v10  ;;  %1601 = vmatprep.mubr.f32.mxu0 %v119_v11  ;;  %v5928_v22 = vpop.f32.mrf.mxu1  ;;  %v156_v10 = vld [vmem:[%s8214_s0 + $0x410] sm:$0xff]  ;;  %v166_v15 = vld [vmem:[%s8214_s0 + $0x460] sm:$0xff] }
 0x11a   :  { %1757 = vmatmul.mubr.f32.gmra.mxu1 %v108_v13  ;;  %3476 = vmatprep.subr.mxu0 %v292_v14  ;;  %v941_v26 = vpop.f32.mrf.mxu0  ;;  %v280_v11 = vld [vmem:[%s8213_s1 + $0x1f0] sm:$0xff]  ;;  %v334_v14 = vld [vmem:[%s8213_s1 + $0x3a0] sm:$0xff] }
 0x11b   :  { %3553 = vmatpush3.msra.mxu1 %v346_v16  ;;  %1602 = vmatmul.mubr.f32.gmra.mxu0 %v118_v17  ;;  %v942_v30 = vadd.f32 %v941_v26, %v5737_v5  ;;  %v169_v17 = vld [vmem:[%s8214_s0 + $0x478] sm:$0xff] }
 0x11c   :  { %3420 = vmatprep.mubr.msk.f32.mxu1 %vm802_vm0, %v121_v20  ;;  %3477 = vmatpush3.msra.mxu0 %v244_v21  ;;  %v5950_v33 = vpop.f32.mrf.mxu0  ;;  %v232_v20 = vld [vmem:[%s8213_s1 + $0x70] sm:$0xff] }
 0x11d   :  { %3554 = vmatprep.subr.mxu1 %v391_v23  ;;  %1607 = vmatprep.mubr.f32.mxu0 %v131_v25  ;;  %v1102_v37 = vpop.f32.mrf.mxu1  ;;  %v379_v23 = vld [vmem:[%s8213_s1 + $0x508] sm:$0xff] }
 0x11e   :  { %1763 = vmatmul.mubr.f32.gmra.mxu1 %v120_v28  ;;  %3478 = vmatprep.subr.mxu0 %v289_v29  ;;  %v5964_v40 = vadd.f32 %v1102_v37, %v942_v30  ;;  %v179_v25 = vld [vmem:[%s8214_s0 + $0x4c8] sm:$0xff]  ;;  %v168_v28 = vld [vmem:[%s8214_s0 + $0x470] sm:$0xff]  ;;  %v277_v29 = vld [vmem:[%s8213_s1 + $0x1d8] sm:$0xff] }
 0x11f   :  { %3555 = vmatpush3.msra.mxu1 %v343_v31  ;;  %1608 = vmatmul.mubr.f32.gmra.mxu0 %v130_v32  ;;  %v5972_v44 = vpop.f32.mrf.mxu1  ;;  %v331_v31 = vld [vmem:[%s8213_s1 + $0x388] sm:$0xff]  ;;  %v178_v32 = vld [vmem:[%s8214_s0 + $0x4c0] sm:$0xff]  ;;  %v229_v37 = vld [vmem:[%s8213_s1 + $0x58] sm:$0xff] }
 0x120   :  { %3421 = vmatprep.mubr.msk.f32.mxu1 %vm802_vm0, %v133_v34  ;;  %3479 = vmatpush3.msra.mxu0 %v241_v35  ;;  %v947_v48 = vpop.f32.mrf.mxu0  ;;  %v181_v35 = vld [vmem:[%s8214_s0 + $0x4d8] sm:$0xff] }
 0x121   :  { %3556 = vmatprep.subr.mxu1 %v388_v38  ;;  %1613 = vmatprep.mubr.f32.mxu0 %v143_v39  ;;  %v948_v52 = vadd.f32 %v947_v48, %v5737_v5  ;;  %v376_v39 = vld [vmem:[%s8213_s1 + $0x4f0] sm:$0xff] }
 0x122   :  { %1769 = vmatmul.mubr.f32.gmra.mxu1 %v132_v41  ;;  %3480 = vmatprep.subr.mxu0 %v286_v43  ;;  %v5994_v56 = vpop.f32.mrf.mxu0  ;;  %v191_v41 = vld [vmem:[%s8214_s0 + $0x528] sm:$0xff] }
 0x123   :  { %3557 = vmatpush3.msra.mxu1 %v340_v46  ;;  %1614 = vmatmul.mubr.f32.gmra.mxu0 %v142_v47  ;;  %v1108_v60 = vpop.f32.mrf.mxu1  ;;  %v180_v46 = vld [vmem:[%s8214_s0 + $0x4d0] sm:$0xff]  ;;  %v274_v47 = vld [vmem:[%s8213_s1 + $0x1c0] sm:$0xff] }
 0x124   :  { %3422 = vmatprep.mubr.msk.f32.mxu1 %vm802_vm0, %v145_v49  ;;  %3481 = vmatpush3.msra.mxu0 %v238_v51  ;;  %v6009_v1 = vadd.f32 %v1108_v60, %v948_v52  ;;  %v328_v49 = vld [vmem:[%s8213_s1 + $0x370] sm:$0xff]  ;;  %v190_v51 = vld [vmem:[%s8214_s0 + $0x520] sm:$0xff]  ;;  %v203_v60 = vld [vmem:[%s8214_s0 + $0x588] sm:$0xff] }
 0x125   :  { %3558 = vmatprep.subr.mxu1 %v385_v53  ;;  %1619 = vmatprep.mubr.f32.mxu0 %v155_v54  ;;  %v6017_v6 = vpop.f32.mrf.mxu1  ;;  %v193_v53 = vld [vmem:[%s8214_s0 + $0x538] sm:$0xff]  ;;  %v226_v54 = vld [vmem:[%s8213_s1 + $0x40] sm:$0xff] }
 0x126   :  { %1775 = vmatmul.mubr.f32.gmra.mxu1 %v144_v57  ;;  %3482 = vmatprep.subr.mxu0 %v283_v58  ;;  %v953_v9 = vpop.f32.mrf.mxu0  ;;  %v373_v58 = vld [vmem:[%s8213_s1 + $0x4d8] sm:$0xff] }
 0x127   :  { %3559 = vmatpush3.msra.mxu1 %v337_v61  ;;  %1620 = vmatmul.mubr.f32.gmra.mxu0 %v154_v0  ;;  %v954_v13 = vadd.f32 %v953_v9, %v5737_v5  ;;  %v192_v0 = vld [vmem:[%s8214_s0 + $0x530] sm:$0xff] }
 0x128   :  { %3423 = vmatprep.mubr.msk.f32.mxu1 %vm802_vm0, %v157_v3  ;;  %3483 = vmatpush3.msra.mxu0 %v235_v4  ;;  %v6039_v16 = vpop.f32.mrf.mxu0  ;;  %v271_v3 = vld [vmem:[%s8213_s1 + $0x1a8] sm:$0xff] }
 0x129   :  { %3560 = vmatprep.subr.mxu1 %v382_v7  ;;  %1625 = vmatprep.mubr.f32.mxu0 %v167_v8  ;;  %v1114_v21 = vpop.f32.mrf.mxu1  ;;  %v325_v7 = vld [vmem:[%s8213_s1 + $0x358] sm:$0xff]  ;;  %v202_v8 = vld [vmem:[%s8214_s0 + $0x580] sm:$0xff] }
 0x12a   :  { %1781 = vmatmul.mubr.f32.gmra.mxu1 %v156_v10  ;;  %3484 = vmatprep.subr.mxu0 %v280_v11  ;;  %v6053_v26 = vadd.f32 %v1114_v21, %v954_v13  ;;  %v205_v10 = vld [vmem:[%s8214_s0 + $0x598] sm:$0xff]  ;;  %v223_v11 = vld [vmem:[%s8213_s1 + $0x28] sm:$0xff]  ;;  %v268_v21 = vld [vmem:[%s8213_s1 + $0x190] sm:$0xff] }
 0x12b   :  { %3561 = vmatpush3.msra.mxu1 %v334_v14  ;;  %1626 = vmatmul.mubr.f32.gmra.mxu0 %v166_v15  ;;  %v6061_v30 = vpop.f32.mrf.mxu1  ;;  %v370_v14 = vld [vmem:[%s8213_s1 + $0x4c0] sm:$0xff]  ;;  %v215_v15 = vld [vmem:[%s8214_s0 + $0x5e8] sm:$0xff] }
 0x12c   :  { %3424 = vmatprep.mubr.msk.f32.mxu1 %vm802_vm0, %v169_v17  ;;  %3485 = vmatpush3.msra.mxu0 %v232_v20  ;;  %v959_v34 = vpop.f32.mrf.mxu0  ;;  %v204_v20 = vld [vmem:[%s8214_s0 + $0x590] sm:$0xff] }
 0x12d   :  { %3562 = vmatprep.subr.mxu1 %v379_v23  ;;  %1631 = vmatprep.mubr.f32.mxu0 %v179_v25  ;;  %v960_v38 = vadd.f32 %v959_v34, %v5737_v5  ;;  %v322_v25 = vld [vmem:[%s8213_s1 + $0x340] sm:$0xff] }
 0x12e   :  { %1787 = vmatmul.mubr.f32.gmra.mxu1 %v168_v28  ;;  %3486 = vmatprep.subr.mxu0 %v277_v29  ;;  %v6083_v43 = vpop.f32.mrf.mxu0  ;;  %v214_v28 = vld [vmem:[%s8214_s0 + $0x5e0] sm:$0xff] }
 0x12f   :  { %3563 = vmatpush3.msra.mxu1 %v331_v31  ;;  %1632 = vmatmul.mubr.f32.gmra.mxu0 %v178_v32  ;;  %v1120_v48 = vpop.f32.mrf.mxu1  ;;  %v217_v31 = vld [vmem:[%s8214_s0 + $0x5f8] sm:$0xff]  ;;  %v220_v32 = vld [vmem:[%s8213_s1 + $0x10] sm:$0xff] }
 0x130   :  { %3425 = vmatprep.mubr.msk.f32.mxu1 %vm802_vm0, %v181_v35  ;;  %3487 = vmatpush3.msra.mxu0 %v229_v37  ;;  %v6098_v52 = vadd.f32 %v1120_v48, %v960_v38  ;;  %v367_v35 = vld [vmem:[%s8213_s1 + $0x4a8] sm:$0xff]  ;;  %v216_v38 = vld [vmem:[%s8214_s0 + $0x5f0] sm:$0xff] }
 0x131   :  { %3564 = vmatprep.subr.mxu1 %v376_v39  ;;  %1637 = vmatprep.mubr.f32.mxu0 %v191_v41  ;;  %v6106_v57 = vpop.f32.mrf.mxu1  ;;  %v505_v39 = vld [vmem:[%s8213_s1 + $0x8f8] sm:$0xff]  ;;  %v3952_v48 = vld [vmem:[%s8214_s0 + $0x8] sm:$0xff] }
 0x132   :  { %1793 = vmatmul.mubr.f32.gmra.mxu1 %v180_v46  ;;  %3488 = vmatprep.subr.mxu0 %v274_v47  ;;  %v965_v61 = vpop.f32.mrf.mxu0  ;;  %v319_v46 = vld [vmem:[%s8213_s1 + $0x328] sm:$0xff] }
 0x133   :  { %3565 = vmatpush3.msra.mxu1 %v328_v49  ;;  %1638 = vmatmul.mubr.f32.gmra.mxu0 %v190_v51  ;;  %v966_v4 = vadd.f32 %v965_v61, %v5737_v5  ;;  %v364_v49 = vld [vmem:[%s8213_s1 + $0x490] sm:$0xff] }
 0x134   :  { %3426 = vmatprep.mubr.msk.f32.mxu1 %vm802_vm0, %v193_v53  ;;  %3489 = vmatpush3.msra.mxu0 %v226_v54  ;;  %v6128_v9 = vpop.f32.mrf.mxu0  ;;  %v316_v53 = vld [vmem:[%s8213_s1 + $0x310] sm:$0xff]  ;;  %v457_v54 = vld [vmem:[%s8213_s1 + $0x778] sm:$0xff] }
 0x135   :  { %3566 = vmatprep.subr.mxu1 %v373_v58  ;;  %1643 = vmatprep.mubr.f32.mxu0 %v203_v60  ;;  %v1126_v13 = vpop.f32.mrf.mxu1  ;;  %v3953_v60 = vld [vmem:[%s8214_s0] sm:$0xff] }
 0x136   :  { %1799 = vmatmul.mubr.f32.gmra.mxu1 %v192_v0  ;;  %3490 = vmatprep.subr.mxu0 %v271_v3  ;;  %v6142_v17 = vadd.f32 %v1126_v13, %v966_v4  ;;  %v3954_v0 = vld [vmem:[%s8214_s0 + $0x18] sm:$0xff]  ;;  %v502_v3 = vld [vmem:[%s8213_s1 + $0x8e0] sm:$0xff] }
 0x137   :  { %3567 = vmatpush3.msra.mxu1 %v325_v7  ;;  %1644 = vmatmul.mubr.f32.gmra.mxu0 %v202_v8  ;;  %v6150_v23 = vpop.f32.mrf.mxu1  ;;  %v454_v7 = vld [vmem:[%s8213_s1 + $0x760] sm:$0xff]  ;;  %v601_v13 = vld [vmem:[%s8213_s1 + $0xbf8] sm:$0xff] }
 0x138   :  { %3427 = vmatprep.mubr.msk.f32.mxu1 %vm802_vm0, %v205_v10  ;;  %3491 = vmatpush3.msra.mxu0 %v223_v11  ;;  %v971_v29 = vpop.f32.mrf.mxu0  ;;  %v3955_v10 = vld [vmem:[%s8214_s0 + $0x10] sm:$0xff]  ;;  %v3956_v11 = vld [vmem:[%s8214_s0 + $0x68] sm:$0xff] }
 0x139   :  { %3568 = vmatprep.subr.mxu1 %v370_v14  ;;  %1649 = vmatprep.mubr.f32.mxu0 %v215_v15  ;;  %v972_v34 = vadd.f32 %v971_v29, %v5737_v5  ;;  %v3957_v15 = vld [vmem:[%s8214_s0 + $0x60] sm:$0xff] }
 0x13a   :  { %1805 = vmatmul.mubr.f32.gmra.mxu1 %v204_v20  ;;  %3492 = vmatprep.subr.mxu0 %v268_v21  ;;  %v6169_v37 = vpop.f32.mrf.mxu0  ;;  %v499_v20 = vld [vmem:[%s8213_s1 + $0x8c8] sm:$0xff] }
 0x13b   :  { %3569 = vmatpush3.msra.mxu1 %v322_v25  ;;  %1650 = vmatmul.mubr.f32.gmra.mxu0 %v214_v28  ;;  %v1132_v41 = vpop.f32.mrf.mxu1  ;;  %v3958_v25 = vld [vmem:[%s8214_s0 + $0x78] sm:$0xff] }
 0x13c   :  { %3428 = vmatprep.mubr.msk.f32.mxu1 %vm802_vm0, %v217_v31  ;;  %3493 = vmatpush3.msra.mxu0 %v220_v32  ;;  %v6181_v47 = vadd.f32 %v1132_v41, %v972_v34  ;;  %v553_v28 = vld [vmem:[%s8213_s1 + $0xa78] sm:$0xff]  ;;  %v3959_v31 = vld [vmem:[%s8214_s0 + $0xc8] sm:$0xff]  ;;  %v3961_v41 = vld [vmem:[%s8214_s0 + $0xc0] sm:$0xff] }
 0x13d   :  { %3570 = vmatprep.subr.mxu1 %v367_v35  ;;  %1881 = vmatprep.mubr.f32.mxu0 %v3952_v48  ;;  %v6189_v51 = vpop.f32.mrf.mxu1  ;;  %v451_v32 = vld [vmem:[%s8213_s1 + $0x748] sm:$0xff]  ;;  %v3960_v35 = vld [vmem:[%s8214_s0 + $0x70] sm:$0xff] }
 0x13e   :  { %1811 = vmatmul.mubr.f32.gmra.mxu1 %v216_v38  ;;  %3622 = vmatprep.subr.mxu0 %v505_v39  ;;  %v977_v58 = vpop.f32.mrf.mxu0  ;;  %v598_v38 = vld [vmem:[%s8213_s1 + $0xbe0] sm:$0xff] }
 0x13f   :  { %3571 = vmatpush3.msra.mxu1 %v319_v46  ;;  %1882 = vmatmul.mubr.f32.vlgmr.msra.gmra.mxu0 %v3953_v60  ;;  %v978_v61 = vadd.f32 %v977_v58, %v5737_v5  ;;  %v496_v46 = vld [vmem:[%s8213_s1 + $0x8b0] sm:$0xff]  ;;  %v3963_v58 = vld [vmem:[%s8214_s0 + $0x128] sm:$0xff] }
 0x140   :  { %3572 = vmatprep.subr.mxu1 %v364_v49  ;;  %2026 = vmatprep.mubr.f32.mxu1 %v3954_v0  ;;  %v6207_v4 = vpop.f32.mrf.mxu0  ;;  %v3962_v49 = vld [vmem:[%s8214_s0 + $0xd8] sm:$0xff]  ;;  %v448_v60 = vld [vmem:[%s8213_s1 + $0x730] sm:$0xff] }
 0x141   :  { %3573 = vmatpush3.msra.mxu1 %v316_v53  ;;  %3623 = vmatpush3.msra.mxu0 %v457_v54  ;;  %v1138_v8 = vpop.f32.mrf.mxu1  ;;  %v550_v53 = vld [vmem:[%s8213_s1 + $0xa60] sm:$0xff]  ;;  %v3964_v0 = vld [vmem:[%s8214_s0 + $0xd0] sm:$0xff] }
 0x142   :  { %2027 = vmatmul.mubr.f32.vlgmr.msra.gmra.mxu1 %v3955_v10  ;;  %1886 = vmatprep.mubr.f32.mxu0 %v3956_v11  ;;  %v6221_v14 = vadd.f32 %v1138_v8, %v978_v61  ;;  %v3965_v8 = vld [vmem:[%s8214_s0 + $0x120] sm:$0xff]  ;;  %v493_v10 = vld [vmem:[%s8213_s1 + $0x898] sm:$0xff] }
 0x143   :  { %1887 = vmatmul.mubr.f32.gmra.mxu0 %v3957_v15  ;;  %3624 = vmatprep.subr.mxu0 %v502_v3  ;;  %v6229_v21 = vpop.f32.mrf.mxu1  ;;  %v595_v3 = vld [vmem:[%s8213_s1 + $0xbc8] sm:$0xff] }
 0x144   :  { %2031 = vmatprep.mubr.f32.mxu1 %v3958_v25  ;;  %3625 = vmatpush3.msra.mxu0 %v454_v7  ;;  %v983_v29 = vpop.f32.mrf.mxu0  ;;  %v547_v15 = vld [vmem:[%s8213_s1 + $0xa48] sm:$0xff] }
 0x145   :  { %3702 = vmatprep.subr.mxu1 %v601_v13  ;;  %1891 = vmatprep.mubr.f32.mxu0 %v3959_v31  ;;  %v984_v34 = vadd.f32 %v983_v29, %v5737_v5  ;;  %v3966_v13 = vld [vmem:[%s8214_s0 + $0x138] sm:$0xff]  ;;  %v3967_v25 = vld [vmem:[%s8214_s0 + $0x188] sm:$0xff]  ;;  %v3968_v31 = vld [vmem:[%s8214_s0 + $0x130] sm:$0xff] }
 0x146   :  { %2032 = vmatmul.mubr.f32.gmra.mxu1 %v3960_v35  ;;  %3626 = vmatprep.subr.mxu0 %v499_v20  ;;  %v6250_v39 = vpop.f32.mrf.mxu0  ;;  %v3969_v35 = vld [vmem:[%s8214_s0 + $0x180] sm:$0xff] }
 0x147   :  { %3703 = vmatpush3.msra.mxu1 %v553_v28  ;;  %1892 = vmatmul.mubr.f32.gmra.mxu0 %v3961_v41  ;;  %v1144_v48 = vpop.f32.mrf.mxu1  ;;  %v445_v28 = vld [vmem:[%s8213_s1 + $0x718] sm:$0xff] }
 0x148   :  { %2036 = vmatprep.mubr.f32.mxu1 %v3962_v49  ;;  %3627 = vmatpush3.msra.mxu0 %v451_v32  ;;  %v6264_v54 = vadd.f32 %v1144_v48, %v984_v34  ;;  %v592_v32 = vld [vmem:[%s8213_s1 + $0xbb0] sm:$0xff] }
 0x149   :  { %3704 = vmatprep.subr.mxu1 %v598_v38  ;;  %1896 = vmatprep.mubr.f32.mxu0 %v3963_v58  ;;  %v6272_v61 = vpop.f32.mrf.mxu1  ;;  %v490_v38 = vld [vmem:[%s8213_s1 + $0x880] sm:$0xff]  ;;  %v544_v48 = vld [vmem:[%s8213_s1 + $0xa30] sm:$0xff] }
 0x14a   :  { %2037 = vmatmul.mubr.f32.gmra.mxu1 %v3964_v0  ;;  %3628 = vmatprep.subr.mxu0 %v496_v46  ;;  %v989_v7 = vpop.f32.mrf.mxu0  ;;  %v3970_v46 = vld [vmem:[%s8214_s0 + $0x198] sm:$0xff]  ;;  %v442_v58 = vld [vmem:[%s8213_s1 + $0x700] sm:$0xff]  ;;  %v3972_v0 = vld [vmem:[%s8214_s0 + $0x190] sm:$0xff] }
 0x14b   :  { %3705 = vmatpush3.msra.mxu1 %v550_v53  ;;  %1897 = vmatmul.mubr.f32.gmra.mxu0 %v3965_v8  ;;  %v990_v11 = vadd.f32 %v989_v7, %v5737_v5  ;;  %v3971_v53 = vld [vmem:[%s8214_s0 + $0x1e8] sm:$0xff]  ;;  %v3973_v8 = vld [vmem:[%s8214_s0 + $0x1e0] sm:$0xff] }
 0x14c   :  { %2041 = vmatprep.mubr.f32.mxu1 %v3966_v13  ;;  %3629 = vmatpush3.msra.mxu0 %v448_v60  ;;  %v6293_v20 = vpop.f32.mrf.mxu0  ;;  %v3974_v13 = vld [vmem:[%s8214_s0 + $0x1f8] sm:$0xff] }
 0x14d   :  { %3706 = vmatprep.subr.mxu1 %v595_v3  ;;  %1901 = vmatprep.mubr.f32.mxu0 %v3967_v25  ;;  %v1150_v29 = vpop.f32.mrf.mxu1  ;;  %v589_v3 = vld [vmem:[%s8213_s1 + $0xb98] sm:$0xff] }
 0x14e   :  { %2042 = vmatmul.mubr.f32.gmra.mxu1 %v3968_v31  ;;  %3630 = vmatprep.subr.mxu0 %v493_v10  ;;  %v6307_v34 = vadd.f32 %v1150_v29, %v990_v11  ;;  %v487_v10 = vld [vmem:[%s8213_s1 + $0x868] sm:$0xff] }
 0x14f   :  { %3707 = vmatpush3.msra.mxu1 %v547_v15  ;;  %1902 = vmatmul.mubr.f32.gmra.mxu0 %v3969_v35  ;;  %v6315_v41 = vpop.f32.mrf.mxu1  ;;  %v541_v15 = vld [vmem:[%s8213_s1 + $0xa18] sm:$0xff]  ;;  %v439_v29 = vld [vmem:[%s8213_s1 + $0x6e8] sm:$0xff]  ;;  %v586_v35 = vld [vmem:[%s8213_s1 + $0xb80] sm:$0xff] }
 0x150   :  { %2046 = vmatprep.mubr.f32.mxu1 %v3970_v46  ;;  %3631 = vmatpush3.msra.mxu0 %v445_v28  ;;  %v995_v49 = vpop.f32.mrf.mxu0  ;;  %v3975_v28 = vld [vmem:[%s8214_s0 + $0x248] sm:$0xff]  ;;  %v3977_v46 = vld [vmem:[%s8214_s0 + $0x240] sm:$0xff] }
 0x151   :  { %3708 = vmatprep.subr.mxu1 %v592_v32  ;;  %1906 = vmatprep.mubr.f32.mxu0 %v3971_v53  ;;  %v996_v60 = vadd.f32 %v995_v49, %v5737_v5  ;;  %v3976_v32 = vld [vmem:[%s8214_s0 + $0x1f0] sm:$0xff]  ;;  %v3978_v53 = vld [vmem:[%s8214_s0 + $0x258] sm:$0xff] }
 0x152   :  { %2047 = vmatmul.mubr.f32.gmra.mxu1 %v3972_v0  ;;  %3632 = vmatprep.subr.mxu0 %v490_v38  ;;  %v6336_v7 = vpop.f32.mrf.mxu0  ;;  %v8221_v0 = vsub.s32 1, %v5678_v50 }
 0x153   :  { %3709 = vmatpush3.msra.mxu1 %v544_v48  ;;  %1907 = vmatmul.mubr.f32.gmra.mxu0 %v3973_v8  ;;  %v1156_v11 = vpop.f32.mrf.mxu1  ;;  %v484_v48 = vld [vmem:[%s8213_s1 + $0x850] sm:$0xff] }
 0x154   :  { %2051 = vmatprep.mubr.f32.mxu1 %v3974_v13  ;;  %3633 = vmatpush3.msra.mxu0 %v442_v58  ;;  %v6350_v25 = vadd.f32 %v1156_v11, %v996_v60  ;;  %v538_v58 = vld [vmem:[%s8213_s1 + $0xa00] sm:$0xff]  ;;  %v436_v8 = vld [vmem:[%s8213_s1 + $0x6d0] sm:$0xff]  ;;  %v583_v13 = vld [vmem:[%s8213_s1 + $0xb68] sm:$0xff] }
 0x155   :  { %3710 = vmatprep.subr.mxu1 %v589_v3  ;;  %1911 = vmatprep.mubr.f32.mxu0 %v3975_v28  ;;  %v6358_v31 = vpop.f32.mrf.mxu1  ;;  %v3979_v3 = vld [vmem:[%s8214_s0 + $0x2a8] sm:$0xff]  ;;  %v3980_v11 = vld [vmem:[%s8214_s0 + $0x250] sm:$0xff]  ;;  %v3981_v28 = vld [vmem:[%s8214_s0 + $0x2a0] sm:$0xff] }
 0x156   :  { %2052 = vmatmul.mubr.f32.gmra.mxu1 %v3976_v32  ;;  %3634 = vmatprep.subr.mxu0 %v487_v10  ;;  %v1001_v38 = vpop.f32.mrf.mxu0 }
 0x157   :  { %3711 = vmatpush3.msra.mxu1 %v541_v15  ;;  %1912 = vmatmul.mubr.f32.gmra.mxu0 %v3977_v46  ;;  %v1002_v49 = vadd.f32 %v1001_v38, %v5737_v5  ;;  %v535_v38 = vld [vmem:[%s8213_s1 + $0x9e8] sm:$0xff] }
 0x158   :  { %2056 = vmatprep.mubr.f32.mxu1 %v3978_v53  ;;  %3635 = vmatpush3.msra.mxu0 %v439_v29  ;;  %v6379_v60 = vpop.f32.mrf.mxu0  ;;  %v481_v29 = vld [vmem:[%s8213_s1 + $0x838] sm:$0xff] }
 0x159   :  { %3712 = vmatprep.subr.mxu1 %v586_v35  ;;  %1916 = vmatprep.mubr.f32.mxu0 %v3979_v3  ;;  %v1162_v10 = vpop.f32.mrf.mxu1  ;;  %v3982_v35 = vld [vmem:[%s8214_s0 + $0x2b8] sm:$0xff]  ;;  %v3984_v3 = vld [vmem:[%s8214_s0 + $0x2b0] sm:$0xff] }
 0x15a   :  { %2057 = vmatmul.mubr.f32.gmra.mxu1 %v3980_v11  ;;  %3636 = vmatprep.subr.mxu0 %v484_v48  ;;  %v6394_v15 = vadd.f32 %v1162_v10, %v1002_v49  ;;  %v6413_v48 = vrot.slane %v5714_v62, %v8221_v0  ;;  %v3983_v49 = vld [vmem:[%s8214_s0 + $0x308] sm:$0xff]  ;;  %v433_v53 = vld [vmem:[%s8213_s1 + $0x6b8] sm:$0xff]  ;;  %v580_v62 = vld [vmem:[%s8213_s1 + $0xb50] sm:$0xff] }
 0x15b   :  { %3713 = vmatpush3.msra.mxu1 %v538_v58  ;;  %1917 = vmatmul.mubr.f32.gmra.mxu0 %v3981_v28  ;;  %v6402_v32 = vpop.f32.mrf.mxu1  ;;  %v3985_v10 = vld [vmem:[%s8214_s0 + $0x300] sm:$0xff]  ;;  %v3986_v28 = vld [vmem:[%s8214_s0 + $0x318] sm:$0xff]  ;;  %v4000_v0 = vld [vmem:[%s8214_s0 + $0x430] sm:$0xff] }
 0x15c   :  { %2061 = vmatprep.mubr.f32.mxu1 %v3982_v35  ;;  %3637 = vmatpush3.msra.mxu0 %v436_v8  ;;  %v1007_v46 = vpop.f32.mrf.mxu0 }
 0x15d   :  { %3714 = vmatprep.subr.mxu1 %v583_v13  ;;  %1921 = vmatprep.mubr.f32.mxu0 %v3983_v49  ;;  %v1008_v58 = vadd.f32 %v1007_v46, %v5737_v5  ;;  %v478_v5 = vld [vmem:[%s8213_s1 + $0x820] sm:$0xff] }
 0x15e   :  { %2062 = vmatmul.mubr.f32.gmra.mxu1 %v3984_v3  ;;  %3638 = vmatprep.subr.mxu0 %v481_v29  ;;  %v1009_v8 = vpop.f32.mrf.mxu0  ;;  %v532_v29 = vld [vmem:[%s8213_s1 + $0x9d0] sm:$0xff]  ;;  %v430_v46 = vld [vmem:[%s8213_s1 + $0x6a0] sm:$0xff] }
 0x15f   :  { %3715 = vmatpush3.msra.mxu1 %v535_v38  ;;  %1922 = vmatmul.mubr.f32.gmra.mxu0 %v3985_v10  ;;  %v1010_v11 = vadd.f32 %v1009_v8, %v6413_v48  ;;  %v1168_v13 = vpop.f32.mrf.mxu1  ;;  %v3987_v38 = vld [vmem:[%s8214_s0 + $0x368] sm:$0xff]  ;;  %v3989_v8 = vld [vmem:[%s8214_s0 + $0x360] sm:$0xff] }
 0x160   :  { %2066 = vmatprep.mubr.f32.mxu1 %v3986_v28  ;;  %3639 = vmatpush3.msra.mxu0 %v433_v53  ;;  %v6441_v35 = vadd.f32 %v1168_v13, %v1008_v58  ;;  %v3988_v53 = vld [vmem:[%s8214_s0 + $0x310] sm:$0xff]  ;;  %v577_v58 = vld [vmem:[%s8213_s1 + $0xb38] sm:$0xff]  ;;  %v475_v10 = vld [vmem:[%s8213_s1 + $0x808] sm:$0xff] }
 0x161   :  { %3716 = vmatprep.subr.mxu1 %v580_v62  ;;  %1926 = vmatprep.mubr.f32.mxu0 %v3987_v38  ;;  %v1170_v49 = vpop.f32.mrf.mxu1 }
 0x162   :  { %2067 = vmatmul.mubr.f32.gmra.mxu1 %v3988_v53  ;;  %3640 = vmatprep.subr.mxu0 %v478_v5  ;;  %v6455_v3 = vadd.f32 %v1170_v49, %v1010_v11  ;;  %v1239_v62 = vpop.f32.mrf.mxu0  ;;  %v3990_v5 = vld [vmem:[%s8214_s0 + $0x378] sm:$0xff]  ;;  %v574_v49 = vld [vmem:[%s8213_s1 + $0xb20] sm:$0xff] }
 0x163   :  { %3717 = vmatpush3.msra.mxu1 %v532_v29  ;;  %1927 = vmatmul.mubr.f32.gmra.mxu0 %v3989_v8  ;;  %v1240_v13 = vadd.f32 %v1239_v62, %v5786_v24  ;;  %v529_v11 = vld [vmem:[%s8213_s1 + $0x9b8] sm:$0xff]  ;;  %v3991_v29 = vld [vmem:[%s8214_s0 + $0x3c8] sm:$0xff]  ;;  %v472_v62 = vld [vmem:[%s8213_s1 + $0x7f0] sm:$0xff] }
 0x164   :  { %2071 = vmatprep.mubr.f32.mxu1 %v3990_v5  ;;  %3641 = vmatpush3.msra.mxu0 %v430_v46  ;;  %v6470_v28 = vpop.f32.mrf.mxu0  ;;  %v427_v24 = vld [vmem:[%s8213_s1 + $0x688] sm:$0xff]  ;;  %v3992_v46 = vld [vmem:[%s8214_s0 + $0x370] sm:$0xff] }
 0x165   :  { %3718 = vmatprep.subr.mxu1 %v577_v58  ;;  %1931 = vmatprep.mubr.f32.mxu0 %v3991_v29  ;;  %v1400_v38 = vpop.f32.mrf.mxu1  ;;  %v3993_v58 = vld [vmem:[%s8214_s0 + $0x3c0] sm:$0xff]  ;;  %v932_v29 = vadd.f32 %v5861_v55, %v6413_v48  ;;  %v571_v55 = vld [vmem:[%s8213_s1 + $0xb08] sm:$0xff] }
 0x166   :  { %2072 = vmatmul.mubr.f32.gmra.mxu1 %v3992_v46  ;;  %3642 = vmatprep.subr.mxu0 %v475_v10  ;;  %v6484_v53 = vadd.f32 %v1400_v38, %v1240_v13  ;;  %v3994_v10 = vld [vmem:[%s8214_s0 + $0x3d8] sm:$0xff]  ;;  %v526_v13 = vld [vmem:[%s8213_s1 + $0x9a0] sm:$0xff]  ;;  %v3995_v38 = vld [vmem:[%s8214_s0 + $0x428] sm:$0xff] }
 0x167   :  { %3719 = vmatpush3.msra.mxu1 %v529_v11  ;;  %1932 = vmatmul.mubr.f32.gmra.mxu0 %v3993_v58  ;;  %v1245_v8 = vpop.f32.mrf.mxu0  ;;  %v6492_v5 = vpop.f32.mrf.mxu1  ;;  %v424_v46 = vld [vmem:[%s8213_s1 + $0x670] sm:$0xff] }
 0x168   :  { %2076 = vmatprep.mubr.f32.mxu1 %v3994_v10  ;;  %3643 = vmatpush3.msra.mxu0 %v427_v24  ;;  %v1246_v11 = vadd.f32 %v1245_v8, %v5831_v42  ;;  %v3996_v42 = vld [vmem:[%s8214_s0 + $0x3d0] sm:$0xff]  ;;  %v3997_v8 = vld [vmem:[%s8214_s0 + $0x420] sm:$0xff]  ;;  %v469_v10 = vld [vmem:[%s8213_s1 + $0x7d8] sm:$0xff] }
 0x169   :  { %3720 = vmatprep.subr.mxu1 %v574_v49  ;;  %1936 = vmatprep.mubr.f32.mxu0 %v3995_v38  ;;  %v6509_v24 = vpop.f32.mrf.mxu0  ;;  %v1406_v58 = vpop.f32.mrf.mxu1 }
 0x16a   :  { %2077 = vmatmul.mubr.f32.gmra.mxu1 %v3996_v42  ;;  %3644 = vmatprep.subr.mxu0 %v472_v62  ;;  %v6517_v49 = vadd.f32 %v1406_v58, %v1246_v11  ;;  %v3998_v62 = vld [vmem:[%s8214_s0 + $0x438] sm:$0xff]  ;;  %v1093_v58 = vadd.f32 %v5883_v2, %v932_v29  ;;  %v3999_v42 = vld [vmem:[%s8214_s0 + $0x488] sm:$0xff]  ;;  %v568_v2 = vld [vmem:[%s8213_s1 + $0xaf0] sm:$0xff] }
 0x16b   :  { %3721 = vmatpush3.msra.mxu1 %v526_v13  ;;  %1937 = vmatmul.mubr.f32.gmra.mxu0 %v3997_v8  ;;  %v6525_v38 = vpop.f32.mrf.mxu1  ;;  %v523_v13 = vld [vmem:[%s8213_s1 + $0x988] sm:$0xff]  ;;  %v421_v8 = vld [vmem:[%s8213_s1 + $0x658] sm:$0xff] }
 0x16c   :  { %2081 = vmatprep.mubr.f32.mxu1 %v3998_v62  ;;  %3645 = vmatpush3.msra.mxu0 %v424_v46  ;;  %v1251_v11 = vpop.f32.mrf.mxu0  ;;  %v938_v46 = vadd.f32 %v5905_v12, %v6413_v48  ;;  %v466_v12 = vld [vmem:[%s8213_s1 + $0x7c0] sm:$0xff] }
 0x16d   :  { %3722 = vmatprep.subr.mxu1 %v571_v55  ;;  %1941 = vmatprep.mubr.f32.mxu0 %v3999_v42  ;;  %v1252_v62 = vadd.f32 %v1251_v11, %v5875_v63  ;;  %v4001_v63 = vld [vmem:[%s8214_s0 + $0x480] sm:$0xff] }
 0x16e   :  { %2082 = vmatmul.mubr.f32.gmra.mxu1 %v4000_v0  ;;  %3646 = vmatprep.subr.mxu0 %v469_v10  ;;  %v1253_v29 = vpop.f32.mrf.mxu0  ;;  %v1412_v55 = vpop.f32.mrf.mxu1  ;;  %v4002_v0 = vld [vmem:[%s8214_s0 + $0x498] sm:$0xff]  ;;  %v520_v10 = vld [vmem:[%s8213_s1 + $0x970] sm:$0xff] }
 0x16f   :  { %3723 = vmatpush3.msra.mxu1 %v523_v13  ;;  %1942 = vmatmul.mubr.f32.gmra.mxu0 %v4001_v63  ;;  %v1254_v11 = vadd.f32 %v1253_v29, %v1093_v58  ;;  %v6555_v42 = vadd.f32 %v1412_v55, %v1252_v62  ;;  %v4003_v63 = vld [vmem:[%s8214_s0 + $0x4e8] sm:$0xff]  ;;  %v418_v58 = vld [vmem:[%s8213_s1 + $0x640] sm:$0xff]  ;;  %v4004_v55 = vld [vmem:[%s8214_s0 + $0x490] sm:$0xff] }
 0x170   :  { %2086 = vmatprep.mubr.f32.mxu1 %v4002_v0  ;;  %3647 = vmatpush3.msra.mxu0 %v421_v8  ;;  %v1414_v13 = vpop.f32.mrf.mxu1  ;;  %v1099_v8 = vadd.f32 %v5928_v22, %v938_v46  ;;  %v463_v22 = vld [vmem:[%s8213_s1 + $0x7a8] sm:$0xff] }
 0x171   :  { %3724 = vmatprep.subr.mxu1 %v568_v2  ;;  %1946 = vmatprep.mubr.f32.mxu0 %v4003_v63  ;;  %v1257_v62 = vpop.f32.mrf.mxu0  ;;  %v6569_v29 = vadd.f32 %v1414_v13, %v1254_v11  ;;  %v565_v2 = vld [vmem:[%s8213_s1 + $0xad8] sm:$0xff]  ;;  %v4005_v11 = vld [vmem:[%s8214_s0 + $0x4e0] sm:$0xff] }
 0x172   :  { %2087 = vmatmul.mubr.f32.gmra.mxu1 %v4004_v55  ;;  %3648 = vmatprep.subr.mxu0 %v466_v12  ;;  %v1258_v0 = vadd.f32 %v1257_v62, %v5920_v19  ;;  %v944_v12 = vadd.f32 %v5950_v33, %v6413_v48  ;;  %v4006_v13 = vld [vmem:[%s8214_s0 + $0x4f8] sm:$0xff]  ;;  %v4007_v62 = vld [vmem:[%s8214_s0 + $0x548] sm:$0xff] }
 0x173   :  { %3725 = vmatpush3.msra.mxu1 %v520_v10  ;;  %1947 = vmatmul.mubr.f32.gmra.mxu0 %v4005_v11  ;;  %v1259_v46 = vpop.f32.mrf.mxu0  ;;  %v517_v19 = vld [vmem:[%s8213_s1 + $0x958] sm:$0xff]  ;;  %v415_v33 = vld [vmem:[%s8213_s1 + $0x628] sm:$0xff]  ;;  %v4009_v11 = vld [vmem:[%s8214_s0 + $0x540] sm:$0xff] }
 0x174   :  { %2091 = vmatprep.mubr.f32.mxu1 %v4006_v13  ;;  %3649 = vmatpush3.msra.mxu0 %v418_v58  ;;  %v1260_v10 = vadd.f32 %v1259_v46, %v1099_v8  ;;  %v1418_v63 = vpop.f32.mrf.mxu1  ;;  %v4008_v58 = vld [vmem:[%s8214_s0 + $0x4f0] sm:$0xff]  ;;  %v562_v8 = vld [vmem:[%s8213_s1 + $0xac0] sm:$0xff] }
 0x175   :  { %3726 = vmatprep.subr.mxu1 %v565_v2  ;;  %1951 = vmatprep.mubr.f32.mxu0 %v4007_v62  ;;  %v6599_v55 = vadd.f32 %v1418_v63, %v1258_v0  ;;  %v460_v0 = vld [vmem:[%s8213_s1 + $0x790] sm:$0xff]  ;;  %v4010_v63 = vld [vmem:[%s8214_s0 + $0x558] sm:$0xff] }
 0x176   :  { %2092 = vmatmul.mubr.f32.gmra.mxu1 %v4008_v58  ;;  %3650 = vmatprep.subr.mxu0 %v463_v22  ;;  %v1420_v2 = vpop.f32.mrf.mxu1  ;;  %v1105_v22 = vadd.f32 %v5972_v44, %v944_v12  ;;  %v412_v44 = vld [vmem:[%s8213_s1 + $0x610] sm:$0xff] }
 0x177   :  { %3727 = vmatpush3.msra.mxu1 %v517_v19  ;;  %1952 = vmatmul.mubr.f32.gmra.mxu0 %v4009_v11  ;;  %v1263_v46 = vpop.f32.mrf.mxu0  ;;  %v6613_v13 = vadd.f32 %v1420_v2, %v1260_v10  ;;  %v514_v19 = vld [vmem:[%s8213_s1 + $0x940] sm:$0xff]  ;;  %v4011_v10 = vld [vmem:[%s8214_s0 + $0x5a8] sm:$0xff]  ;;  %v4012_v58 = vld [vmem:[%s8214_s0 + $0x550] sm:$0xff] }
 0x178   :  { %2096 = vmatprep.mubr.f32.mxu1 %v4010_v63  ;;  %3651 = vmatpush3.msra.mxu0 %v415_v33  ;;  %v1264_v62 = vadd.f32 %v1263_v46, %v5964_v40  ;;  %v950_v33 = vadd.f32 %v5994_v56, %v6413_v48  ;;  %v559_v40 = vld [vmem:[%s8213_s1 + $0xaa8] sm:$0xff]  ;;  %v4013_v11 = vld [vmem:[%s8214_s0 + $0x5a0] sm:$0xff]  ;;  %v697_v56 = vld [vmem:[%s8213_s1 + $0xef8] sm:$0xff] }
 0x179   :  { %3728 = vmatprep.subr.mxu1 %v562_v8  ;;  %1956 = vmatprep.mubr.f32.mxu0 %v4011_v10  ;;  %v1265_v12 = vpop.f32.mrf.mxu0 }
 0x17a   :  { %2097 = vmatmul.mubr.f32.gmra.mxu1 %v4012_v58  ;;  %3652 = vmatprep.subr.mxu0 %v460_v0  ;;  %v1266_v8 = vadd.f32 %v1265_v12, %v1105_v22  ;;  %v1424_v2 = vpop.f32.mrf.mxu1  ;;  %v4014_v0 = vld [vmem:[%s8214_s0 + $0x5b8] sm:$0xff]  ;;  %v511_v22 = vld [vmem:[%s8213_s1 + $0x928] sm:$0xff]  ;;  %v4016_v58 = vld [vmem:[%s8214_s0 + $0x5b0] sm:$0xff] }
 0x17b   :  { %3729 = vmatpush3.msra.mxu1 %v514_v19  ;;  %1957 = vmatmul.mubr.f32.gmra.mxu0 %v4013_v11  ;;  %v6643_v46 = vadd.f32 %v1424_v2, %v1264_v62  ;;  %v4015_v19 = vld [vmem:[%s8214_s0 + $0x28] sm:$0xff]  ;;  %v556_v62 = vld [vmem:[%s8213_s1 + $0xa90] sm:$0xff]  ;;  %v649_v2 = vld [vmem:[%s8213_s1 + $0xd78] sm:$0xff] }
 0x17c   :  { %2101 = vmatprep.mubr.f32.mxu1 %v4014_v0  ;;  %3653 = vmatpush3.msra.mxu0 %v412_v44  ;;  %v1426_v63 = vpop.f32.mrf.mxu1  ;;  %v1111_v44 = vadd.f32 %v6017_v6, %v950_v33  ;;  %v4017_v6 = vld [vmem:[%s8214_s0 + $0x20] sm:$0xff] }
 0x17d   :  { %3730 = vmatprep.subr.mxu1 %v559_v40  ;;  %2171 = vmatprep.mubr.f32.mxu0 %v4015_v19  ;;  %v1269_v10 = vpop.f32.mrf.mxu0  ;;  %v6657_v12 = vadd.f32 %v1426_v63, %v1266_v8  ;;  %v508_v40 = vld [vmem:[%s8213_s1 + $0x910] sm:$0xff]  ;;  %v956_v8 = vadd.f32 %v6039_v16, %v6413_v48  ;;  %v646_v63 = vld [vmem:[%s8213_s1 + $0xd60] sm:$0xff] }
 0x17e   :  { %2102 = vmatmul.mubr.f32.gmra.mxu1 %v4016_v58  ;;  %3782 = vmatprep.subr.mxu0 %v697_v56  ;;  %v1270_v11 = vadd.f32 %v1269_v10, %v6009_v1  ;;  %v4018_v56 = vld [vmem:[%s8214_s0 + $0x38] sm:$0xff]  ;;  %v694_v1 = vld [vmem:[%s8213_s1 + $0xee0] sm:$0xff]  ;;  %v4019_v16 = vld [vmem:[%s8214_s0 + $0x30] sm:$0xff] }
 0x17f   :  { %3731 = vmatpush3.msra.mxu1 %v511_v22  ;;  %2172 = vmatmul.mubr.f32.vlgmr.msra.gmra.mxu0 %v4017_v6  ;;  %v1271_v33 = vpop.f32.mrf.mxu0  ;;  %v691_v58 = vld [vmem:[%s8213_s1 + $0xec8] sm:$0xff]  ;;  %v4022_v6 = vld [vmem:[%s8214_s0 + $0x98] sm:$0xff] }
 0x180   :  { %3732 = vmatprep.subr.mxu1 %v556_v62  ;;  %2316 = vmatprep.mubr.f32.mxu1 %v4018_v56  ;;  %v1272_v0 = vadd.f32 %v1271_v33, %v1111_v44  ;;  %v1430_v22 = vpop.f32.mrf.mxu1  ;;  %v4020_v62 = vld [vmem:[%s8214_s0 + $0x88] sm:$0xff]  ;;  %v4021_v44 = vld [vmem:[%s8214_s0 + $0x80] sm:$0xff]  ;;  %v745_v33 = vld [vmem:[%s8213_s1 + $0x1078] sm:$0xff] }
 0x181   :  { %3733 = vmatpush3.msra.mxu1 %v508_v40  ;;  %3783 = vmatpush3.msra.mxu0 %v649_v2  ;;  %v6684_v19 = vadd.f32 %v1430_v22, %v1270_v11  ;;  %v1117_v11 = vadd.f32 %v6061_v30, %v956_v8  ;;  %v643_v30 = vld [vmem:[%s8213_s1 + $0xd48] sm:$0xff]  ;;  %v962_v22 = vadd.f32 %v6083_v43, %v6413_v48  ;;  %v4026_v43 = vld [vmem:[%s8214_s0 + $0xf8] sm:$0xff] }
 0x182   :  { %2317 = vmatmul.mubr.f32.vlgmr.msra.gmra.mxu1 %v4019_v16  ;;  %2176 = vmatprep.mubr.f32.mxu0 %v4020_v62  ;;  %v1432_v10 = vpop.f32.mrf.mxu1  ;;  %v4025_v62 = vld [vmem:[%s8214_s0 + $0xe0] sm:$0xff] }
 0x183   :  { %2177 = vmatmul.mubr.f32.gmra.mxu0 %v4021_v44  ;;  %3784 = vmatprep.subr.mxu0 %v694_v1  ;;  %v1275_v40 = vpop.f32.mrf.mxu0  ;;  %v6698_v2 = vadd.f32 %v1432_v10, %v1272_v0  ;;  %v4145_v1 = vmov 0.0   ;;  %v4023_v0 = vld [vmem:[%s8214_s0 + $0xe8] sm:$0xff]  ;;  %v688_v10 = vld [vmem:[%s8213_s1 + $0xeb0] sm:$0xff] }
 0x184   :  { %2321 = vmatprep.mubr.f32.mxu1 %v4022_v6  ;;  %3785 = vmatpush3.msra.mxu0 %v646_v63  ;;  %v1276_v56 = vadd.f32 %v1275_v40, %v6053_v26  ;;  %v4024_v26 = vld [vmem:[%s8214_s0 + $0x90] sm:$0xff] }
 0x185   :  { %2542 = vmatprep.subr.mxu1 %v4145_v1  ;;  %2181 = vmatprep.mubr.f32.mxu0 %v4023_v0  ;;  %v1277_v8 = vpop.f32.mrf.mxu0  ;;  %v4028_v0 = vld [vmem:[%s8214_s0 + $0xf0] sm:$0xff] }
 0x186   :  { %2322 = vmatmul.mubr.f32.gmra.mxu1 %v4024_v26  ;;  %3786 = vmatprep.subr.mxu0 %v691_v58  ;;  %v1278_v63 = vadd.f32 %v1277_v8, %v1117_v11  ;;  %v1436_v16 = vpop.f32.mrf.mxu1  ;;  %v742_v58 = vld [vmem:[%s8213_s1 + $0x1060] sm:$0xff]  ;;  %v4027_v11 = vld [vmem:[%s8214_s0 + $0x148] sm:$0xff]  ;;  %v640_v8 = vld [vmem:[%s8213_s1 + $0xd30] sm:$0xff] }
 0x187   :  { %2543 = vmatpush1.msra.mxu1 %v745_v33  ;;  %2182 = vmatmul.mubr.f32.gmra.mxu0 %v4025_v62  ;;  %v6726_v44 = vadd.f32 %v1436_v16, %v1276_v56  ;;  %v1123_v56 = vadd.f32 %v6106_v57, %v962_v22  ;;  %v4029_v57 = vld [vmem:[%s8214_s0 + $0x140] sm:$0xff]  ;;  %v4030_v16 = vld [vmem:[%s8214_s0 + $0x158] sm:$0xff] }
 0x188   :  { %2326 = vmatprep.mubr.f32.mxu1 %v4026_v43  ;;  %3787 = vmatpush3.msra.mxu0 %v643_v30  ;;  %v1438_v40 = vpop.f32.mrf.mxu1  ;;  %v739_v30 = vld [vmem:[%s8213_s1 + $0x1048] sm:$0xff] }
 0x189   :  { %2544 = vmatprep.subr.mxu1 %v4145_v1  ;;  %2186 = vmatprep.mubr.f32.mxu0 %v4027_v11  ;;  %v1281_v6 = vpop.f32.mrf.mxu0  ;;  %v6738_v33 = vadd.f32 %v1438_v40, %v1278_v63  ;;  %v968_v63 = vadd.f32 %v6128_v9, %v6413_v48  ;;  %v4031_v9 = vld [vmem:[%s8214_s0 + $0x150] sm:$0xff]  ;;  %v733_v40 = vld [vmem:[%s8213_s1 + $0x1018] sm:$0xff] }
 0x18a   :  { %2327 = vmatmul.mubr.f32.gmra.mxu1 %v4028_v0  ;;  %3788 = vmatprep.subr.mxu0 %v688_v10  ;;  %v1282_v26 = vadd.f32 %v1281_v6, %v6098_v52  ;;  %v736_v52 = vld [vmem:[%s8213_s1 + $0x1030] sm:$0xff]  ;;  %v4032_v6 = vld [vmem:[%s8214_s0 + $0x1a8] sm:$0xff] }
 0x18b   :  { %2545 = vmatpush1.msra.mxu1 %v742_v58  ;;  %2187 = vmatmul.mubr.f32.gmra.mxu0 %v4029_v57  ;;  %v1283_v22 = vpop.f32.mrf.mxu0  ;;  %v685_v58 = vld [vmem:[%s8213_s1 + $0xe98] sm:$0xff] }
 0x18c   :  { %2546 = vmatprep.subr.mxu1 %v4145_v1  ;;  %2331 = vmatprep.mubr.f32.mxu1 %v4030_v16  ;;  %v1284_v62 = vadd.f32 %v1283_v22, %v1123_v56  ;;  %v1442_v10 = vpop.f32.mrf.mxu1  ;;  %v637_v56 = vld [vmem:[%s8213_s1 + $0xd18] sm:$0xff]  ;;  %v730_v22 = vld [vmem:[%s8213_s1 + $0x1000] sm:$0xff] }
 0x18d   :  { %2547 = vmatpush1.msra.mxu1 %v739_v30  ;;  %3789 = vmatpush3.msra.mxu0 %v640_v8  ;;  %v6763_v43 = vadd.f32 %v1442_v10, %v1282_v26  ;;  %v1129_v8 = vadd.f32 %v6150_v23, %v968_v63  ;;  %v4033_v26 = vld [vmem:[%s8214_s0 + $0x1a0] sm:$0xff]  ;;  %v4034_v23 = vld [vmem:[%s8214_s0 + $0x1b8] sm:$0xff]  ;;  %v4035_v10 = vld [vmem:[%s8214_s0 + $0x1b0] sm:$0xff] }
 0x18e   :  { %2548 = vmatprep.subr.mxu1 %v4145_v1  ;;  %2332 = vmatmul.mubr.f32.gmra.mxu1 %v4031_v9  ;;  %v1444_v11 = vpop.f32.mrf.mxu1  ;;  %v4036_v9 = vld [vmem:[%s8214_s0 + $0x208] sm:$0xff] }
 0x18f   :  { %2549 = vmatpush1.msra.mxu1 %v736_v52  ;;  %2191 = vmatprep.mubr.f32.mxu0 %v4032_v6  ;;  %v1287_v0 = vpop.f32.mrf.mxu0  ;;  %v6781_v30 = vadd.f32 %v1444_v11, %v1284_v62  ;;  %v974_v52 = vadd.f32 %v6169_v37, %v6413_v48  ;;  %v4037_v6 = vld [vmem:[%s8214_s0 + $0x200] sm:$0xff] }
 0x190   :  { %2550 = vmatprep.subr.mxu1 %v4145_v1  ;;  %2192 = vmatmul.mubr.f32.gmra.mxu0 %v4033_v26  ;;  %v1288_v57 = vadd.f32 %v1287_v0, %v6142_v17  ;;  %v682_v17 = vld [vmem:[%s8213_s1 + $0xe80] sm:$0xff]  ;;  %v4038_v26 = vld [vmem:[%s8214_s0 + $0x218] sm:$0xff] }
 0x191   :  { %3790 = vmatprep.subr.mxu0 %v685_v58  ;;  %2551 = vmatpush1.msra.mxu1 %v733_v40  ;;  %v1289_v16 = vpop.f32.mrf.mxu0  ;;  %v634_v58 = vld [vmem:[%s8213_s1 + $0xd00] sm:$0xff]  ;;  %v727_v40 = vld [vmem:[%s8213_s1 + $0xfe8] sm:$0xff] }
 0x192   :  { %2336 = vmatprep.mubr.f32.mxu1 %v4034_v23  ;;  %3791 = vmatpush3.msra.mxu0 %v637_v56  ;;  %v1290_v63 = vadd.f32 %v1289_v16, %v1129_v8  ;;  %v1448_v62 = vpop.f32.mrf.mxu1  ;;  %v1135_v8 = vadd.f32 %v6189_v51, %v974_v52  ;;  %v679_v16 = vld [vmem:[%s8213_s1 + $0xe68] sm:$0xff]  ;;  %v980_v52 = vadd.f32 %v6207_v4, %v6413_v48  ;;  %v4039_v23 = vld [vmem:[%s8214_s0 + $0x210] sm:$0xff]  ;;  %v721_v4 = vld [vmem:[%s8213_s1 + $0xfb8] sm:$0xff] }
 0x193   :  { %2337 = vmatmul.mubr.f32.gmra.mxu1 %v4035_v10  ;;  %2552 = vmatprep.subr.mxu1 %v4145_v1  ;;  %v6804_v37 = vadd.f32 %v1448_v62, %v1288_v57  ;;  %v724_v57 = vld [vmem:[%s8213_s1 + $0xfd0] sm:$0xff]  ;;  %v631_v62 = vld [vmem:[%s8213_s1 + $0xce8] sm:$0xff] }
 0x194   :  { %2196 = vmatprep.mubr.f32.mxu0 %v4036_v9  ;;  %2553 = vmatpush1.msra.mxu1 %v730_v22  ;;  %v1450_v11 = vpop.f32.mrf.mxu1  ;;  %v4041_v9 = vld [vmem:[%s8214_s0 + $0x260] sm:$0xff] }
 0x195   :  { %2197 = vmatmul.mubr.f32.gmra.mxu0 %v4037_v6  ;;  %3792 = vmatprep.subr.mxu0 %v682_v17  ;;  %v1293_v56 = vpop.f32.mrf.mxu0  ;;  %v6818_v0 = vadd.f32 %v1450_v11, %v1290_v63  ;;  %v718_v11 = vld [vmem:[%s8213_s1 + $0xfa0] sm:$0xff] }
 0x196   :  { %2554 = vmatprep.subr.mxu1 %v4145_v1  ;;  %2341 = vmatprep.mubr.f32.mxu1 %v4038_v26  ;;  %v1294_v22 = vadd.f32 %v1293_v56, %v6181_v47  ;;  %v4040_v47 = vld [vmem:[%s8214_s0 + $0x268] sm:$0xff]  ;;  %v676_v26 = vld [vmem:[%s8213_s1 + $0xe50] sm:$0xff] }
 0x197   :  { %3793 = vmatpush3.msra.mxu0 %v634_v58  ;;  %2555 = vmatpush1.msra.mxu1 %v727_v40  ;;  %v1295_v51 = vpop.f32.mrf.mxu0  ;;  %v4042_v40 = vld [vmem:[%s8214_s0 + $0x278] sm:$0xff] }
 0x198   :  { %2342 = vmatmul.mubr.f32.gmra.mxu1 %v4039_v23  ;;  %2556 = vmatprep.subr.mxu1 %v4145_v1  ;;  %v1296_v17 = vadd.f32 %v1295_v51, %v1135_v8  ;;  %v1454_v63 = vpop.f32.mrf.mxu1  ;;  %v1141_v8 = vadd.f32 %v6229_v21, %v980_v52  ;;  %v986_v51 = vadd.f32 %v6250_v39, %v6413_v48  ;;  %v4044_v52 = vld [vmem:[%s8214_s0 + $0x2c8] sm:$0xff]  ;;  %v4046_v39 = vld [vmem:[%s8214_s0 + $0x2d8] sm:$0xff] }
 0x199   :  { %2201 = vmatprep.mubr.f32.mxu0 %v4040_v47  ;;  %2557 = vmatpush1.msra.mxu1 %v724_v57  ;;  %v6847_v10 = vadd.f32 %v1454_v63, %v1294_v22  ;;  %v4043_v22 = vld [vmem:[%s8214_s0 + $0x270] sm:$0xff]  ;;  %v715_v63 = vld [vmem:[%s8213_s1 + $0xf88] sm:$0xff] }
 0x19a   :  { %2202 = vmatmul.mubr.f32.gmra.mxu0 %v4041_v9  ;;  %3794 = vmatprep.subr.mxu0 %v679_v16  ;;  %v1456_v58 = vpop.f32.mrf.mxu1  ;;  %v628_v16 = vld [vmem:[%s8213_s1 + $0xcd0] sm:$0xff]  ;;  %v673_v9 = vld [vmem:[%s8213_s1 + $0xe38] sm:$0xff] }
 0x19b   :  { %2558 = vmatprep.subr.mxu1 %v4145_v1  ;;  %2346 = vmatprep.mubr.f32.mxu1 %v4042_v40  ;;  %v1299_v6 = vpop.f32.mrf.mxu0  ;;  %v6859_v56 = vadd.f32 %v1456_v58, %v1296_v17  ;;  %v4045_v17 = vld [vmem:[%s8214_s0 + $0x2c0] sm:$0xff]  ;;  %v712_v58 = vld [vmem:[%s8213_s1 + $0xf70] sm:$0xff] }
 0x19c   :  { %3795 = vmatpush3.msra.mxu0 %v631_v62  ;;  %2559 = vmatpush1.msra.mxu1 %v721_v4  ;;  %v1300_v57 = vadd.f32 %v1299_v6, %v6221_v14  ;;  %v4047_v4 = vld [vmem:[%s8214_s0 + $0x2d0] sm:$0xff]  ;;  %v1147_v6 = vadd.f32 %v6272_v61, %v986_v51 }
 0x19d   :  { %8231 = vst [vmem:[#allocation3_spill] sm:$0xff] %v6859_v56  ;;  %2347 = vmatmul.mubr.f32.gmra.mxu1 %v4043_v22  ;;  %2560 = vmatprep.subr.mxu1 %v4145_v1  ;;  %v1301_v21 = vpop.f32.mrf.mxu0  ;;  %v4049_v22 = vld [vmem:[%s8214_s0 + $0x320] sm:$0xff] }
 0x19e   :  { %2206 = vmatprep.mubr.f32.mxu0 %v4044_v52  ;;  %2561 = vmatpush1.msra.mxu1 %v718_v11  ;;  %v1302_v14 = vadd.f32 %v1301_v21, %v1141_v8  ;;  %v1460_v23 = vpop.f32.mrf.mxu1  ;;  %v4048_v8 = vld [vmem:[%s8214_s0 + $0x328] sm:$0xff]  ;;  %v709_v21 = vld [vmem:[%s8213_s1 + $0xf58] sm:$0xff] }
 0x19f   :  { %2207 = vmatmul.mubr.f32.gmra.mxu0 %v4045_v17  ;;  %3796 = vmatprep.subr.mxu0 %v676_v26  ;;  %v6884_v47 = vadd.f32 %v1460_v23, %v1300_v57  ;;  %v625_v26 = vld [vmem:[%s8213_s1 + $0xcb8] sm:$0xff]  ;;  %v670_v23 = vld [vmem:[%s8213_s1 + $0xe20] sm:$0xff] }
 0x1a0   :  { %2351 = vmatprep.mubr.f32.mxu1 %v4046_v39  ;;  %3797 = vmatpush3.msra.mxu0 %v628_v16  ;;  %v1462_v62 = vpop.f32.mrf.mxu1  ;;  %v992_v16 = vadd.f32 %v6293_v20, %v6413_v48  ;;  %v4051_v20 = vld [vmem:[%s8214_s0 + $0x330] sm:$0xff]  ;;  %v706_v17 = vld [vmem:[%s8213_s1 + $0xf40] sm:$0xff]  ;;  %v4052_v39 = vld [vmem:[%s8214_s0 + $0x388] sm:$0xff] }
 0x1a1   :  { %2562 = vmatprep.subr.mxu1 %v4145_v1  ;;  %2352 = vmatmul.mubr.f32.gmra.mxu1 %v4047_v4  ;;  %v1305_v40 = vpop.f32.mrf.mxu0  ;;  %v6899_v11 = vadd.f32 %v1462_v62, %v1302_v14  ;;  %v622_v62 = vld [vmem:[%s8213_s1 + $0xca0] sm:$0xff] }
 0x1a2   :  { %2563 = vmatpush1.msra.mxu1 %v715_v63  ;;  %2211 = vmatprep.mubr.f32.mxu0 %v4048_v8  ;;  %v1306_v57 = vadd.f32 %v1305_v40, %v6264_v54  ;;  %v4050_v54 = vld [vmem:[%s8214_s0 + $0x338] sm:$0xff]  ;;  %v4053_v40 = vld [vmem:[%s8214_s0 + $0x380] sm:$0xff]  ;;  %v703_v8 = vld [vmem:[%s8213_s1 + $0xf28] sm:$0xff] }
 0x1a3   :  { %8232 = vst [vmem:[#allocation4_spill] sm:$0xff] %v6899_v11  ;;  %2564 = vmatprep.subr.mxu1 %v4145_v1  ;;  %2212 = vmatmul.mubr.f32.gmra.mxu0 %v4049_v22  ;;  %v1307_v61 = vpop.f32.mrf.mxu0 }
 0x1a4   :  { %3798 = vmatprep.subr.mxu0 %v673_v9  ;;  %2565 = vmatpush1.msra.mxu1 %v712_v58  ;;  %v1308_v51 = vadd.f32 %v1307_v61, %v1147_v6  ;;  %v1466_v52 = vpop.f32.mrf.mxu1  ;;  %v1153_v58 = vadd.f32 %v6315_v41, %v992_v16  ;;  %v4054_v41 = vld [vmem:[%s8214_s0 + $0x398] sm:$0xff]  ;;  %v4055_v16 = vld [vmem:[%s8214_s0 + $0x390] sm:$0xff] }
 0x1a5   :  { %2356 = vmatprep.mubr.f32.mxu1 %v4050_v54  ;;  %3799 = vmatpush3.msra.mxu0 %v625_v26  ;;  %v6921_v14 = vadd.f32 %v1466_v52, %v1306_v57  ;;  %v998_v57 = vadd.f32 %v6336_v7, %v6413_v48  ;;  %v700_v52 = vld [vmem:[%s8213_s1 + $0xf10] sm:$0xff] }
 0x1a6   :  { %2566 = vmatprep.subr.mxu1 %v4145_v1  ;;  %2357 = vmatmul.mubr.f32.gmra.mxu1 %v4051_v20  ;;  %v1468_v63 = vpop.f32.mrf.mxu1  ;;  %v4057_v20 = vld [vmem:[%s8214_s0 + $0x3e0] sm:$0xff] }
 0x1a7   :  { %2567 = vmatpush1.msra.mxu1 %v709_v21  ;;  %2216 = vmatprep.mubr.f32.mxu0 %v4052_v39  ;;  %v1311_v4 = vpop.f32.mrf.mxu0  ;;  %v6939_v9 = vadd.f32 %v1468_v63, %v1308_v51  ;;  %v4056_v21 = vld [vmem:[%s8214_s0 + $0x3e8] sm:$0xff]  ;;  %v1159_v63 = vadd.f32 %v6358_v31, %v998_v57  ;;  %v4058_v39 = vld [vmem:[%s8214_s0 + $0x3f8] sm:$0xff]  ;;  %v616_v57 = vld [vmem:[%s8213_s1 + $0xc70] sm:$0xff] }
 0x1a8   :  { %2568 = vmatprep.subr.mxu1 %v4145_v1  ;;  %2217 = vmatmul.mubr.f32.gmra.mxu0 %v4053_v40  ;;  %v1312_v6 = vadd.f32 %v1311_v4, %v6307_v34  ;;  %v667_v34 = vld [vmem:[%s8213_s1 + $0xe08] sm:$0xff]  ;;  %v1004_v40 = vadd.f32 %v6379_v60, %v6413_v48  ;;  %v781_v60 = vld [vmem:[%s8213_s1 + $0x1198] sm:$0xff] }
 0x1a9   :  { %8233 = vst [vmem:[#allocation5_spill] sm:$0xff] %v6939_v9  ;;  %3800 = vmatprep.subr.mxu0 %v670_v23  ;;  %2569 = vmatpush1.msra.mxu1 %v706_v17  ;;  %v1313_v26 = vpop.f32.mrf.mxu0  ;;  %v619_v51 = vld [vmem:[%s8213_s1 + $0xc88] sm:$0xff] }
 0x1aa   :  { %2361 = vmatprep.mubr.f32.mxu1 %v4054_v41  ;;  %3801 = vmatpush3.msra.mxu0 %v622_v62  ;;  %v1314_v22 = vadd.f32 %v1313_v26, %v1153_v58  ;;  %v1472_v61 = vpop.f32.mrf.mxu1  ;;  %v784_v62 = vld [vmem:[%s8213_s1 + $0x11b0] sm:$0xff] }
 0x1ab   :  { %2570 = vmatprep.subr.mxu1 %v4145_v1  ;;  %2362 = vmatmul.mubr.f32.gmra.mxu1 %v4055_v16  ;;  %v6962_v7 = vadd.f32 %v1472_v61, %v1312_v6  ;;  %v664_v58 = vld [vmem:[%s8213_s1 + $0xdf0] sm:$0xff]  ;;  %v4062_v61 = vld [vmem:[%s8214_s0 + $0x458] sm:$0xff]  ;;  %v778_v16 = vld [vmem:[%s8213_s1 + $0x1180] sm:$0xff] }
 0x1ac   :  { %2571 = vmatpush1.msra.mxu1 %v703_v8  ;;  %2221 = vmatprep.mubr.f32.mxu0 %v4056_v21  ;;  %v1474_v54 = vpop.f32.mrf.mxu1  ;;  %v4059_v6 = vld [vmem:[%s8214_s0 + $0x3f0] sm:$0xff] }
 0x1ad   :  { %2222 = vmatmul.mubr.f32.gmra.mxu0 %v4057_v20  ;;  %3802 = vmatprep.subr.mxu0 %v667_v34  ;;  %v1317_v23 = vpop.f32.mrf.mxu0  ;;  %v6976_v17 = vadd.f32 %v1474_v54, %v1314_v22  ;;  %v4061_v34 = vld [vmem:[%s8214_s0 + $0x440] sm:$0xff]  ;;  %v661_v54 = vld [vmem:[%s8213_s1 + $0xdd8] sm:$0xff] }
 0x1ae   :  { %2572 = vmatprep.subr.mxu1 %v4145_v1  ;;  %2366 = vmatprep.mubr.f32.mxu1 %v4058_v39  ;;  %v1318_v4 = vadd.f32 %v1317_v23, %v6350_v25  ;;  %v4060_v25 = vld [vmem:[%s8214_s0 + $0x448] sm:$0xff]  ;;  %v4063_v23 = vld [vmem:[%s8214_s0 + $0x450] sm:$0xff]  ;;  %v920_v39 = vadd.f32 %v5772_v18, %v6413_v48  ;;  %v4065_v18 = vld [vmem:[%s8214_s0 + $0x4a0] sm:$0xff] }
 0x1af   :  { %8234 = vst [vmem:[#allocation6_spill] sm:$0xff] %v6976_v17  ;;  %3803 = vmatpush3.msra.mxu0 %v619_v51  ;;  %2573 = vmatpush1.msra.mxu1 %v700_v52  ;;  %v1319_v31 = vpop.f32.mrf.mxu0  ;;  %v1165_v52 = vadd.f32 %v6402_v32, %v1004_v40  ;;  %v4064_v32 = vld [vmem:[%s8214_s0 + $0x4a8] sm:$0xff]  ;;  %v4066_v40 = vld [vmem:[%s8214_s0 + $0x4b8] sm:$0xff] }
 0x1b0   :  { %2367 = vmatmul.mubr.f32.gmra.mxu1 %v4059_v6  ;;  %2580 = vmatprep.subr.mxu1 %v4145_v1  ;;  %v1320_v8 = vadd.f32 %v1319_v31, %v1159_v63  ;;  %v1478_v26 = vpop.f32.mrf.mxu1 }
 0x1b1   :  { %2226 = vmatprep.mubr.f32.mxu0 %v4060_v25  ;;  %2581 = vmatpush2.msra.mxu1 %v784_v62  ;;  %v7005_v41 = vadd.f32 %v1478_v26, %v1318_v4  ;;  %v775_v62 = vld [vmem:[%s8213_s1 + $0x1168] sm:$0xff]  ;;  %v772_v26 = vld [vmem:[%s8213_s1 + $0x1150] sm:$0xff] }
 0x1b2   :  { %2227 = vmatmul.mubr.f32.gmra.mxu0 %v4061_v34  ;;  %3804 = vmatprep.subr.mxu0 %v664_v58  ;;  %v1480_v22 = vpop.f32.mrf.mxu1  ;;  %v926_v34 = vadd.f32 %v5816_v36, %v6413_v48 }
 0x1b3   :  { %2582 = vmatprep.subr.mxu1 %v4145_v1  ;;  %2371 = vmatprep.mubr.f32.mxu1 %v4062_v61  ;;  %v1323_v21 = vpop.f32.mrf.mxu0  ;;  %v7017_v51 = vadd.f32 %v1480_v22, %v1320_v8  ;;  %v658_v8 = vld [vmem:[%s8213_s1 + $0xdc0] sm:$0xff]  ;;  %v4067_v22 = vld [vmem:[%s8214_s0 + $0x4b0] sm:$0xff]  ;;  %v4068_v61 = vld [vmem:[%s8214_s0 + $0x508] sm:$0xff] }
 0x1b4   :  { %3805 = vmatpush3.msra.mxu0 %v616_v57  ;;  %2583 = vmatpush2.msra.mxu1 %v781_v60  ;;  %v1324_v20 = vadd.f32 %v1323_v21, %v6394_v15  ;;  %v613_v15 = vld [vmem:[%s8213_s1 + $0xc58] sm:$0xff]  ;;  %v1081_v60 = vadd.f32 %v5794_v27, %v920_v39  ;;  %v4069_v27 = vld [vmem:[%s8214_s0 + $0x500] sm:$0xff] }
 0x1b5   :  { %8235 = vst [vmem:[#allocation7_spill] sm:$0xff] %v7017_v51  ;;  %2372 = vmatmul.mubr.f32.gmra.mxu1 %v4063_v23  ;;  %2584 = vmatprep.subr.mxu1 %v4145_v1  ;;  %v1325_v63 = vpop.f32.mrf.mxu0  ;;  %v766_v39 = vld [vmem:[%s8213_s1 + $0x1120] sm:$0xff] }
 0x1b6   :  { %2231 = vmatprep.mubr.f32.mxu0 %v4064_v32  ;;  %2585 = vmatpush2.msra.mxu1 %v778_v16  ;;  %v1326_v4 = vadd.f32 %v1325_v63, %v1165_v52  ;;  %v1484_v58 = vpop.f32.mrf.mxu1  ;;  %v610_v16 = vld [vmem:[%s8213_s1 + $0xc40] sm:$0xff]  ;;  %v1242_v48 = vadd.f32 %v6470_v28, %v1081_v60  ;;  %v769_v52 = vld [vmem:[%s8213_s1 + $0x1138] sm:$0xff]  ;;  %v1087_v63 = vadd.f32 %v5839_v45, %v926_v34  ;;  %v4071_v28 = vld [vmem:[%s8214_s0 + $0x510] sm:$0xff] }
 0x1b7   :  { %2232 = vmatmul.mubr.f32.gmra.mxu0 %v4065_v18  ;;  %3806 = vmatprep.subr.mxu0 %v661_v54  ;;  %v7042_v31 = vadd.f32 %v1484_v58, %v1324_v20  ;;  %v4072_v45 = vld [vmem:[%s8214_s0 + $0x568] sm:$0xff]  ;;  %v652_v60 = vld [vmem:[%s8213_s1 + $0xd90] sm:$0xff] }
 0x1b8   :  { %2586 = vmatprep.subr.mxu1 %v4145_v1  ;;  %2376 = vmatprep.mubr.f32.mxu1 %v4066_v40  ;;  %v1486_v6 = vpop.f32.mrf.mxu1  ;;  %v1403_v58 = vadd.f32 %v6492_v5, %v1242_v48  ;;  %v1248_v18 = vadd.f32 %v6509_v24, %v1087_v63  ;;  %v4073_v40 = vld [vmem:[%s8214_s0 + $0x560] sm:$0xff]  ;;  %v4074_v5 = vld [vmem:[%s8214_s0 + $0x578] sm:$0xff]  ;;  %v760_v34 = vld [vmem:[%s8213_s1 + $0x10f0] sm:$0xff] }
 0x1b9   :  { %3807 = vmatpush3.msra.mxu0 %v613_v15  ;;  %2587 = vmatpush2.msra.mxu1 %v775_v62  ;;  %v1329_v25 = vpop.f32.mrf.mxu0  ;;  %v7054_v57 = vadd.f32 %v1486_v6, %v1326_v4  ;;  %v607_v15 = vld [vmem:[%s8213_s1 + $0xc28] sm:$0xff] }
 0x1ba   :  { %2377 = vmatmul.mubr.f32.gmra.mxu1 %v4067_v22  ;;  %2236 = vmatprep.mubr.f32.mxu0 %v4068_v61  ;;  %v1330_v21 = vadd.f32 %v1329_v25, %v6441_v35  ;;  %v4070_v35 = vld [vmem:[%s8214_s0 + $0x518] sm:$0xff] }
 0x1bb   :  { %8236 = vst [vmem:[#allocation8_spill] sm:$0xff] %v7054_v57  ;;  %2588 = vmatprep.subr.mxu1 %v4145_v1  ;;  %2237 = vmatmul.mubr.f32.gmra.mxu0 %v4069_v27  ;;  %v1331_v36 = vpop.f32.mrf.mxu0  ;;  %v604_v27 = vld [vmem:[%s8213_s1 + $0xc10] sm:$0xff] }
 0x1bc   :  { %3808 = vmatprep.subr.mxu0 %v658_v8  ;;  %2589 = vmatpush2.msra.mxu1 %v772_v26  ;;  %v1332_v54 = vadd.f32 %v1331_v36, %v6455_v3  ;;  %v1490_v20 = vpop.f32.mrf.mxu1  ;;  %v655_v3 = vld [vmem:[%s8213_s1 + $0xda8] sm:$0xff] }
 0x1bd   :  { %2381 = vmatprep.mubr.f32.mxu1 %v4070_v35  ;;  %3809 = vmatpush3.msra.mxu0 %v610_v16  ;;  %v7081_v23 = vadd.f32 %v1490_v20, %v1330_v21  ;;  %v763_v8 = vld [vmem:[%s8213_s1 + $0x1108] sm:$0xff]  ;;  %v1409_v16 = vadd.f32 %v6525_v38, %v1248_v18  ;;  %v757_v20 = vld [vmem:[%s8213_s1 + $0x10d8] sm:$0xff] }
 0x1be   :  { %2590 = vmatprep.subr.mxu1 %v4145_v1  ;;  %2382 = vmatmul.mubr.f32.gmra.mxu1 %v4071_v28  ;;  %v1492_v32 = vpop.f32.mrf.mxu1  ;;  %v4076_v21 = vld [vmem:[%s8214_s0 + $0x5c8] sm:$0xff] }
 0x1bf   :  { %2591 = vmatpush2.msra.mxu1 %v769_v52  ;;  %2241 = vmatprep.mubr.f32.mxu0 %v4072_v45  ;;  %v7100_v62 = vadd.f32 %v1492_v32, %v1332_v54  ;;  %v1561_v4 = vpop.f32.mrf.mxu0  ;;  %v4077_v52 = vld [vmem:[%s8214_s0 + $0x5c0] sm:$0xff] }
 0x1c0   :  { %2592 = vmatprep.subr.mxu1 %v4145_v1  ;;  %2242 = vmatmul.mubr.f32.gmra.mxu0 %v4073_v40  ;;  %v1562_v6 = vadd.f32 %v1561_v4, %v6484_v53  ;;  %v4075_v53 = vld [vmem:[%s8214_s0 + $0x570] sm:$0xff]  ;;  %v754_v32 = vld [vmem:[%s8213_s1 + $0x10c0] sm:$0xff]  ;;  %v4080_v4 = vld [vmem:[%s8214_s0 + $0x48] sm:$0xff] }
 0x1c1   :  { %8237 = vst [vmem:[#allocation9_spill] sm:$0xff] %v7100_v62  ;;  %3810 = vmatprep.subr.mxu0 %v655_v3  ;;  %2593 = vmatpush2.msra.mxu1 %v766_v39  ;;  %v1563_v26 = vpop.f32.mrf.mxu0  ;;  %v4079_v39 = vld [vmem:[%s8214_s0 + $0x5d0] sm:$0xff] }
 0x1c2   :  { %2386 = vmatprep.mubr.f32.mxu1 %v4074_v5  ;;  %3811 = vmatpush3.msra.mxu0 %v607_v15  ;;  %v1564_v24 = vadd.f32 %v1563_v26, %v1403_v58  ;;  %v1722_v25 = vpop.f32.mrf.mxu1  ;;  %v4082_v5 = vld [vmem:[%s8214_s0 + $0xa8] sm:$0xff] }
 0x1c3   :  { %2594 = vmatprep.subr.mxu1 %v4145_v1  ;;  %2387 = vmatmul.mubr.f32.gmra.mxu1 %v4075_v53  ;;  %v7125_v22 = vadd.f32 %v1722_v25, %v1562_v6  ;;  %v1567_v61 = vpop.f32.mrf.mxu0  ;;  %v4081_v6 = vld [vmem:[%s8214_s0 + $0x40] sm:$0xff]  ;;  %v748_v53 = vld [vmem:[%s8213_s1 + $0x1090] sm:$0xff] }
 0x1c4   :  { %2595 = vmatpush2.msra.mxu1 %v763_v8  ;;  %2246 = vmatprep.mubr.f32.mxu0 %v4076_v21  ;;  %v1568_v36 = vadd.f32 %v1567_v61, %v6517_v49  ;;  %v1724_v48 = vpop.f32.mrf.mxu1  ;;  %v4078_v49 = vld [vmem:[%s8214_s0 + $0x5d8] sm:$0xff] }
 0x1c5   :  { %8238 = vst [vmem:[#allocation10_spill] sm:$0xff] %v7125_v22  ;;  %2596 = vmatprep.subr.mxu1 %v4145_v1  ;;  %2247 = vmatmul.mubr.f32.gmra.mxu0 %v4077_v52  ;;  %v7139_v38 = vadd.f32 %v1724_v48, %v1564_v24  ;;  %v1569_v54 = vpop.f32.mrf.mxu0  ;;  %v4085_v48 = vld [vmem:[%s8214_s0 + $0x108] sm:$0xff]  ;;  %v2943_v22 = vld [vmem:[%s8216_s3 + $0xf8] sm:$0xff] }
 0x1c6   :  { %3812 = vmatprep.subr.mxu0 %v652_v60  ;;  %2597 = vmatpush2.msra.mxu1 %v760_v34  ;;  %v1570_v35 = vadd.f32 %v1569_v54, %v1409_v16  ;;  %v1728_v63 = vpop.f32.mrf.mxu1 }
 0x1c7   :  { %8239 = vst [vmem:[#allocation11_spill] sm:$0xff] %v7139_v38  ;;  %2391 = vmatprep.mubr.f32.mxu1 %v4078_v49  ;;  %3813 = vmatpush3.msra.mxu0 %v604_v27  ;;  %v7147_v28 = vadd.f32 %v1728_v63, %v1568_v36  ;;  %v1573_v3 = vpop.f32.mrf.mxu0  ;;  %v8224_v18 = vmax.f32 %v7139_v38, 0.0  ;;  %v4084_v27 = vld [vmem:[%s8214_s0 + $0xa0] sm:$0xff] }
 0x1c8   :  { %2598 = vmatprep.subr.mxu1 %v4145_v1  ;;  %2392 = vmatmul.mubr.f32.gmra.mxu1 %v4079_v39  ;;  %v1574_v45 = vadd.f32 %v1573_v3, %v6555_v42  ;;  %v1730_v15 = vpop.f32.mrf.mxu1  ;;  %v751_v42 = vld [vmem:[%s8213_s1 + $0x10a8] sm:$0xff]  ;;  %v4088_v3 = vld [vmem:[%s8214_s0 + $0x100] sm:$0xff] }
 0x1c9   :  { %8240 = vst [vmem:[#allocation12_spill] sm:$0xff] %v7147_v28  ;;  %2599 = vmatpush2.msra.mxu1 %v757_v20  ;;  %2461 = vmatprep.mubr.f32.mxu0 %v4080_v4  ;;  %v7160_v58 = vadd.f32 %v1730_v15, %v1570_v35  ;;  %v1575_v40 = vpop.f32.mrf.mxu0  ;;  %v4087_v35 = vld [vmem:[%s8214_s0 + $0xb8] sm:$0xff]  ;;  %v4090_v4 = vld [vmem:[%s8214_s0 + $0xb0] sm:$0xff] }
 0x1ca   :  { %2600 = vmatprep.subr.mxu1 %v4145_v1  ;;  %2462 = vmatmul.mubr.f32.vlgmr.msra.gmra.mxu0 %v4081_v6  ;;  %v1576_v8 = vadd.f32 %v1575_v40, %v6569_v29  ;;  %v1734_v26 = vpop.f32.mrf.mxu1  ;;  %v4083_v29 = vld [vmem:[%s8214_s0 + $0x58] sm:$0xff] }
 0x1cb   :  { %8241 = vst [vmem:[#allocation13_spill] sm:$0xff] %v7160_v58  ;;  %2601 = vmatpush2.msra.mxu1 %v754_v32  ;;  %2466 = vmatprep.mubr.f32.mxu0 %v4082_v5  ;;  %v7174_v24 = vadd.f32 %v1734_v26, %v1574_v45  ;;  %v1579_v25 = vpop.f32.mrf.mxu0  ;;  %v8223_v61 = vmax.f32 %v7160_v58, 0.0  ;;  %v4092_v26 = vld [vmem:[%s8214_s0 + $0x160] sm:$0xff] }
 0x1cc   :  { %2602 = vmatprep.subr.mxu1 %v4145_v1  ;;  %3429 = vmatprep.mubr.msk.f32.mxu1 %vm802_vm0, %v4083_v29  ;;  %v1580_v60 = vadd.f32 %v1579_v25, %v6599_v55  ;;  %v1736_v34 = vpop.f32.mrf.mxu1 }
 0x1cd   :  { %8242 = vst [vmem:[#allocation14_spill] sm:$0xff] %v7174_v24  ;;  %2603 = vmatpush2.msra.mxu1 %v751_v42  ;;  %2767 = vrot.lane.b32.xlu0 %v8224_v18, %s4146_s14  ;;  %v7189_v16 = vadd.f32 %v1736_v34, %v1576_v8  ;;  %v1581_v21 = vpop.f32.mrf.mxu0 }
 0x1ce   :  { %2604 = vmatprep.subr.mxu1 %v4145_v1  ;;  %2467 = vmatmul.mubr.f32.gmra.mxu0 %v4084_v27  ;;  %v1582_v55 = vadd.f32 %v1581_v21, %v6613_v13  ;;  %v1740_v36 = vpop.f32.mrf.mxu1  ;;  %v4086_v1 = vld [vmem:[%s8214_s0 + $0x50] sm:$0xff] }
 0x1cf   :  { %2605 = vmatpush2.msra.mxu1 %v748_v53  ;;  %2471 = vmatprep.mubr.f32.mxu0 %v4085_v48  ;;  %v7199_v52 = vadd.f32 %v1740_v36, %v1580_v60  ;;  %v1585_v54 = vpop.f32.mrf.mxu0  ;;  %v4094_v60 = vld [vmem:[%s8214_s0 + $0x110] sm:$0xff]  ;;  %v4096_v36 = vld [vmem:[%s8214_s0 + $0x1c0] sm:$0xff] }
 0x1d0   :  { %2607 = vmatmul.mubr.f32.vlgmr.msra.gmra.mxu1 %v4086_v1  ;;  %2771 = vrot.lane.b32.xlu1 %v8223_v61, %s4146_s14  ;;  %v1586_v13 = vadd.f32 %v1585_v54, %v6643_v46  ;;  %v1742_v20 = vpop.f32.mrf.mxu1  ;;  %v4089_v46 = vld [vmem:[%s8214_s0 + $0x168] sm:$0xff] }
 0x1d1   :  { %8243 = vst [vmem:[#allocation15_spill] sm:$0xff] %v7199_v52  ;;  %3430 = vmatprep.mubr.msk.f32.mxu1 %vm802_vm0, %v4087_v35  ;;  %v7212_v63 = vadd.f32 %v1742_v20, %v1582_v55  ;;  %v1587_v49 = vpop.f32.mrf.mxu0  ;;  %v4098_v20 = vld [vmem:[%s8214_s0 + $0x170] sm:$0xff]  ;;  %3015 = vmatprep.subr.mxu0 %v2943_v22  ;;  %v2937_v22 = vld [vmem:[%s8216_s3 + $0xc8] sm:$0xff] }
 0x1d2   :  { %2472 = vmatmul.mubr.f32.gmra.mxu0 %v4088_v3  ;;  %v1588_v39 = vadd.f32 %v1587_v49, %v6657_v12  ;;  %v1746_v32 = vpop.f32.mrf.mxu1  ;;  %v4091_v12 = vld [vmem:[%s8214_s0 + $0x118] sm:$0xff] }
 0x1d3   :  { %2476 = vmatprep.mubr.f32.mxu0 %v4089_v46  ;;  %v7221_v45 = vadd.f32 %v1746_v32, %v1586_v13  ;;  %v1591_v15 = vpop.f32.mrf.mxu0  ;;  %v4100_v32 = vld [vmem:[%s8214_s0 + $0x220] sm:$0xff] }
 0x1d4   :  { %2612 = vmatmul.mubr.f32.gmra.mxu1 %v4090_v4  ;;  %v1592_v40 = vadd.f32 %v1591_v15, %v6684_v19  ;;  %v1748_v6 = vpop.f32.mrf.mxu1  ;;  %v4093_v19 = vld [vmem:[%s8214_s0 + $0x1c8] sm:$0xff] }
 0x1d5   :  { %8244 = vst [vmem:[#allocation16_spill] sm:$0xff] %v7221_v45  ;;  %3431 = vmatprep.mubr.msk.f32.mxu1 %vm802_vm0, %v4091_v12  ;;  %v7231_v42 = vadd.f32 %v1748_v6, %v1588_v39  ;;  %v1593_v8 = vpop.f32.mrf.mxu0  ;;  %v4102_v6 = vld [vmem:[%s8214_s0 + $0x1d0] sm:$0xff] }
 0x1d6   :  { %2477 = vmatmul.mubr.f32.gmra.mxu0 %v4092_v26  ;;  %v1594_v5 = vadd.f32 %v1593_v8, %v6698_v2  ;;  %v1752_v25 = vpop.f32.mrf.mxu1  ;;  %v4095_v2 = vld [vmem:[%s8214_s0 + $0x178] sm:$0xff] }
 0x1d7   :  { %2481 = vmatprep.mubr.f32.mxu0 %v4093_v19  ;;  %v7240_v53 = vadd.f32 %v1752_v25, %v1592_v40  ;;  %v1597_v29 = vpop.f32.mrf.mxu0  ;;  %v4104_v25 = vld [vmem:[%s8214_s0 + $0x280] sm:$0xff] }
 0x1d8   :  { %2617 = vmatmul.mubr.f32.gmra.mxu1 %v4094_v60  ;;  %v1598_v34 = vadd.f32 %v1597_v29, %v6726_v44  ;;  %v1754_v21 = vpop.f32.mrf.mxu1  ;;  %v4097_v44 = vld [vmem:[%s8214_s0 + $0x228] sm:$0xff] }
 0x1d9   :  { %8245 = vst [vmem:[#allocation17_spill] sm:$0xff] %v7240_v53  ;;  %3432 = vmatprep.mubr.msk.f32.mxu1 %vm802_vm0, %v4095_v2  ;;  %v7250_v27 = vadd.f32 %v1754_v21, %v1594_v5  ;;  %v1599_v55 = vpop.f32.mrf.mxu0 }
 0x1da   :  { %2482 = vmatmul.mubr.f32.gmra.mxu0 %v4096_v36  ;;  %v1600_v48 = vadd.f32 %v1599_v55, %v6738_v33  ;;  %v1758_v54 = vpop.f32.mrf.mxu1  ;;  %v4099_v33 = vld [vmem:[%s8214_s0 + $0x1d8] sm:$0xff] }
 0x1db   :  { %2486 = vmatprep.mubr.f32.mxu0 %v4097_v44  ;;  %v7259_v1 = vadd.f32 %v1758_v54, %v1598_v34  ;;  %v1603_v13 = vpop.f32.mrf.mxu0  ;;  %v4106_v34 = vld [vmem:[%s8214_s0 + $0x230] sm:$0xff]  ;;  %v4107_v55 = vld [vmem:[%s8214_s0 + $0x298] sm:$0xff] }
 0x1dc   :  { %2622 = vmatmul.mubr.f32.gmra.mxu1 %v4098_v20  ;;  %v1604_v35 = vadd.f32 %v1603_v13, %v6763_v43  ;;  %v1760_v49 = vpop.f32.mrf.mxu1  ;;  %v4101_v43 = vld [vmem:[%s8214_s0 + $0x288] sm:$0xff]  ;;  %v4110_v20 = vld [vmem:[%s8214_s0 + $0x290] sm:$0xff] }
 0x1dd   :  { %8246 = vst [vmem:[#allocation18_spill] sm:$0xff] %v7259_v1  ;;  %3433 = vmatprep.mubr.msk.f32.mxu1 %vm802_vm0, %v4099_v33  ;;  %v7269_v3 = vadd.f32 %v1760_v49, %v1600_v48  ;;  %v1605_v39 = vpop.f32.mrf.mxu0  ;;  %v4108_v48 = vld [vmem:[%s8214_s0 + $0x2e0] sm:$0xff]  ;;  %v4111_v33 = vld [vmem:[%s8214_s0 + $0x2f8] sm:$0xff] }
 0x1de   :  { %2487 = vmatmul.mubr.f32.gmra.mxu0 %v4100_v32  ;;  %v1606_v46 = vadd.f32 %v1605_v39, %v6781_v30  ;;  %v1764_v15 = vpop.f32.mrf.mxu1  ;;  %v4103_v30 = vld [vmem:[%s8214_s0 + $0x238] sm:$0xff]  ;;  %v4112_v32 = vld [vmem:[%s8214_s0 + $0x340] sm:$0xff] }
 0x1df   :  { %2491 = vmatprep.mubr.f32.mxu0 %v4101_v43  ;;  %v7278_v4 = vadd.f32 %v1764_v15, %v1604_v35  ;;  %v1609_v40 = vpop.f32.mrf.mxu0 }
 0x1e0   :  { %2627 = vmatmul.mubr.f32.gmra.mxu1 %v4102_v6  ;;  %v1610_v12 = vadd.f32 %v1609_v40, %v6804_v37  ;;  %v1766_v8 = vpop.f32.mrf.mxu1  ;;  %v4105_v37 = vld [vmem:[%s8214_s0 + $0x2e8] sm:$0xff]  ;;  %v4114_v40 = vld [vmem:[%s8214_s0 + $0x2f0] sm:$0xff] }
 0x1e1   :  { %8247 = vst [vmem:[#allocation19_spill] sm:$0xff] %v7278_v4  ;;  %3434 = vmatprep.mubr.msk.f32.mxu1 %vm802_vm0, %v4103_v30  ;;  %v7288_v26 = vadd.f32 %v1766_v8, %v1606_v46  ;;  %v7290_v5 = vpop.f32.mrf.mxu0  ;;  %v4115_v8 = vld [vmem:[%s8214_s0 + $0x358] sm:$0xff] }
 0x1e2   :  { %2492 = vmatmul.mubr.f32.gmra.mxu0 %v4104_v25  ;;  %v1770_v19 = vpop.f32.mrf.mxu1  ;;  %v4116_v25 = vld [vmem:[%s8214_s0 + $0x3a0] sm:$0xff] }
 0x1e3   :  { %8248 = vst [vmem:[#allocation20_spill] sm:$0xff] %v7288_v26  ;;  %2496 = vmatprep.mubr.f32.mxu0 %v4105_v37  ;;  %v7298_v29 = vadd.f32 %v1770_v19, %v1610_v12  ;;  %v1615_v60 = vpop.f32.mrf.mxu0 }
 0x1e4   :  { %2632 = vmatmul.mubr.f32.gmra.mxu1 %v4106_v34  ;;  %v1616_v21 = vadd.f32 %v1615_v60, %v6847_v10  ;;  %v7304_v2 = vpop.f32.mrf.mxu1  ;;  %v4109_v10 = vld [vmem:[%s8214_s0 + $0x348] sm:$0xff]  ;;  %v4118_v34 = vld [vmem:[%s8214_s0 + $0x350] sm:$0xff] }
 0x1e5   :  { %8249 = vst [vmem:[#allocation21_spill] sm:$0xff] %v7298_v29  ;;  %8250 = vst [vmem:[#allocation22_spill] sm:$0xff] %v7304_v2  ;;  %3435 = vmatprep.mubr.msk.f32.mxu1 %vm802_vm0, %v4107_v55  ;;  %v7310_v36 = vpop.f32.mrf.mxu0 }
 0x1e6   :  { %8251 = vst [vmem:[#allocation23_spill] sm:$0xff] %v7310_v36  ;;  %2497 = vmatmul.mubr.f32.gmra.mxu0 %v4108_v48  ;;  %v1776_v54 = vpop.f32.mrf.mxu1  ;;  %v4119_v48 = vld [vmem:[%s8214_s0 + $0x3b8] sm:$0xff] }
 0x1e7   :  { %2501 = vmatprep.mubr.f32.mxu0 %v4109_v10  ;;  %v7318_v44 = vadd.f32 %v1776_v54, %v1616_v21  ;;  %v1621_v13 = vpop.f32.mrf.mxu0  ;;  %v4120_v10 = vld [vmem:[%s8214_s0 + $0x400] sm:$0xff] }
 0x1e8   :  { %2637 = vmatmul.mubr.f32.gmra.mxu1 %v4110_v20  ;;  %v1622_v35 = vadd.f32 %v1621_v13, %v6884_v47  ;;  %v7324_v49 = vpop.f32.mrf.mxu1  ;;  %v4113_v47 = vld [vmem:[%s8214_s0 + $0x3a8] sm:$0xff] }
 0x1e9   :  { %8252 = vst [vmem:[#allocation24_spill] sm:$0xff] %v7318_v44  ;;  %8253 = vst [vmem:[#allocation25_spill] sm:$0xff] %v7324_v49  ;;  %3436 = vmatprep.mubr.msk.f32.mxu1 %vm802_vm0, %v4111_v33  ;;  %v7330_v39 = vpop.f32.mrf.mxu0  ;;  %v4122_v33 = vld [vmem:[%s8214_s0 + $0x3b0] sm:$0xff] }
 0x1ea   :  { %8254 = vst [vmem:[#allocation26_spill] sm:$0xff] %v7330_v39  ;;  %2502 = vmatmul.mubr.f32.gmra.mxu0 %v4112_v32  ;;  %v1782_v46 = vpop.f32.mrf.mxu1 }
 0x1eb   :  { %2506 = vmatprep.mubr.f32.mxu0 %v4113_v47  ;;  %v7338_v15 = vadd.f32 %v1782_v46, %v1622_v35  ;;  %v1627_v43 = vpop.f32.mrf.mxu0  ;;  %v4123_v47 = vld [vmem:[%s8214_s0 + $0x418] sm:$0xff] }
 0x1ec   :  { %2642 = vmatmul.mubr.f32.gmra.mxu1 %v4114_v40  ;;  %v1628_v6 = vadd.f32 %v1627_v43, %v6921_v14  ;;  %v7344_v12 = vpop.f32.mrf.mxu1  ;;  %v4117_v14 = vld [vmem:[%s8214_s0 + $0x408] sm:$0xff]  ;;  %v4124_v40 = vld [vmem:[%s8214_s0 + $0x460] sm:$0xff] }
 0x1ed   :  { %8255 = vst [vmem:[#allocation27_spill] sm:$0xff] %v7338_v15  ;;  %8256 = vst [vmem:[#allocation28_spill] sm:$0xff] %v7344_v12  ;;  %3437 = vmatprep.mubr.msk.f32.mxu1 %vm802_vm0, %v4115_v8  ;;  %v7350_v30 = vpop.f32.mrf.mxu0  ;;  %v2922_v12 = vld [vmem:[%s8216_s3 + $0x50] sm:$0xff] }
 0x1ee   :  { %8257 = vst [vmem:[#allocation29_spill] sm:$0xff] %v7350_v30  ;;  %2507 = vmatmul.mubr.f32.gmra.mxu0 %v4116_v25  ;;  %v1788_v19 = vpop.f32.mrf.mxu1  ;;  %v2924_v30 = vld [vmem:[%s8216_s3 + $0x60] sm:$0xff] }
 0x1ef   :  { %2511 = vmatprep.mubr.f32.mxu0 %v4117_v14  ;;  %v7358_v37 = vadd.f32 %v1788_v19, %v1628_v6  ;;  %v1633_v60 = vpop.f32.mrf.mxu0  ;;  %v4126_v19 = vld [vmem:[%s8214_s0 + $0x410] sm:$0xff] }
 0x1f0   :  { %2647 = vmatmul.mubr.f32.gmra.mxu1 %v4118_v34  ;;  %v1634_v21 = vadd.f32 %v1633_v60, %v6962_v7  ;;  %v7364_v55 = vpop.f32.mrf.mxu1  ;;  %v4121_v7 = vld [vmem:[%s8214_s0 + $0x468] sm:$0xff]  ;;  %v4127_v34 = vld [vmem:[%s8214_s0 + $0x478] sm:$0xff] }
 0x1f1   :  { %8258 = vst [vmem:[#allocation30_spill] sm:$0xff] %v7358_v37  ;;  %8259 = vst [vmem:[#allocation31_spill] sm:$0xff] %v7364_v55  ;;  %3438 = vmatprep.mubr.msk.f32.mxu1 %vm802_vm0, %v4119_v48  ;;  %v7370_v54 = vpop.f32.mrf.mxu0  ;;  %v4128_v48 = vld [vmem:[%s8214_s0 + $0x4c0] sm:$0xff] }
 0x1f2   :  { %8260 = vst [vmem:[#allocation32_spill] sm:$0xff] %v7370_v54  ;;  %2512 = vmatmul.mubr.f32.gmra.mxu0 %v4120_v10  ;;  %v1794_v13 = vpop.f32.mrf.mxu1 }
 0x1f3   :  { %2516 = vmatprep.mubr.f32.mxu0 %v4121_v7  ;;  %v7378_v20 = vadd.f32 %v1794_v13, %v1634_v21  ;;  %v1639_v35 = vpop.f32.mrf.mxu0 }
 0x1f4   :  { %2652 = vmatmul.mubr.f32.gmra.mxu1 %v4122_v33  ;;  %v1640_v32 = vadd.f32 %v1639_v35, %v7005_v41  ;;  %v7384_v46 = vpop.f32.mrf.mxu1  ;;  %v4125_v41 = vld [vmem:[%s8214_s0 + $0x4c8] sm:$0xff]  ;;  %v4130_v35 = vld [vmem:[%s8214_s0 + $0x470] sm:$0xff] }
 0x1f5   :  { %8261 = vst [vmem:[#allocation33_spill] sm:$0xff] %v7378_v20  ;;  %8262 = vst [vmem:[#allocation34_spill] sm:$0xff] %v7384_v46  ;;  %3439 = vmatprep.mubr.msk.f32.mxu1 %vm802_vm0, %v4123_v47  ;;  %v7390_v43 = vpop.f32.mrf.mxu0  ;;  %v797_v47 = vsub.s32 2, %v5678_v50 }
 0x1f6   :  { %8263 = vst [vmem:[#allocation35_spill] sm:$0xff] %v7390_v43  ;;  %2517 = vmatmul.mubr.f32.gmra.mxu0 %v4124_v40  ;;  %v1800_v6 = vpop.f32.mrf.mxu1  ;;  %v4131_v40 = vld [vmem:[%s8214_s0 + $0x4d8] sm:$0xff] }
 0x1f7   :  { %2521 = vmatprep.mubr.f32.mxu0 %v4125_v41  ;;  %v7398_v8 = vadd.f32 %v1800_v6, %v1640_v32  ;;  %v1645_v25 = vpop.f32.mrf.mxu0  ;;  %v4132_v41 = vld [vmem:[%s8214_s0 + $0x520] sm:$0xff] }
 0x1f8   :  { %2657 = vmatmul.mubr.f32.gmra.mxu1 %v4126_v19  ;;  %v1646_v14 = vadd.f32 %v1645_v25, %v7042_v31  ;;  %v7404_v60 = vpop.f32.mrf.mxu1  ;;  %v4129_v31 = vld [vmem:[%s8214_s0 + $0x528] sm:$0xff] }
 0x1f9   :  { %8264 = vst [vmem:[#allocation36_spill] sm:$0xff] %v7398_v8  ;;  %8265 = vst [vmem:[#allocation37_spill] sm:$0xff] %v7404_v60  ;;  %3440 = vmatprep.mubr.msk.f32.mxu1 %vm802_vm0, %v4127_v34  ;;  %v7410_v21 = vpop.f32.mrf.mxu0  ;;  %v4134_v34 = vld [vmem:[%s8214_s0 + $0x4d0] sm:$0xff] }
 0x1fa   :  { %8266 = vst [vmem:[#allocation38_spill] sm:$0xff] %v7410_v21  ;;  %2522 = vmatmul.mubr.f32.gmra.mxu0 %v4128_v48  ;;  %v1806_v10 = vpop.f32.mrf.mxu1  ;;  %v2938_v21 = vld [vmem:[%s8216_s3 + $0xd0] sm:$0xff] }
 0x1fb   :  { %2526 = vmatprep.mubr.f32.mxu0 %v4129_v31  ;;  %v7418_v13 = vadd.f32 %v1806_v10, %v1646_v14  ;;  %v1651_v7 = vpop.f32.mrf.mxu0  ;;  %v4135_v10 = vld [vmem:[%s8215_s2] sm:$0x7] }
 0x1fc   :  { %2662 = vmatmul.mubr.f32.gmra.mxu1 %v4130_v35  ;;  %v1652_v33 = vadd.f32 %v1651_v7, %v7081_v23  ;;  %v7424_v32 = vpop.f32.mrf.mxu1  ;;  %v4133_v23 = vld [vmem:[%s8214_s0 + $0x588] sm:$0xff]  ;;  %v7449_v31 = vrot.slane %v4135_v10, %v797_v47  ;;  %v4136_v7 = vld [vmem:[%s8214_s0 + $0x538] sm:$0xff] }
 0x1fd   :  { %8267 = vst [vmem:[#allocation39_spill] sm:$0xff] %v7418_v13  ;;  %8268 = vst [vmem:[#allocation40_spill] sm:$0xff] %v7424_v32  ;;  %3441 = vmatprep.mubr.msk.f32.mxu1 %vm802_vm0, %v4131_v40  ;;  %v7431_v6 = vpop.f32.mrf.mxu0  ;;  %v2939_v32 = vld [vmem:[%s8216_s3 + $0xd8] sm:$0xff] }
 0x1fe   :  { %8269 = vst [vmem:[#allocation41_spill] sm:$0xff] %v7431_v6  ;;  %2527 = vmatmul.mubr.f32.gmra.mxu0 %v4132_v41  ;;  %v1812_v25 = vpop.f32.mrf.mxu1  ;;  %v2940_v6 = vld [vmem:[%s8216_s3 + $0xe0] sm:$0xff] }
 0x1ff   :  { %2531 = vmatprep.mubr.f32.mxu0 %v4133_v23  ;;  %v7439_v19 = vadd.f32 %v1812_v25, %v1652_v33  ;;  %v3494_v14 = vpop.f32.mrf.mxu0  ;;  %v4137_v33 = vld [vmem:[%s8214_s0 + $0x580] sm:$0xff]  ;;  %v4138_v25 = vld [vmem:[%s8214_s0 + $0x5e8] sm:$0xff]  ;;  %v4139_v23 = vld [vmem:[%s8214_s0 + $0x530] sm:$0xff] }
 0x200   :  { %2667 = vmatmul.mubr.f32.gmra.mxu1 %v4134_v34  ;;  %v7444_v48 = vpop.f32.mrf.mxu1 }
 0x201   :  { %8270 = vst [vmem:[#allocation42_spill] sm:$0xff] %v7439_v19  ;;  %8271 = vst [vmem:[#allocation43_spill] sm:$0xff] %v7444_v48  ;;  %3442 = vmatprep.mubr.msk.f32.mxu1 %vm802_vm0, %v4136_v7  ;;  %v3495_v35 = vpop.f32.mrf.mxu0  ;;  %v4140_v7 = vld [vmem:[%s8214_s0 + $0x598] sm:$0xff]  ;;  %v2942_v48 = vld [vmem:[%s8216_s3 + $0xf0] sm:$0xff] }
 0x202   :  { %2532 = vmatmul.mubr.f32.gmra.mxu0 %v4137_v33  ;;  %v3496_v40 = vadd.f32 %v3495_v35, %v3494_v14  ;;  %v3574_v41 = vpop.f32.mrf.mxu1  ;;  %v4141_v33 = vld [vmem:[%s8214_s0 + $0x5e0] sm:$0xff] }
 0x203   :  { %2536 = vmatprep.mubr.f32.mxu0 %v4138_v25  ;;  %v3497_v47 = vpop.f32.mrf.mxu0  ;;  %3016 = vmatpush1.msra.mxu0 %v2942_v48  ;;  %v2936_v48 = vld [vmem:[%s8216_s3 + $0xc0] sm:$0xff] }
 0x204   :  { %2672 = vmatmul.mubr.f32.gmra.mxu1 %v4139_v23  ;;  %v1884_v34 = vadd.f32 %v3496_v40, %v7449_v31  ;;  %v3575_v10 = vpop.f32.mrf.mxu1  ;;  %v4142_v40 = vld [vmem:[%s8214_s0 + $0x590] sm:$0xff] }
 0x205   :  { %3443 = vmatprep.mubr.msk.f32.mxu1 %vm802_vm0, %v4140_v7  ;;  %v3576_v14 = vadd.f32 %v3575_v10, %v3574_v41  ;;  %v3498_v35 = vpop.f32.mrf.mxu0  ;;  %v4143_v41 = vld [vmem:[%s8214_s0 + $0x5f8] sm:$0xff] }
 0x206   :  { %2537 = vmatmul.mubr.f32.gmra.mxu0 %v4141_v33  ;;  %v3499_v25 = vadd.f32 %v3498_v35, %v3497_v47  ;;  %v3577_v59 = vpop.f32.mrf.mxu1 }
 0x207   :  { %v7472_v61 = vadd.f32 %v3576_v14, %v1884_v34  ;;  %v3500_v23 = vpop.f32.mrf.mxu0 }
 0x208   :  { %2677 = vmatmul.mubr.f32.gmra.mxu1 %v4142_v40  ;;  %v1889_v18 = vadd.f32 %v3499_v25, %v7449_v31  ;;  %v3578_v7 = vpop.f32.mrf.mxu1  ;;  %v4144_v40 = vld [vmem:[%s8214_s0 + $0x5f0] sm:$0xff] }
 0x209   :  { %3444 = vmatprep.mubr.msk.f32.mxu1 %vm802_vm0, %v4143_v41  ;;  %v3579_v10 = vadd.f32 %v3578_v7, %v3577_v59  ;;  %v3501_v47 = vpop.f32.mrf.mxu0 }
 0x20a   :  { %v3502_v35 = vadd.f32 %v3501_v47, %v3500_v23  ;;  %v3580_v34 = vpop.f32.mrf.mxu1 }
 0x20b   :  { %v7482_v14 = vadd.f32 %v3579_v10, %v1889_v18  ;;  %v3503_v33 = vpop.f32.mrf.mxu0 }
 0x20c   :  { %2682 = vmatmul.mubr.f32.gmra.mxu1 %v4144_v40  ;;  %v1894_v25 = vadd.f32 %v3502_v35, %v7449_v31  ;;  %v3581_v50 = vpop.f32.mrf.mxu1 }
 0x20d   :  { %v3582_v19 = vadd.f32 %v3581_v50, %v3580_v34  ;;  %v3504_v13 = vpop.f32.mrf.mxu0 }
 0x20e   :  { %v3505_v8 = vadd.f32 %v3504_v13, %v3503_v33  ;;  %v3583_v20 = vpop.f32.mrf.mxu1 }
 0x20f   :  { %v7488_v41 = vadd.f32 %v3582_v19, %v1894_v25  ;;  %v3506_v59 = vpop.f32.mrf.mxu0 }
 0x210   :  { %v1899_v23 = vadd.f32 %v3505_v8, %v7449_v31  ;;  %v3584_v18 = vpop.f32.mrf.mxu1 }
 0x211   :  { %v3585_v7 = vadd.f32 %v3584_v18, %v3583_v20  ;;  %v3507_v10 = vpop.f32.mrf.mxu0 }
 0x212   :  { %v3508_v47 = vadd.f32 %v3507_v10, %v3506_v59  ;;  %v3586_v37 = vpop.f32.mrf.mxu1 }
 0x213   :  { %v7491_v15 = vadd.f32 %v3585_v7, %v1899_v23  ;;  %v3509_v40 = vpop.f32.mrf.mxu0 }
 0x214   :  { %v1904_v35 = vadd.f32 %v3508_v47, %v7449_v31  ;;  %v3587_v44 = vpop.f32.mrf.mxu1 }
 0x215   :  { %v3588_v50 = vadd.f32 %v3587_v44, %v3586_v37  ;;  %v3510_v34 = vpop.f32.mrf.mxu0 }
 0x216   :  { %v3511_v13 = vadd.f32 %v3510_v34, %v3509_v40  ;;  %v3589_v33 = vpop.f32.mrf.mxu1 }
 0x217   :  { %v7494_v19 = vadd.f32 %v3588_v50, %v1904_v35  ;;  %v3512_v25 = vpop.f32.mrf.mxu0 }
 0x218   :  { %v1909_v8 = vadd.f32 %v3511_v13, %v7449_v31  ;;  %v3590_v29 = vpop.f32.mrf.mxu1 }
 0x219   :  { %v3591_v20 = vadd.f32 %v3590_v29, %v3589_v33  ;;  %v3513_v18 = vpop.f32.mrf.mxu0 }
 0x21a   :  { %v3514_v59 = vadd.f32 %v3513_v18, %v3512_v25  ;;  %v3592_v10 = vpop.f32.mrf.mxu1 }
 0x21b   :  { %v7497_v23 = vadd.f32 %v3591_v20, %v1909_v8  ;;  %v3515_v7 = vpop.f32.mrf.mxu0 }
 0x21c   :  { %v1914_v47 = vadd.f32 %v3514_v59, %v7449_v31  ;;  %v3593_v4 = vpop.f32.mrf.mxu1 }
 0x21d   :  { %v3594_v44 = vadd.f32 %v3593_v4, %v3592_v10  ;;  %v3516_v37 = vpop.f32.mrf.mxu0 }
 0x21e   :  { %v3517_v40 = vadd.f32 %v3516_v37, %v3515_v7  ;;  %v3595_v34 = vpop.f32.mrf.mxu1 }
 0x21f   :  { %v7500_v35 = vadd.f32 %v3594_v44, %v1914_v47  ;;  %v3518_v50 = vpop.f32.mrf.mxu0 }
 0x220   :  { %v1919_v13 = vadd.f32 %v3517_v40, %v7449_v31  ;;  %v3596_v1 = vpop.f32.mrf.mxu1 }
 0x221   :  { %v3597_v29 = vadd.f32 %v3596_v1, %v3595_v34  ;;  %v3519_v33 = vpop.f32.mrf.mxu0 }
 0x222   :  { %v3520_v25 = vadd.f32 %v3519_v33, %v3518_v50  ;;  %v3598_v18 = vpop.f32.mrf.mxu1 }
 0x223   :  { %v7503_v8 = vadd.f32 %v3597_v29, %v1919_v13  ;;  %v3521_v20 = vpop.f32.mrf.mxu0 }
 0x224   :  { %v1924_v59 = vadd.f32 %v3520_v25, %v7449_v31  ;;  %v3599_v53 = vpop.f32.mrf.mxu1 }
 0x225   :  { %v3600_v4 = vadd.f32 %v3599_v53, %v3598_v18  ;;  %v3522_v10 = vpop.f32.mrf.mxu0 }
 0x226   :  { %v3523_v7 = vadd.f32 %v3522_v10, %v3521_v20  ;;  %v3601_v37 = vpop.f32.mrf.mxu1 }
 0x227   :  { %v7506_v47 = vadd.f32 %v3600_v4, %v1924_v59  ;;  %v3524_v44 = vpop.f32.mrf.mxu0 }
 0x228   :  { %v1929_v40 = vadd.f32 %v3523_v7, %v7449_v31  ;;  %v3602_v45 = vpop.f32.mrf.mxu1 }
 0x229   :  { %v3603_v1 = vadd.f32 %v3602_v45, %v3601_v37  ;;  %v3525_v34 = vpop.f32.mrf.mxu0 }
 0x22a   :  { %v3526_v50 = vadd.f32 %v3525_v34, %v3524_v44  ;;  %v3604_v33 = vpop.f32.mrf.mxu1 }
 0x22b   :  { %v7509_v13 = vadd.f32 %v3603_v1, %v1929_v40  ;;  %v3527_v29 = vpop.f32.mrf.mxu0 }
 0x22c   :  { %v1934_v25 = vadd.f32 %v3526_v50, %v7449_v31  ;;  %v3605_v52 = vpop.f32.mrf.mxu1 }
 0x22d   :  { %8272 = vst [vmem:[#allocation44_spill] sm:$0xff] %v7509_v13  ;;  %v3606_v53 = vadd.f32 %v3605_v52, %v3604_v33  ;;  %v3528_v18 = vpop.f32.mrf.mxu0 }
 0x22e   :  { %v3529_v20 = vadd.f32 %v3528_v18, %v3527_v29  ;;  %v3607_v10 = vpop.f32.mrf.mxu1 }
 0x22f   :  { %v7512_v59 = vadd.f32 %v3606_v53, %v1934_v25  ;;  %v3530_v4 = vpop.f32.mrf.mxu0 }
 0x230   :  { %v1939_v7 = vadd.f32 %v3529_v20, %v7449_v31  ;;  %v3608_v24 = vpop.f32.mrf.mxu1 }
 0x231   :  { %8273 = vst [vmem:[#allocation45_spill] sm:$0xff] %v7512_v59  ;;  %v3609_v45 = vadd.f32 %v3608_v24, %v3607_v10  ;;  %v3531_v37 = vpop.f32.mrf.mxu0 }
 0x232   :  { %v3532_v44 = vadd.f32 %v3531_v37, %v3530_v4  ;;  %v3610_v34 = vpop.f32.mrf.mxu1 }
 0x233   :  { %v7515_v40 = vadd.f32 %v3609_v45, %v1939_v7  ;;  %v3533_v1 = vpop.f32.mrf.mxu0 }
 0x234   :  { %v1944_v50 = vadd.f32 %v3532_v44, %v7449_v31  ;;  %v3611_v58 = vpop.f32.mrf.mxu1 }
 0x235   :  { %8274 = vst [vmem:[#allocation46_spill] sm:$0xff] %v7515_v40  ;;  %v3612_v52 = vadd.f32 %v3611_v58, %v3610_v34  ;;  %v3534_v33 = vpop.f32.mrf.mxu0 }
 0x236   :  { %v3535_v29 = vadd.f32 %v3534_v33, %v3533_v1  ;;  %v3613_v18 = vpop.f32.mrf.mxu1 }
 0x237   :  { %v7518_v25 = vadd.f32 %v3612_v52, %v1944_v50  ;;  %v3536_v53 = vpop.f32.mrf.mxu0 }
 0x238   :  { %v1949_v20 = vadd.f32 %v3535_v29, %v7449_v31  ;;  %v3614_v28 = vpop.f32.mrf.mxu1 }
 0x239   :  { %8275 = vst [vmem:[#allocation47_spill] sm:$0xff] %v7518_v25  ;;  %v3615_v24 = vadd.f32 %v3614_v28, %v3613_v18  ;;  %v3537_v10 = vpop.f32.mrf.mxu0 }
 0x23a   :  { %v3538_v4 = vadd.f32 %v3537_v10, %v3536_v53  ;;  %v3616_v37 = vpop.f32.mrf.mxu1 }
 0x23b   :  { %v7521_v7 = vadd.f32 %v3615_v24, %v1949_v20  ;;  %v3539_v45 = vpop.f32.mrf.mxu0 }
 0x23c   :  { %v1954_v44 = vadd.f32 %v3538_v4, %v7449_v31  ;;  %v3617_v38 = vpop.f32.mrf.mxu1 }
 0x23d   :  { %8276 = vst [vmem:[#allocation48_spill] sm:$0xff] %v7521_v7  ;;  %v3618_v58 = vadd.f32 %v3617_v38, %v3616_v37  ;;  %v3540_v34 = vpop.f32.mrf.mxu0 }
 0x23e   :  { %v3541_v1 = vadd.f32 %v3540_v34, %v3539_v45  ;;  %v3619_v33 = vpop.f32.mrf.mxu1 }
 0x23f   :  { %v7524_v50 = vadd.f32 %v3618_v58, %v1954_v44  ;;  %v7526_v52 = vpop.f32.mrf.mxu0 }
 0x240   :  { %v1959_v29 = vadd.f32 %v3541_v1, %v7449_v31  ;;  %v3620_v28 = vpop.f32.mrf.mxu1 }
 0x241   :  { %8277 = vst [vmem:[#allocation49_spill] sm:$0xff] %v7524_v50  ;;  %v3621_v18 = vadd.f32 %v3620_v28, %v3619_v33  ;;  %v7529_v53 = vpop.f32.mrf.mxu0 }
 0x242   :  { %v7531_v20 = vpop.f32.mrf.mxu1 }
 0x243   :  { %v7533_v24 = vadd.f32 %v3621_v18, %v1959_v29  ;;  %v7535_v10 = vpop.f32.mrf.mxu0 }
 0x244   :  { %v7537_v38 = vpop.f32.mrf.mxu1 }
 0x245   :  { %8278 = vst [vmem:[#allocation50_spill] sm:$0xff] %v7533_v24  ;;  %v7539_v4 = vpop.f32.mrf.mxu0  ;;  %v2941_v24 = vld [vmem:[%s8216_s3 + $0xe8] sm:$0xff] }
 0x246   :  { %v7541_v37 = vpop.f32.mrf.mxu1  ;;  %3017 = vmatprep.subr.mxu0 %v2941_v24  ;;  %v2935_v24 = vld [vmem:[%s8216_s3 + $0xb8] sm:$0xff] }
 0x247   :  { %v7543_v45 = vpop.f32.mrf.mxu0  ;;  %3018 = vmatpush1.msra.mxu0 %v2940_v6  ;;  %v2934_v6 = vld [vmem:[%s8216_s3 + $0xb0] sm:$0xff] }
 0x248   :  { %v7545_v44 = vpop.f32.mrf.mxu1  ;;  %3019 = vmatprep.subr.mxu0 %v2939_v32  ;;  %v2933_v32 = vld [vmem:[%s8216_s3 + $0xa8] sm:$0xff] }
 0x249   :  { %v7547_v31 = vpop.f32.mrf.mxu0  ;;  %3020 = vmatpush1.msra.mxu0 %v2938_v21  ;;  %v2932_v21 = vld [vmem:[%s8216_s3 + $0xa0] sm:$0xff] }
 0x24a   :  { %v7549_v58 = vpop.f32.mrf.mxu1  ;;  %3021 = vmatprep.subr.mxu0 %v2937_v22  ;;  %v2931_v22 = vld [vmem:[%s8216_s3 + $0x98] sm:$0xff] }
 0x24b   :  { %v7551_v34 = vpop.f32.mrf.mxu0  ;;  %3022 = vmatpush1.msra.mxu0 %v2936_v48  ;;  %v2930_v48 = vld [vmem:[%s8216_s3 + $0x90] sm:$0xff] }
 0x24c   :  { %v7553_v1 = vpop.f32.mrf.mxu1  ;;  %3023 = vmatprep.subr.mxu0 %v2935_v24  ;;  %v2929_v24 = vld [vmem:[%s8216_s3 + $0x88] sm:$0xff] }
 0x24d   :  { %v7555_v33 = vpop.f32.mrf.mxu0  ;;  %3024 = vmatpush1.msra.mxu0 %v2934_v6  ;;  %v2928_v6 = vld [vmem:[%s8216_s3 + $0x80] sm:$0xff] }
 0x24e   :  { %v7557_v29 = vpop.f32.mrf.mxu1  ;;  %3025 = vmatprep.subr.mxu0 %v2933_v32  ;;  %v2927_v32 = vld [vmem:[%s8216_s3 + $0x78] sm:$0xff] }
 0x24f   :  { %3026 = vmatpush1.msra.mxu0 %v2932_v21  ;;  %v2926_v21 = vld [vmem:[%s8216_s3 + $0x70] sm:$0xff] }
 0x250   :  { %v7559_v28 = vpop.f32.mrf.mxu0  ;;  %v7561_v18 = vpop.f32.mrf.mxu1  ;;  %3027 = vmatprep.subr.mxu0 %v2931_v22  ;;  %v2925_v22 = vld [vmem:[%s8216_s3 + $0x68] sm:$0xff] }
 0x251   :  { %3028 = vmatpush1.msra.mxu0 %v2930_v48 }
 0x252   :  { %v7575_v62 = vpop.f32.mrf.mxu0  ;;  %3029 = vmatprep.subr.mxu0 %v2929_v24  ;;  %v2923_v24 = vld [vmem:[%s8216_s3 + $0x58] sm:$0xff] }
 0x253   :  { %v7580_v50 = vpop.f32.mrf.mxu1  ;;  %3030 = vmatpush1.msra.mxu0 %v2928_v6 }
 0x254   :  { %3031 = vmatprep.subr.mxu0 %v2927_v32  ;;  %v2921_v32 = vld [vmem:[%s8216_s3 + $0x48] sm:$0xff] }
 0x255   :  { %v7588_v57 = vpop.f32.mrf.mxu0  ;;  %v7590_v60 = vpop.f32.mrf.mxu1  ;;  %3032 = vmatpush1.msra.mxu0 %v2926_v21  ;;  %v2920_v21 = vld [vmem:[%s8216_s3 + $0x40] sm:$0xff] }
 0x256   :  { %3033 = vmatprep.subr.mxu0 %v2925_v22  ;;  %v2919_v22 = vld [vmem:[%s8216_s3 + $0x38] sm:$0xff] }
 0x257   :  { %v7598_v7 = vpop.f32.mrf.mxu0  ;;  %3034 = vmatpush1.msra.mxu0 %v2924_v30  ;;  %v2918_v30 = vld [vmem:[%s8216_s3 + $0x30] sm:$0xff] }
 0x258   :  { %v7603_v46 = vpop.f32.mrf.mxu1  ;;  %3035 = vmatprep.subr.mxu0 %v2923_v24  ;;  %v2917_v24 = vld [vmem:[%s8216_s3 + $0x28] sm:$0xff] }
 0x259   :  { %3036 = vmatpush1.msra.mxu0 %v2922_v12  ;;  %v2916_v12 = vld [vmem:[%s8216_s3 + $0x20] sm:$0xff] }
 0x25a   :  { %v7611_v43 = vpop.f32.mrf.mxu0  ;;  %v7613_v51 = vpop.f32.mrf.mxu1  ;;  %3037 = vmatprep.subr.mxu0 %v2921_v32  ;;  %v2915_v32 = vld [vmem:[%s8216_s3 + $0x18] sm:$0xff] }
 0x25b   :  { %3038 = vmatpush1.msra.mxu0 %v2920_v21  ;;  %v2914_v21 = vld [vmem:[%s8216_s3 + $0x10] sm:$0xff] }
 0x25c   :  { %v7621_v25 = vpop.f32.mrf.mxu0  ;;  %3039 = vmatprep.subr.mxu0 %v2919_v22  ;;  %v2913_v22 = vld [vmem:[%s8216_s3 + $0x8] sm:$0xff] }
 0x25d   :  { %v7626_v54 = vpop.f32.mrf.mxu1  ;;  %3040 = vmatpush1.msra.mxu0 %v2918_v30  ;;  %v2912_v30 = vld [vmem:[%s8216_s3] sm:$0xff] }
 0x25e   :  { %3041 = vmatprep.subr.mxu0 %v2917_v24  ;;  %v2953_v24 = vld [vmem:[%s8216_s3 + $0x148] sm:$0xff] }
 0x25f   :  { %v7634_v17 = vpop.f32.mrf.mxu0  ;;  %v7636_v55 = vpop.f32.mrf.mxu1  ;;  %3042 = vmatpush1.msra.mxu0 %v2916_v12  ;;  %v2952_v12 = vld [vmem:[%s8216_s3 + $0x140] sm:$0xff] }
 0x260   :  { %3043 = vmatprep.subr.mxu0 %v2915_v32  ;;  %v2951_v32 = vld [vmem:[%s8216_s3 + $0x138] sm:$0xff] }
 0x261   :  { %v7644_v40 = vpop.f32.mrf.mxu0  ;;  %v7646_v48 = vpop.f32.mrf.mxu1  ;;  %3044 = vmatpush1.msra.mxu0 %v2914_v21  ;;  %v2950_v21 = vld [vmem:[%s8216_s3 + $0x130] sm:$0xff] }
 0x262   :  { %3045 = vmatprep.subr.mxu0 %v2913_v22  ;;  %v2949_v22 = vld [vmem:[%s8216_s3 + $0x128] sm:$0xff] }
 0x263   :  { %v7654_v9 = vpop.f32.mrf.mxu0  ;;  %v7656_v6 = vpop.f32.mrf.mxu1  ;;  %3046 = vmatpush1.msra.mxu0 %v2912_v30  ;;  %v2948_v30 = vld [vmem:[%s8216_s3 + $0x120] sm:$0xff] }
 0x264   :  { %3069 = vmatprep.subr.mxu0 %v2953_v24  ;;  %v2947_v24 = vld [vmem:[%s8216_s3 + $0x118] sm:$0xff] }
 0x265   :  { %v7664_v59 = vpop.f32.mrf.mxu0  ;;  %3070 = vmatpush2.msra.mxu0 %v2952_v12  ;;  %v2946_v12 = vld [vmem:[%s8216_s3 + $0x110] sm:$0xff] }
 0x266   :  { %v7669_v49 = vpop.f32.mrf.mxu1  ;;  %3071 = vmatprep.subr.mxu0 %v2951_v32 }
 0x267   :  { %3072 = vmatpush2.msra.mxu0 %v2950_v21 }
 0x268   :  { %v7677_v39 = vpop.f32.mrf.mxu0  ;;  %v7679_v11 = vpop.f32.mrf.mxu1  ;;  %3073 = vmatprep.subr.mxu0 %v2949_v22 }
 0x269   :  { %8279 = vst [vmem:[#allocation51_spill] sm:$0xff] %v7677_v39  ;;  %3074 = vmatpush2.msra.mxu0 %v2948_v30 }
 0x26a   :  { %v7687_v13 = vpop.f32.mrf.mxu0  ;;  %3075 = vmatprep.subr.mxu0 %v2947_v24 }
 0x26b   :  { %8280 = vst [vmem:[#allocation52_spill] sm:$0xff] %v7687_v13  ;;  %v7692_v36 = vpop.f32.mrf.mxu1  ;;  %3076 = vmatpush2.msra.mxu0 %v2946_v12  ;;  %v3656_v12 = vadd.f32 %v7529_v53, %v7526_v52  ;;  %v2944_v52 = vld [vmem:[%s8216_s3 + $0x100] sm:$0xff] }
 0x26c   :  { %8281 = vst [vmem:[#allocation53_spill] sm:$0xff] %v7692_v36 }
 0x26d   :  { %v7700_v56 = vpop.f32.mrf.mxu0  ;;  %v7702_v2 = vpop.f32.mrf.mxu1 }
 0x26e   :  { %8282 = vst [vmem:[#allocation54_spill] sm:$0xff] %v7700_v56  ;;  %8283 = vst [vmem:[#allocation55_spill] sm:$0xff] %v7702_v2 }
 0x26f   :  { %v7710_v36 = vpop.f32.mrf.mxu0 }
 0x270   :  { %8284 = vst [vmem:[#allocation56_spill] sm:$0xff] %v7710_v36  ;;  %v7715_v56 = vpop.f32.mrf.mxu1 }
 0x271   :  { %8285 = vst [vmem:[#allocation57_spill] sm:$0xff] %v7715_v56 }
 0x272   :  { %v7723_v2 = vpop.f32.mrf.mxu0  ;;  %v7725_v36 = vpop.f32.mrf.mxu1 }
 0x273   :  { %8286 = vst [vmem:[#allocation58_spill] sm:$0xff] %v7723_v2  ;;  %8287 = vst [vmem:[#allocation59_spill] sm:$0xff] %v7725_v36 }
 0x274   :  { %v7733_v56 = vpop.f32.mrf.mxu0 }
 0x275   :  { %8288 = vst [vmem:[#allocation60_spill] sm:$0xff] %v7733_v56  ;;  %v7738_v2 = vpop.f32.mrf.mxu1 }
 0x276   :  { %8289 = vst [vmem:[#allocation61_spill] sm:$0xff] %v7738_v2 }
 0x277   :  { %v7743_v32 = vpop.f32.mrf.mxu0  ;;  %v7745_v36 = vpop.f32.mrf.mxu1 }
 0x278   :  { %8290 = vst [vmem:[#allocation62_spill] sm:$0xff] %v7743_v32 }
 0x279   :  { %v7747_v56 = vpop.f32.mrf.mxu0 }
 0x27a   :  { %v7749_v21 = vpop.f32.mrf.mxu1 }
 0x27b   :  { %8291 = vst [vmem:[#allocation63_spill] sm:$0xff] %v7749_v21  ;;  %v7751_v26 = vpop.f32.mrf.mxu0 }
 0x27c   :  { %8292 = vst [vmem:[#allocation64_spill] sm:$0xff] %v7751_v26  ;;  %v7753_v13 = vpop.f32.mrf.mxu1 }
 0x27d   :  { %8293 = vst [vmem:[#allocation65_spill] sm:$0xff] %v7753_v13  ;;  %v7755_v22 = vpop.f32.mrf.mxu0 }
 0x27e   :  { %8294 = vst [vmem:[#allocation66_spill] sm:$0xff] %v7755_v22  ;;  %v7757_v2 = vpop.f32.mrf.mxu1  ;;  %v2174_v22 = vadd.f32 %v3656_v12, %v7472_v61  ;;  %v3662_v61 = vadd.f32 %v7547_v31, %v7543_v45 }
 0x27f   :  { %8295 = vst [vmem:[#allocation67_spill] sm:$0xff] %v7757_v2  ;;  %v3736_v2 = vadd.f32 %v7537_v38, %v7531_v20 }
 0x280   :  { %v7759_v39 = vpop.f32.mrf.mxu0  ;;  %v7761_v30 = vpop.f32.mrf.mxu1 }
 0x281   :  { %8296 = vst [vmem:[#allocation68_spill] sm:$0xff] %v7759_v39  ;;  %8297 = vst [vmem:[#allocation69_spill] sm:$0xff] %v7761_v30  ;;  %v3659_v30 = vadd.f32 %v7539_v4, %v7535_v10  ;;  %v2319_v38 = vadd.f32 %v3736_v2, %v2174_v22  ;;  %v3739_v4 = vadd.f32 %v7545_v44, %v7541_v37 }
 0x282   :  { %v7763_v32 = vpop.f32.mrf.mxu0  ;;  %v3665_v2 = vadd.f32 %v7555_v33, %v7551_v34  ;;  %v2694_v34 = vmax.f32 %v7189_v16, 0.0 }
 0x283   :  { %8298 = vst [vmem:[#allocation70_spill] sm:$0xff] %v7763_v32  ;;  %v7765_v24 = vpop.f32.mrf.mxu1  ;;  %v2179_v10 = vadd.f32 %v3659_v30, %v7482_v14 }
 0x284   :  { %8299 = vst [vmem:[#allocation71_spill] sm:$0xff] %v7765_v24  ;;  %v2945_v24 = vld [vmem:[%s8216_s3 + $0x108] sm:$0xff] }
 0x285   :  { %v7769_v21 = vpop.f32.mrf.mxu0  ;;  %v7771_v26 = vpop.f32.mrf.mxu1  ;;  %3077 = vmatprep.subr.mxu0 %v2945_v24  ;;  %v3742_v24 = vadd.f32 %v7553_v1, %v7549_v58  ;;  %v2324_v45 = vadd.f32 %v3739_v4, %v2179_v10  ;;  %v2189_v58 = vadd.f32 %v3665_v2, %v7491_v15  ;;  %v3745_v1 = vadd.f32 %v7561_v18, %v7557_v29 }
 0x286   :  { %8300 = vst [vmem:[#allocation72_spill] sm:$0xff] %v7769_v21  ;;  %8301 = vst [vmem:[#allocation73_spill] sm:$0xff] %v7771_v26  ;;  %3078 = vmatpush2.msra.mxu0 %v2944_v52  ;;  %v3671_v15 = vadd.f32 %v7598_v7, %v7588_v57  ;;  %v3674_v7 = vadd.f32 %v7621_v25, %v7611_v43  ;;  %v3754_v25 = vadd.f32 %v7636_v55, %v7626_v54 }
 0x287   :  { %v7773_v13 = vpop.f32.mrf.mxu0  ;;  %v2334_v18 = vadd.f32 %v3745_v1, %v2189_v58 }
 0x288   :  { %8302 = vst [vmem:[#allocation74_spill] sm:$0xff] %v7773_v13  ;;  %v7786_v53 = vpop.f32.mrf.mxu1  ;;  %v2199_v57 = vadd.f32 %v3671_v15, %v7497_v23  ;;  %v2700_v23 = vmax.f32 %v7231_v42, 0.0  ;;  %v2204_v43 = vadd.f32 %v3674_v7, %v7500_v35  ;;  %v2703_v35 = vmax.f32 %v7250_v27, 0.0  ;;  %v8307_v7 = vld [vmem:[#allocation22_spill] sm:$0xff] }
 0x289   :  { %8303 = vst [vmem:[#allocation75_spill] sm:$0xff] %v7786_v53  ;;  %v2184_v53 = vadd.f32 %v3662_v61, %v7488_v41 }
 0x28a   :  { %v3814_v21 = vpop.f32.mrf.mxu0  ;;  %v7793_v13 = vpop.f32.mrf.mxu1  ;;  %v2349_v54 = vadd.f32 %v3754_v25, %v2204_v43 }
 0x28b   :  { %v2329_v30 = vadd.f32 %v3742_v24, %v2184_v53 }
 0x28c   :  { %v3815_v20 = vpop.f32.mrf.mxu0 }
 0x28d   :  { %v3816_v12 = vadd.f32 %v3815_v20, %v3814_v21  ;;  %v3668_v20 = vadd.f32 %v7575_v62, %v7559_v28  ;;  %v3748_v62 = vadd.f32 %v7590_v60, %v7580_v50 }
 0x28e   :  { %v3817_v26 = vpop.f32.mrf.mxu0 }
 0x28f   :  { %v2464_v32 = vadd.f32 %v3816_v12, %v2319_v38  ;;  %v2194_v53 = vadd.f32 %v3668_v20, %v7494_v19  ;;  %v2697_v19 = vmax.f32 %v7212_v63, 0.0 }
 0x290   :  { %v2608_v52 = vpop.f32.mrf.mxu1  ;;  %v3818_v39 = vpop.f32.mrf.mxu0 }
 0x291   :  { %v2609_v14 = vadd.f32 %v2608_v52, %v2464_v32  ;;  %v3819_v31 = vadd.f32 %v3818_v39, %v3817_v26  ;;  %v2339_v50 = vadd.f32 %v3748_v62, %v2194_v53 }
 0x292   :  { %v2610_v22 = vpop.f32.mrf.mxu1  ;;  %v3820_v37 = vpop.f32.mrf.mxu0 }
 0x293   :  { %v2689_v44 = vmax.f32 %v2609_v14, 0.0  ;;  %v2469_v21 = vadd.f32 %v3819_v31, %v2324_v45  ;;  %v3751_v31 = vadd.f32 %v7613_v51, %v7603_v46  ;;  %v3677_v51 = vadd.f32 %v7644_v40, %v7634_v17 }
 0x294   :  { %v2613_v41 = vpop.f32.mrf.mxu1  ;;  %v3821_v61 = vpop.f32.mrf.mxu0  ;;  %v3680_v40 = vadd.f32 %v7664_v59, %v7654_v9  ;;  %v1612_v9 = vadd.f32 %v7290_v5, %v6818_v0  ;;  %v8306_v0 = vld [vmem:[#allocation20_spill] sm:$0xff] }
 0x295   :  { %v2614_v38 = vadd.f32 %v2613_v41, %v2469_v21  ;;  %v3822_v10 = vadd.f32 %v3821_v61, %v3820_v37  ;;  %2769 = vrot.lane.b32.xlu0 %v2689_v44, %s4146_s14  ;;  %v2344_v61 = vadd.f32 %v3751_v31, %v2199_v57  ;;  %v2209_v17 = vadd.f32 %v3677_v51, %v7503_v8 }
 0x296   :  { %v2615_v26 = vpop.f32.mrf.mxu1  ;;  %v3823_v39 = vpop.f32.mrf.mxu0  ;;  %v2706_v8 = vmax.f32 %v7269_v3, 0.0  ;;  %v2709_v5 = vmax.f32 %v8306_v0, 0.0 }
 0x297   :  { %v2692_v33 = vmax.f32 %v2614_v38, 0.0  ;;  %v2474_v32 = vadd.f32 %v3822_v10, %v2329_v30 }
 0x298   :  { %v2618_v28 = vpop.f32.mrf.mxu1  ;;  %v3824_v29 = vpop.f32.mrf.mxu0 }
 0x299   :  { %v2619_v4 = vadd.f32 %v2618_v28, %v2474_v32  ;;  %v3825_v12 = vadd.f32 %v3824_v29, %v3823_v39  ;;  %2773 = vrot.lane.b32.xlu1 %v2692_v33, %s4146_s14  ;;  %2775 = vrot.lane.b32.xlu0 %v2694_v34, %s4146_s14  ;;  %v3757_v32 = vadd.f32 %v7656_v6, %v7646_v48  ;;  %v8304_v6 = vld [vmem:[#allocation51_spill] sm:$0xff] }
 0x29a   :  { %v2620_v24 = vpop.f32.mrf.mxu1  ;;  %v3826_v52 = vpop.f32.mrf.mxu0  ;;  %v3760_v48 = vadd.f32 %v7679_v11, %v7669_v49  ;;  %v7860_v11 = vadd.f32 %v8307_v7, %v1612_v9  ;;  %v8308_v49 = vld [vmem:[#allocation3_spill] sm:$0xff]  ;;  %v8325_v7 = vld [vmem:[#allocation29_spill] sm:$0xff] }
 0x29b   :  { %v2695_v45 = vmax.f32 %v2619_v4, 0.0  ;;  %v2479_v60 = vadd.f32 %v3825_v12, %v2334_v18  ;;  %v2214_v18 = vadd.f32 %v3680_v40, %v7506_v47  ;;  %v8305_v4 = vld [vmem:[#allocation52_spill] sm:$0xff]  ;;  %v8317_v40 = vld [vmem:[#allocation25_spill] sm:$0xff] }
 0x29c   :  { %v2623_v2 = vpop.f32.mrf.mxu1  ;;  %v3827_v14 = vpop.f32.mrf.mxu0  ;;  %v3683_v12 = vadd.f32 %v8305_v4, %v8304_v6 }
 0x29d   :  { %v2624_v22 = vadd.f32 %v2623_v2, %v2479_v60  ;;  %v3828_v37 = vadd.f32 %v3827_v14, %v3826_v52  ;;  %2777 = vrot.lane.b32.xlu1 %v2695_v45, %s4146_s14  ;;  %2779 = vrot.lane.b32.xlu0 %v2697_v19, %s4146_s14  ;;  %v2354_v45 = vadd.f32 %v3757_v32, %v2209_v17  ;;  %v8309_v2 = vld [vmem:[#allocation23_spill] sm:$0xff]  ;;  %v2712_v17 = vmax.f32 %v7860_v11, 0.0 }
 0x29e   :  { %v2625_v44 = vpop.f32.mrf.mxu1  ;;  %v3829_v21 = vpop.f32.mrf.mxu0  ;;  %v1618_v14 = vadd.f32 %v8309_v2, %v8308_v49 }
 0x29f   :  { %v2698_v30 = vmax.f32 %v2624_v22, 0.0  ;;  %v2484_v20 = vadd.f32 %v3828_v37, %v2339_v50  ;;  %v2359_v37 = vadd.f32 %v3760_v48, %v2214_v18  ;;  %v8310_v44 = vld [vmem:[#allocation44_spill] sm:$0xff] }
 0x2a0   :  { %v2628_v46 = vpop.f32.mrf.mxu1  ;;  %v3830_v41 = vpop.f32.mrf.mxu0 }
 0x2a1   :  { %v2629_v58 = vadd.f32 %v2628_v46, %v2484_v20  ;;  %v3831_v1 = vadd.f32 %v3830_v41, %v3829_v21  ;;  %2781 = vrot.lane.b32.xlu1 %v2698_v30, %s4146_s14  ;;  %2783 = vrot.lane.b32.xlu0 %v2700_v23, %s4146_s14  ;;  %v2219_v21 = vadd.f32 %v3683_v12, %v8310_v44  ;;  %v8311_v30 = vld [vmem:[#allocation54_spill] sm:$0xff]  ;;  %v8312_v20 = vld [vmem:[#allocation56_spill] sm:$0xff]  ;;  %v8313_v46 = vld [vmem:[#allocation53_spill] sm:$0xff] }
 0x2a2   :  { %v2630_v38 = vpop.f32.mrf.mxu1  ;;  %v3832_v10 = vpop.f32.mrf.mxu0  ;;  %v3686_v43 = vadd.f32 %v8312_v20, %v8311_v30  ;;  %v8314_v41 = vld [vmem:[#allocation55_spill] sm:$0xff]  ;;  %v8327_v44 = vld [vmem:[#allocation62_spill] sm:$0xff] }
 0x2a3   :  { %v2701_v26 = vmax.f32 %v2629_v58, 0.0  ;;  %v2489_v55 = vadd.f32 %v3831_v1, %v2344_v61  ;;  %v3763_v61 = vadd.f32 %v8314_v41, %v8313_v46  ;;  %v8315_v38 = vld [vmem:[#allocation4_spill] sm:$0xff] }
 0x2a4   :  { %v2633_v39 = vpop.f32.mrf.mxu1  ;;  %v3833_v33 = vpop.f32.mrf.mxu0 }
 0x2a5   :  { %v2634_v53 = vadd.f32 %v2633_v39, %v2489_v55  ;;  %v3834_v62 = vadd.f32 %v3833_v33, %v3832_v10  ;;  %2785 = vrot.lane.b32.xlu1 %v2701_v26, %s4146_s14  ;;  %2787 = vrot.lane.b32.xlu0 %v2703_v35, %s4146_s14  ;;  %v8316_v10 = vld [vmem:[#allocation26_spill] sm:$0xff]  ;;  %v7877_v39 = vadd.f32 %v8317_v40, %v1618_v14 }
 0x2a6   :  { %v2635_v15 = vpop.f32.mrf.mxu1  ;;  %v3835_v28 = vpop.f32.mrf.mxu0  ;;  %v1624_v26 = vadd.f32 %v8316_v10, %v8315_v38  ;;  %v2364_v4 = vadd.f32 %v3763_v61, %v2219_v21  ;;  %v3692_v21 = vadd.f32 %v7747_v56, %v8327_v44  ;;  %v8330_v56 = vld [vmem:[#allocation6_spill] sm:$0xff]  ;;  %v8331_v10 = vld [vmem:[#allocation32_spill] sm:$0xff] }
 0x2a7   :  { %v2704_v59 = vmax.f32 %v2634_v53, 0.0  ;;  %v2494_v29 = vadd.f32 %v3834_v62, %v2349_v54  ;;  %v8318_v53 = vld [vmem:[#allocation45_spill] sm:$0xff] }
 0x2a8   :  { %v2638_v24 = vpop.f32.mrf.mxu1  ;;  %v3836_v52 = vpop.f32.mrf.mxu0  ;;  %v2224_v62 = vadd.f32 %v3686_v43, %v8318_v53  ;;  %v8319_v15 = vld [vmem:[#allocation57_spill] sm:$0xff] }
 0x2a9   :  { %v2639_v60 = vadd.f32 %v2638_v24, %v2494_v29  ;;  %v3837_v50 = vadd.f32 %v3836_v52, %v3835_v28  ;;  %2789 = vrot.lane.b32.xlu1 %v2704_v59, %s4146_s14  ;;  %2791 = vrot.lane.b32.xlu0 %v2706_v8, %s4146_s14  ;;  %v8320_v28 = vld [vmem:[#allocation59_spill] sm:$0xff]  ;;  %v8321_v59 = vld [vmem:[#allocation58_spill] sm:$0xff]  ;;  %v8322_v29 = vld [vmem:[#allocation60_spill] sm:$0xff] }
 0x2aa   :  { %v2640_v47 = vpop.f32.mrf.mxu1  ;;  %v3838_v57 = vpop.f32.mrf.mxu0  ;;  %v3766_v9 = vadd.f32 %v8320_v28, %v8319_v15  ;;  %v3689_v18 = vadd.f32 %v8322_v29, %v8321_v59  ;;  %v8323_v52 = vld [vmem:[#allocation28_spill] sm:$0xff]  ;;  %v8328_v43 = vld [vmem:[#allocation61_spill] sm:$0xff]  ;;  %v8336_v15 = vld [vmem:[#allocation66_spill] sm:$0xff] }
 0x2ab   :  { %v2707_v31 = vmax.f32 %v2639_v60, 0.0  ;;  %v2499_v22 = vadd.f32 %v3837_v50, %v2354_v45  ;;  %v7889_v45 = vadd.f32 %v8323_v52, %v1624_v26  ;;  %v2715_v47 = vmax.f32 %v7877_v39, 0.0 }
 0x2ac   :  { %v2643_v25 = vpop.f32.mrf.mxu1  ;;  %v3839_v51 = vpop.f32.mrf.mxu0  ;;  %v1636_v26 = vadd.f32 %v8331_v10, %v8330_v56 }
 0x2ad   :  { %v2644_v58 = vadd.f32 %v2643_v25, %v2499_v22  ;;  %v3840_v1 = vadd.f32 %v3839_v51, %v3838_v57  ;;  %2793 = vrot.lane.b32.xlu1 %v2707_v31, %s4146_s14  ;;  %2795 = vrot.lane.b32.xlu0 %v2709_v5, %s4146_s14  ;;  %v8324_v57 = vld [vmem:[#allocation5_spill] sm:$0xff]  ;;  %v2369_v31 = vadd.f32 %v3766_v9, %v2224_v62  ;;  %v8326_v22 = vld [vmem:[#allocation46_spill] sm:$0xff]  ;;  %v2718_v41 = vmax.f32 %v7889_v45, 0.0  ;;  %v8335_v62 = vld [vmem:[#allocation64_spill] sm:$0xff] }
 0x2ae   :  { %v2645_v55 = vpop.f32.mrf.mxu1  ;;  %v3841_v54 = vpop.f32.mrf.mxu0  ;;  %v1630_v49 = vadd.f32 %v8325_v7, %v8324_v57  ;;  %v3769_v25 = vadd.f32 %v7745_v36, %v8328_v43  ;;  %v3695_v28 = vadd.f32 %v8336_v15, %v8335_v62  ;;  %v8344_v43 = vld [vmem:[#allocation69_spill] sm:$0xff] }
 0x2af   :  { %v2710_v33 = vmax.f32 %v2644_v58, 0.0  ;;  %v2504_v32 = vadd.f32 %v3840_v1, %v2359_v37  ;;  %v2229_v37 = vadd.f32 %v3689_v18, %v8326_v22  ;;  %v8329_v1 = vld [vmem:[#allocation31_spill] sm:$0xff]  ;;  %v8341_v22 = vld [vmem:[#allocation68_spill] sm:$0xff]  ;;  %v8350_v62 = vld [vmem:[#allocation73_spill] sm:$0xff] }
 0x2b0   :  { %v2648_v48 = vpop.f32.mrf.mxu1  ;;  %v3842_v6 = vpop.f32.mrf.mxu0  ;;  %v7905_v38 = vadd.f32 %v8329_v1, %v1630_v49 }
 0x2b1   :  { %v2649_v12 = vadd.f32 %v2648_v48, %v2504_v32  ;;  %v3843_v24 = vadd.f32 %v3842_v6, %v3841_v54  ;;  %2797 = vrot.lane.b32.xlu1 %v2710_v33, %s4146_s14  ;;  %2799 = vrot.lane.b32.xlu0 %v2712_v17, %s4146_s14  ;;  %v8332_v54 = vld [vmem:[#allocation47_spill] sm:$0xff]  ;;  %v8334_v32 = vld [vmem:[#allocation65_spill] sm:$0xff]  ;;  %v2374_v29 = vadd.f32 %v3769_v25, %v2229_v37  ;;  %v8342_v37 = vld [vmem:[#allocation70_spill] sm:$0xff] }
 0x2b2   :  { %v2650_v60 = vpop.f32.mrf.mxu1  ;;  %v3844_v50 = vpop.f32.mrf.mxu0  ;;  %v2234_v40 = vadd.f32 %v3692_v21, %v8332_v54  ;;  %v8333_v33 = vld [vmem:[#allocation63_spill] sm:$0xff]  ;;  %v3698_v44 = vadd.f32 %v8342_v37, %v8341_v22 }
 0x2b3   :  { %v2713_v2 = vmax.f32 %v2649_v12, 0.0  ;;  %v2509_v14 = vadd.f32 %v3843_v24, %v2364_v4  ;;  %v3772_v53 = vadd.f32 %v8334_v32, %v8333_v33  ;;  %v8337_v6 = vld [vmem:[#allocation7_spill] sm:$0xff]  ;;  %v2721_v60 = vmax.f32 %v7905_v38, 0.0  ;;  %v8348_v33 = vld [vmem:[#allocation49_spill] sm:$0xff] }
 0x2b4   :  { %v2653_v30 = vpop.f32.mrf.mxu1  ;;  %v3845_v20 = vpop.f32.mrf.mxu0  ;;  %v8338_v4 = vld [vmem:[#allocation35_spill] sm:$0xff]  ;;  %v2244_v32 = vadd.f32 %v3698_v44, %v8348_v33  ;;  %v8356_v44 = vld [vmem:[#allocation50_spill] sm:$0xff] }
 0x2b5   :  { %v2654_v51 = vadd.f32 %v2653_v30, %v2509_v14  ;;  %v3846_v46 = vadd.f32 %v3845_v20, %v3844_v50  ;;  %2801 = vrot.lane.b32.xlu1 %v2713_v2, %s4146_s14  ;;  %2803 = vrot.lane.b32.xlu0 %v2715_v47, %s4146_s14  ;;  %v1642_v12 = vadd.f32 %v8338_v4, %v8337_v6  ;;  %v8339_v50 = vld [vmem:[#allocation34_spill] sm:$0xff]  ;;  %v8340_v14 = vld [vmem:[#allocation48_spill] sm:$0xff]  ;;  %v8343_v20 = vld [vmem:[#allocation67_spill] sm:$0xff] }
 0x2b6   :  { %v2655_v61 = vpop.f32.mrf.mxu1  ;;  %v3847_v58 = vpop.f32.mrf.mxu0  ;;  %v7922_v57 = vadd.f32 %v8339_v50, %v1636_v26  ;;  %v2379_v2 = vadd.f32 %v3772_v53, %v2234_v40  ;;  %v3775_v25 = vadd.f32 %v8344_v43, %v8343_v20  ;;  %v8346_v26 = vld [vmem:[#allocation8_spill] sm:$0xff]  ;;  %v8349_v53 = vld [vmem:[#allocation71_spill] sm:$0xff] }
 0x2b7   :  { %v2716_v55 = vmax.f32 %v2654_v51, 0.0  ;;  %v2514_v36 = vadd.f32 %v3846_v46, %v2369_v31  ;;  %v2239_v31 = vadd.f32 %v3695_v28, %v8340_v14  ;;  %v8345_v61 = vld [vmem:[#allocation37_spill] sm:$0xff]  ;;  %v3778_v15 = vadd.f32 %v8350_v62, %v8349_v53  ;;  %v8351_v28 = vld [vmem:[#allocation72_spill] sm:$0xff]  ;;  %v8357_v43 = vld [vmem:[#allocation75_spill] sm:$0xff] }
 0x2b8   :  { %v2658_v9 = vpop.f32.mrf.mxu1  ;;  %v3848_v59 = vpop.f32.mrf.mxu0  ;;  %v2724_v10 = vmax.f32 %v7922_v57, 0.0  ;;  %v8353_v50 = vld [vmem:[#allocation40_spill] sm:$0xff] }
 0x2b9   :  { %v2659_v18 = vadd.f32 %v2658_v9, %v2514_v36  ;;  %v3849_v48 = vadd.f32 %v3848_v59, %v3847_v58  ;;  %2805 = vrot.lane.b32.xlu1 %v2716_v55, %s4146_s14  ;;  %2807 = vrot.lane.b32.xlu0 %v2718_v41, %s4146_s14  ;;  %v7934_v58 = vadd.f32 %v8345_v61, %v1642_v12  ;;  %v8347_v55 = vld [vmem:[#allocation38_spill] sm:$0xff] }
 0x2ba   :  { %v2660_v24 = vpop.f32.mrf.mxu1  ;;  %v3850_v52 = vpop.f32.mrf.mxu0  ;;  %v1648_v36 = vadd.f32 %v8347_v55, %v8346_v26  ;;  %v8352_v9 = vld [vmem:[#allocation74_spill] sm:$0xff]  ;;  %v2389_v37 = vadd.f32 %v3778_v15, %v2244_v32  ;;  %v8358_v26 = vld [vmem:[#allocation43_spill] sm:$0xff]  ;;  %v3238_v15 = vld [vmem:[%s8217_s5 + $0x70] sm:$0xff] }
 0x2bb   :  { %v2719_v7 = vmax.f32 %v2659_v18, 0.0  ;;  %v2519_v49 = vadd.f32 %v3849_v48, %v2374_v29  ;;  %v3701_v59 = vadd.f32 %v8352_v9, %v8351_v28  ;;  %v2384_v48 = vadd.f32 %v3775_v25, %v2239_v31 }
 0x2bc   :  { %v2663_v21 = vpop.f32.mrf.mxu1  ;;  %v3851_v30 = vpop.f32.mrf.mxu0  ;;  %v2727_v12 = vmax.f32 %v7934_v58, 0.0  ;;  %v3781_v25 = vadd.f32 %v7793_v13, %v8357_v43  ;;  %v3239_v13 = vld [vmem:[%s8217_s5 + $0x78] sm:$0xff] }
 0x2bd   :  { %v2664_v51 = vadd.f32 %v2663_v21, %v2519_v49  ;;  %v3852_v46 = vadd.f32 %v3851_v30, %v3850_v52  ;;  %2809 = vrot.lane.b32.xlu1 %v2719_v7, %s4146_s14  ;;  %2811 = vrot.lane.b32.xlu0 %v2721_v60, %s4146_s14  ;;  %v7950_v7 = vadd.f32 %v8353_v50, %v1648_v36  ;;  %v8354_v49 = vld [vmem:[#allocation9_spill] sm:$0xff] }
 0x2be   :  { %v2665_v1 = vpop.f32.mrf.mxu1  ;;  %v3853_v56 = vpop.f32.mrf.mxu0  ;;  %v2249_v21 = vadd.f32 %v3701_v59, %v8356_v44  ;;  %3894 = vmatprep.subr.mxu1 %v3239_v13  ;;  %v3235_v50 = vld [vmem:[%s8217_s5 + $0x58] sm:$0xff]  ;;  %v8359_v44 = vld [vmem:[#allocation10_spill] sm:$0xff] }
 0x2bf   :  { %v2722_v54 = vmax.f32 %v2664_v51, 0.0  ;;  %v2524_v40 = vadd.f32 %v3852_v46, %v2379_v2  ;;  %v8355_v2 = vld [vmem:[#allocation41_spill] sm:$0xff]  ;;  %3895 = vmatpush3.msra.mxu1 %v3239_v13 }
 0x2c0   :  { %v2668_v29 = vpop.f32.mrf.mxu1  ;;  %v3854_v18 = vpop.f32.mrf.mxu0  ;;  %v1654_v14 = vadd.f32 %v8355_v2, %v8354_v49  ;;  %v2394_v32 = vadd.f32 %v3781_v25, %v2249_v21  ;;  %3896 = vmatprep.subr.mxu1 %v3238_v15  ;;  %v3234_v49 = vld [vmem:[%s8217_s5 + $0x50] sm:$0xff]  ;;  %v3233_v2 = vld [vmem:[%s8217_s5 + $0x48] sm:$0xff]  ;;  %v2687_v21 = vmax.f32 %v8359_v44, 0.0 }
 0x2c1   :  { %v2669_v6 = vadd.f32 %v2668_v29, %v2524_v40  ;;  %v3855_v4 = vadd.f32 %v3854_v18, %v3853_v56  ;;  %2813 = vrot.lane.b32.xlu1 %v2722_v54, %s4146_s14  ;;  %2815 = vrot.lane.b32.xlu0 %v2724_v10, %s4146_s14  ;;  %v2730_v56 = vmax.f32 %v7950_v7, 0.0  ;;  %v8360_v25 = vld [vmem:[#allocation11_spill] sm:$0xff] }
 0x2c2   :  { %v2670_v24 = vpop.f32.mrf.mxu1  ;;  %v3856_v52 = vpop.f32.mrf.mxu0  ;;  %v7963_v55 = vadd.f32 %v8358_v26, %v1654_v14  ;;  %3897 = vmatpush3.msra.mxu1 %v3238_v15  ;;  %v3232_v14 = vld [vmem:[%s8217_s5 + $0x40] sm:$0xff]  ;;  %v3229_v7 = vld [vmem:[%s8217_s5 + $0x28] sm:$0xff] }
 0x2c3   :  { %v2725_v22 = vmax.f32 %v2669_v6, 0.0  ;;  %v2529_v31 = vadd.f32 %v3855_v4, %v2384_v48  ;;  %v3237_v48 = vld [vmem:[%s8217_s5 + $0x68] sm:$0xff]  ;;  %v3236_v24 = vld [vmem:[%s8217_s5 + $0x60] sm:$0xff] }
 0x2c4   :  { %v2673_v30 = vpop.f32.mrf.mxu1  ;;  %v3857_v20 = vpop.f32.mrf.mxu0  ;;  %v2733_v9 = vmax.f32 %v7963_v55, 0.0  ;;  %3898 = vmatprep.subr.mxu1 %v3237_v48  ;;  %v3227_v55 = vld [vmem:[%s8217_s5 + $0x18] sm:$0xff] }
 0x2c5   :  { %v2674_v51 = vadd.f32 %v2673_v30, %v2529_v31  ;;  %v3858_v46 = vadd.f32 %v3857_v20, %v3856_v52  ;;  %2817 = vrot.lane.b32.xlu1 %v2725_v22, %s4146_s14  ;;  %2819 = vrot.lane.b32.xlu0 %v2727_v12, %s4146_s14  ;;  %v3231_v22 = vld [vmem:[%s8217_s5 + $0x38] sm:$0xff]  ;;  %v3230_v31 = vld [vmem:[%s8217_s5 + $0x30] sm:$0xff]  ;;  %v2772_v30 = vpop.permute.xlu1 %2771 }
 0x2c6   :  { %v2675_v61 = vpop.f32.mrf.mxu1  ;;  %v3859_v1 = vpop.f32.mrf.mxu0  ;;  %3899 = vmatpush3.msra.mxu1 %v3237_v48 }
 0x2c7   :  { %v2728_v36 = vmax.f32 %v2674_v51, 0.0  ;;  %v2534_v54 = vadd.f32 %v3858_v46, %v2389_v37  ;;  %3900 = vmatprep.subr.mxu1 %v3236_v24  ;;  %v2768_v37 = vpop.permute.xlu0 %2767  ;;  %v8361_v51 = vmax.f32 %v8360_v25, 0.0 }
 0x2c8   :  { %v2678_v40 = vpop.f32.mrf.mxu1  ;;  %v3860_v33 = vpop.f32.mrf.mxu0  ;;  %3901 = vmatpush3.msra.mxu1 %v3236_v24 }
 0x2c9   :  { %v2679_v53 = vadd.f32 %v2678_v40, %v2534_v54  ;;  %v3861_v62 = vadd.f32 %v3860_v33, %v3859_v1  ;;  %2821 = vrot.lane.b32.xlu1 %v2728_v36, %s4146_s14  ;;  %2823 = vrot.lane.b32.xlu0 %v2730_v56, %s4146_s14  ;;  %v8362_v1 = vld [vmem:[#allocation12_spill] sm:$0xff]  ;;  %v8363_v33 = vld [vmem:[#allocation13_spill] sm:$0xff] }
 0x2ca   :  { %v2680_v28 = vpop.f32.mrf.mxu1  ;;  %3902 = vmatprep.subr.mxu1 %v3235_v50  ;;  %v2690_v26 = vmax.f32 %v8362_v1, 0.0  ;;  %v8364_v13 = vmax.f32 %v8363_v33, 0.0 }
 0x2cb   :  { %v2731_v59 = vmax.f32 %v2679_v53, 0.0  ;;  %v2539_v29 = vadd.f32 %v3861_v62, %v2394_v32  ;;  %3903 = vmatpush3.msra.mxu1 %v3235_v50  ;;  %v8365_v62 = vld [vmem:[#allocation14_spill] sm:$0xff] }
 0x2cc   :  { %v2683_v18 = vpop.f32.mrf.mxu1  ;;  %3904 = vmatprep.subr.mxu1 %v3234_v49  ;;  %v2693_v15 = vmax.f32 %v8365_v62, 0.0 }
 0x2cd   :  { %v2684_v6 = vadd.f32 %v2683_v18, %v2539_v29  ;;  %2825 = vrot.lane.b32.xlu1 %v2731_v59, %s4146_s14  ;;  %2827 = vrot.lane.b32.xlu0 %v2733_v9, %s4146_s14 }
 0x2ce   :  { %v2685_v4 = vpop.f32.mrf.mxu1  ;;  %3905 = vmatpush3.msra.mxu1 %v3234_v49 }
 0x2cf   :  { %v2734_v52 = vmax.f32 %v2684_v6, 0.0  ;;  %3906 = vmatprep.subr.mxu1 %v3233_v2  ;;  %v8366_v6 = vld [vmem:[#allocation15_spill] sm:$0xff] }
 0x2d0   :  { %3907 = vmatpush3.msra.mxu1 %v3233_v2  ;;  %v2696_v4 = vmax.f32 %v8366_v6, 0.0 }
 0x2d1   :  { %2829 = vrot.lane.b32.xlu1 %v2734_v52, %s4146_s14  ;;  %3908 = vmatprep.subr.mxu1 %v3232_v14 }
 0x2d2   :  { %3909 = vmatpush3.msra.mxu1 %v3232_v14  ;;  %v8367_v14 = vld [vmem:[#allocation16_spill] sm:$0xff] }
 0x2d3   :  { %3910 = vmatprep.subr.mxu1 %v3231_v22 }
 0x2d4   :  { %3911 = vmatpush3.msra.mxu1 %v3231_v22  ;;  %v2699_v22 = vmax.f32 %v8367_v14, 0.0 }
 0x2d5   :  { %3912 = vmatprep.subr.mxu1 %v3230_v31 }
 0x2d6   :  { %3913 = vmatpush3.msra.mxu1 %v3230_v31 }
 0x2d7   :  { %3914 = vmatprep.subr.mxu1 %v3229_v7 }
 0x2d8   :  { %3915 = vmatpush3.msra.mxu1 %v3229_v7 }
 0x307   :  { %v2770_v20 = vpop.permute.xlu0 %2769 }
 0x308   :  { %v2832_v43 = vsel %vm2831_vm1, %v2768_v37, %v2770_v20  ;;  %v2881_v46 = vmax.f32 %v8361_v51, %v2770_v20  ;;  %v8369_v51 = vld [vmem:[#allocation18_spill] sm:$0xff] }
 0x309   :  { %v2880_v61 = vmax.f32 %v2687_v21, %v2832_v43  ;;  %v8368_v21 = vld [vmem:[#allocation17_spill] sm:$0xff] }
 0x30a   :  { %3445 = vmatprep.mubr.msk.f32.mxu0 %vm2966_vm2, %v2881_v46  ;;  %v2705_v46 = vmax.f32 %v8369_v51, 0.0  ;;  %v8377_v51 = vld [vmem:[#allocation39_spill] sm:$0xff] }
 0x30b   :  { %v2774_v36 = vpop.permute.xlu1 %2773  ;;  %v2776_v54 = vpop.permute.xlu0 %2775  ;;  %3080 = vmatmul.mubr.f32.vlgmr.msra.gmra.mxu0 %v2880_v61 }
 0x30c   :  { %v2833_v40 = vsel %vm2831_vm1, %v2772_v30, %v2774_v36  ;;  %v2883_v32 = vmax.f32 %v8364_v13, %v2774_v36  ;;  %v2702_v30 = vmax.f32 %v8368_v21, 0.0  ;;  %v8370_v36 = vld [vmem:[#allocation19_spill] sm:$0xff] }
 0x30d   :  { %v2882_v53 = vmax.f32 %v2690_v26, %v2833_v40 }
 0x30e   :  { %3446 = vmatprep.mubr.msk.f32.mxu0 %vm2966_vm2, %v2883_v32  ;;  %v8371_v32 = vld [vmem:[#allocation21_spill] sm:$0xff] }
 0x30f   :  { %v2778_v28 = vpop.permute.xlu1 %2777  ;;  %v2780_v59 = vpop.permute.xlu0 %2779  ;;  %3086 = vmatmul.mubr.f32.gmra.mxu0 %v2882_v53  ;;  %v2711_v53 = vmax.f32 %v8371_v32, 0.0 }
 0x310   :  { %v2834_v29 = vsel %vm2831_vm1, %v2776_v54, %v2778_v28  ;;  %v2885_v18 = vmax.f32 %v2694_v34, %v2778_v28  ;;  %v2708_v54 = vmax.f32 %v8370_v36, 0.0 }
 0x311   :  { %v2884_v48 = vmax.f32 %v2693_v15, %v2834_v29 }
 0x312   :  { %3447 = vmatprep.mubr.msk.f32.mxu0 %vm2966_vm2, %v2885_v18 }
 0x313   :  { %v2782_v24 = vpop.permute.xlu1 %2781  ;;  %v2784_v52 = vpop.permute.xlu0 %2783  ;;  %3092 = vmatmul.mubr.f32.gmra.mxu0 %v2884_v48 }
 0x314   :  { %v2835_v50 = vsel %vm2831_vm1, %v2780_v59, %v2782_v24  ;;  %v2887_v49 = vmax.f32 %v2697_v19, %v2782_v24  ;;  %v8372_v59 = vld [vmem:[#allocation24_spill] sm:$0xff] }
 0x315   :  { %v2886_v2 = vmax.f32 %v2696_v4, %v2835_v50  ;;  %v2714_v29 = vmax.f32 %v8372_v59, 0.0  ;;  %v8373_v4 = vld [vmem:[#allocation27_spill] sm:$0xff] }
 0x316   :  { %3448 = vmatprep.mubr.msk.f32.mxu0 %vm2966_vm2, %v2887_v49  ;;  %v2717_v24 = vmax.f32 %v8373_v4, 0.0 }
 0x317   :  { %v2786_v16 = vpop.permute.xlu1 %2785  ;;  %v2788_v34 = vpop.permute.xlu0 %2787  ;;  %3098 = vmatmul.mubr.f32.gmra.mxu0 %v2886_v2  ;;  %v8374_v2 = vld [vmem:[#allocation30_spill] sm:$0xff] }
 0x318   :  { %v2836_v31 = vsel %vm2831_vm1, %v2784_v52, %v2786_v16  ;;  %v2889_v37 = vmax.f32 %v2700_v23, %v2786_v16  ;;  %v2720_v14 = vmax.f32 %v8374_v2, 0.0 }
 0x319   :  { %v2888_v44 = vmax.f32 %v2699_v22, %v2836_v31  ;;  %v8375_v31 = vld [vmem:[#allocation33_spill] sm:$0xff] }
 0x31a   :  { %3449 = vmatprep.mubr.msk.f32.mxu0 %vm2966_vm2, %v2889_v37  ;;  %v2723_v37 = vmax.f32 %v8375_v31, 0.0 }
 0x31b   :  { %v2790_v63 = vpop.permute.xlu1 %2789  ;;  %v2792_v19 = vpop.permute.xlu0 %2791  ;;  %3104 = vmatmul.mubr.f32.gmra.mxu0 %v2888_v44 }
 0x31c   :  { %v2837_v20 = vsel %vm2831_vm1, %v2788_v34, %v2790_v63  ;;  %v2891_v43 = vmax.f32 %v2703_v35, %v2790_v63  ;;  %v8376_v63 = vld [vmem:[#allocation36_spill] sm:$0xff] }
 0x31d   :  { %v2890_v25 = vmax.f32 %v2702_v30, %v2837_v20 }
 0x31e   :  { %3450 = vmatprep.mubr.msk.f32.mxu0 %vm2966_vm2, %v2891_v43 }
 0x31f   :  { %v2794_v42 = vpop.permute.xlu1 %2793  ;;  %v2796_v23 = vpop.permute.xlu0 %2795  ;;  %3110 = vmatmul.mubr.f32.gmra.mxu0 %v2890_v25 }
 0x320   :  { %v2838_v61 = vsel %vm2831_vm1, %v2792_v19, %v2794_v42  ;;  %v2893_v1 = vmax.f32 %v2706_v8, %v2794_v42  ;;  %v2726_v19 = vmax.f32 %v8376_v63, 0.0 }
 0x321   :  { %v2892_v26 = vmax.f32 %v2705_v46, %v2838_v61  ;;  %v2729_v46 = vmax.f32 %v8377_v51, 0.0  ;;  %v8378_v61 = vld [vmem:[#allocation42_spill] sm:$0xff] }
 0x322   :  { %3451 = vmatprep.mubr.msk.f32.mxu0 %vm2966_vm2, %v2893_v1  ;;  %v2732_v1 = vmax.f32 %v8378_v61, 0.0 }
 0x323   :  { %v2798_v27 = vpop.permute.xlu1 %2797  ;;  %v2800_v35 = vpop.permute.xlu0 %2799  ;;  %3116 = vmatmul.mubr.f32.gmra.mxu0 %v2892_v26 }
 0x324   :  { %v2839_v40 = vsel %vm2831_vm1, %v2796_v23, %v2798_v27  ;;  %v2895_v33 = vmax.f32 %v2709_v5, %v2798_v27  ;;  %v3225_v27 = vld [vmem:[%s8217_s5 + $0x8] sm:$0xff] }
 0x325   :  { %v2894_v13 = vmax.f32 %v2708_v54, %v2839_v40  ;;  %v2954_v40 = vld [vmem:[%s8218_s4] sm:$0x3] }
 0x326   :  { %3452 = vmatprep.mubr.msk.f32.mxu0 %vm2966_vm2, %v2895_v33  ;;  %v8379_v33 = vld [vmem:[#allocation2_spill] sm:$0xff] }
 0x327   :  { %v2802_v3 = vpop.permute.xlu1 %2801  ;;  %v2804_v8 = vpop.permute.xlu0 %2803  ;;  %3122 = vmatmul.mubr.f32.gmra.mxu0 %v2894_v13  ;;  %v8380_v13 = vsub.s32 0, %v8379_v33 }
 0x328   :  { %v2840_v62 = vsel %vm2831_vm1, %v2800_v35, %v2802_v3  ;;  %v2897_v15 = vmax.f32 %v2712_v17, %v2802_v3  ;;  %v3224_v35 = vld [vmem:[%s8217_s5] sm:$0xff] }
 0x329   :  { %v2896_v28 = vmax.f32 %v2711_v53, %v2840_v62  ;;  %v8108_v32 = vrot.slane %v2954_v40, %v8380_v13  ;;  %v8381_v53 = vsub.s32 1, %v8379_v33 }
 0x32a   :  { %3453 = vmatprep.mubr.msk.f32.mxu0 %vm2966_vm2, %v2897_v15 }
 0x32b   :  { %v2806_v0 = vpop.permute.xlu1 %2805  ;;  %v2808_v5 = vpop.permute.xlu0 %2807  ;;  %3128 = vmatmul.mubr.f32.gmra.mxu0 %v2896_v28  ;;  %v8112_v3 = vrot.slane %v2954_v40, %v8381_v53 }
 0x32c   :  { %v2841_v18 = vsel %vm2831_vm1, %v2804_v8, %v2806_v0  ;;  %v2899_v48 = vmax.f32 %v2715_v47, %v2806_v0 }
 0x32d   :  { %v2898_v6 = vmax.f32 %v2714_v29, %v2841_v18 }
 0x32e   :  { %3454 = vmatprep.mubr.msk.f32.mxu0 %vm2966_vm2, %v2899_v48 }
 0x32f   :  { %v2810_v11 = vpop.permute.xlu1 %2809  ;;  %v2812_v17 = vpop.permute.xlu0 %2811  ;;  %3134 = vmatmul.mubr.f32.gmra.mxu0 %v2898_v6 }
 0x330   :  { %v2842_v52 = vsel %vm2831_vm1, %v2808_v5, %v2810_v11  ;;  %v2901_v50 = vmax.f32 %v2718_v41, %v2810_v11 }
 0x331   :  { %v2900_v49 = vmax.f32 %v2717_v24, %v2842_v52 }
 0x332   :  { %3455 = vmatprep.mubr.msk.f32.mxu0 %vm2966_vm2, %v2901_v50 }
 0x333   :  { %v2814_v39 = vpop.permute.xlu1 %2813  ;;  %v2816_v47 = vpop.permute.xlu0 %2815  ;;  %3140 = vmatmul.mubr.f32.gmra.mxu0 %v2900_v49 }
 0x334   :  { %v2843_v22 = vsel %vm2831_vm1, %v2812_v17, %v2814_v39  ;;  %v2903_v16 = vmax.f32 %v2721_v60, %v2814_v39 }
 0x335   :  { %v2902_v34 = vmax.f32 %v2720_v14, %v2843_v22 }
 0x336   :  { %3456 = vmatprep.mubr.msk.f32.mxu0 %vm2966_vm2, %v2903_v16 }
 0x337   :  { %v2818_v45 = vpop.permute.xlu1 %2817  ;;  %v2820_v41 = vpop.permute.xlu0 %2819  ;;  %3146 = vmatmul.mubr.f32.gmra.mxu0 %v2902_v34 }
 0x338   :  { %v2844_v44 = vsel %vm2831_vm1, %v2816_v47, %v2818_v45  ;;  %v2905_v21 = vmax.f32 %v2724_v10, %v2818_v45 }
 0x339   :  { %v2904_v30 = vmax.f32 %v2723_v37, %v2844_v44 }
 0x33a   :  { %3457 = vmatprep.mubr.msk.f32.mxu0 %vm2966_vm2, %v2905_v21 }
 0x33b   :  { %v2822_v38 = vpop.permute.xlu1 %2821  ;;  %3152 = vmatmul.mubr.f32.gmra.mxu0 %v2904_v30  ;;  %v2824_v25 = vpop.permute.xlu0 %2823 }
 0x33c   :  { %v2845_v60 = vsel %vm2831_vm1, %v2820_v41, %v2822_v38  ;;  %v2907_v20 = vmax.f32 %v2727_v12, %v2822_v38 }
 0x33d   :  { %v2906_v43 = vmax.f32 %v2726_v19, %v2845_v60 }
 0x33e   :  { %3458 = vmatprep.mubr.msk.f32.mxu0 %vm2966_vm2, %v2907_v20 }
 0x33f   :  { %v2826_v57 = vpop.permute.xlu1 %2825  ;;  %3158 = vmatmul.mubr.f32.gmra.mxu0 %v2906_v43  ;;  %v2828_v58 = vpop.permute.xlu0 %2827 }
 0x340   :  { %v2846_v10 = vsel %vm2831_vm1, %v2824_v25, %v2826_v57  ;;  %v2909_v42 = vmax.f32 %v2730_v56, %v2826_v57  ;;  %v3228_v56 = vld [vmem:[%s8217_s5 + $0x20] sm:$0xff] }
 0x341   :  { %v2908_v23 = vmax.f32 %v2729_v46, %v2846_v10  ;;  %3916 = vmatprep.subr.mxu1 %v3228_v56 }
 0x342   :  { %3459 = vmatprep.mubr.msk.f32.mxu0 %vm2966_vm2, %v2909_v42  ;;  %3917 = vmatpush3.msra.mxu1 %v3228_v56 }
 0x343   :  { %v2830_v12 = vpop.permute.xlu1 %2829  ;;  %3164 = vmatmul.mubr.f32.gmra.mxu0 %v2908_v23  ;;  %3918 = vmatprep.subr.mxu1 %v3227_v55 }
 0x344   :  { %v2847_v26 = vsel %vm2831_vm1, %v2828_v58, %v2830_v12  ;;  %v2911_v36 = vmax.f32 %v2733_v9, %v2830_v12  ;;  %3919 = vmatpush3.msra.mxu1 %v3227_v55  ;;  %v3226_v9 = vld [vmem:[%s8217_s5 + $0x10] sm:$0xff] }
 0x345   :  { %v2910_v54 = vmax.f32 %v2732_v1, %v2847_v26  ;;  %3920 = vmatprep.subr.mxu1 %v3226_v9 }
 0x346   :  { %3460 = vmatprep.mubr.msk.f32.mxu0 %vm2966_vm2, %v2911_v36  ;;  %3921 = vmatpush3.msra.mxu1 %v3226_v9 }
 0x347   :  { %3170 = vmatmul.mubr.f32.gmra.mxu0 %v2910_v54  ;;  %3922 = vmatprep.subr.mxu1 %v3225_v27 }
 0x348   :  { %3923 = vmatpush3.msra.mxu1 %v3225_v27 }
 0x349   :  { %3924 = vmatprep.subr.mxu1 %v3224_v35 }
 0x34a   :  { %3925 = vmatpush3.msra.mxu1 %v3224_v35 }
 0x3cb   :  { %v3081_v8 = vpop.f32.mrf.mxu0 }
 0x3cc   :  { %v3082_v62 = vadd.f32 %v3081_v8, %v8108_v32 }
 0x3cd   :  { %v3083_v15 = vpop.f32.mrf.mxu0 }
 0x3ce   :  { %v3084_v28 = vadd.f32 %v3083_v15, %v8112_v3  ;;  %v3176_v29 = vmax.f32 %v3082_v62, 0.0 }
 0x3cf   :  { %v3087_v59 = vpop.f32.mrf.mxu0 }
 0x3d0   :  { %v3177_v0 = vmax.f32 %v3084_v28, 0.0  ;;  %v3088_v5 = vadd.f32 %v3087_v59, %v8108_v32 }
 0x3d1   :  { %v3089_v18 = vpop.f32.mrf.mxu0 }
 0x3d2   :  { %v3208_v48 = vmax.f32 %v3176_v29, %v3177_v0  ;;  %v3090_v6 = vadd.f32 %v3089_v18, %v8112_v3  ;;  %v3178_v24 = vmax.f32 %v3088_v5, 0.0 }
 0x3d3   :  { %v3093_v4 = vpop.f32.mrf.mxu0 }
 0x3d4   :  { %v3179_v11 = vmax.f32 %v3090_v6, 0.0  ;;  %v3094_v17 = vadd.f32 %v3093_v4, %v8108_v32  ;;  %3926 = vmatprep.mubr.f32.mxu1 %v3208_v48 }
 0x3d5   :  { %v3095_v52 = vpop.f32.mrf.mxu0 }
 0x3d6   :  { %v3209_v50 = vmax.f32 %v3178_v24, %v3179_v11  ;;  %v3096_v49 = vadd.f32 %v3095_v52, %v8112_v3  ;;  %v3180_v14 = vmax.f32 %v3094_v17, 0.0 }
 0x3d7   :  { %v3099_v2 = vpop.f32.mrf.mxu0 }
 0x3d8   :  { %v3181_v39 = vmax.f32 %v3096_v49, 0.0  ;;  %v3100_v47 = vadd.f32 %v3099_v2, %v8108_v32  ;;  %3927 = vmatmul.mubr.f32.vlgmr.msra.gmra.mxu1 %v3209_v50 }
 0x3d9   :  { %v3101_v22 = vpop.f32.mrf.mxu0 }
 0x3da   :  { %v3210_v16 = vmax.f32 %v3180_v14, %v3181_v39  ;;  %v3102_v34 = vadd.f32 %v3101_v22, %v8112_v3  ;;  %v3182_v37 = vmax.f32 %v3100_v47, 0.0 }
 0x3db   :  { %v3105_v31 = vpop.f32.mrf.mxu0 }
 0x3dc   :  { %v3183_v45 = vmax.f32 %v3102_v34, 0.0  ;;  %v3106_v41 = vadd.f32 %v3105_v31, %v8108_v32  ;;  %3929 = vmatprep.mubr.f32.mxu1 %v3210_v16 }
 0x3dd   :  { %v3107_v44 = vpop.f32.mrf.mxu0 }
 0x3de   :  { %v3211_v21 = vmax.f32 %v3182_v37, %v3183_v45  ;;  %v3108_v30 = vadd.f32 %v3107_v44, %v8112_v3  ;;  %v3184_v19 = vmax.f32 %v3106_v41, 0.0 }
 0x3df   :  { %v3111_v63 = vpop.f32.mrf.mxu0 }
 0x3e0   :  { %v3185_v38 = vmax.f32 %v3108_v30, 0.0  ;;  %v3112_v60 = vadd.f32 %v3111_v63, %v8108_v32  ;;  %3930 = vmatmul.mubr.f32.gmra.mxu1 %v3211_v21 }
 0x3e1   :  { %v3113_v20 = vpop.f32.mrf.mxu0 }
 0x3e2   :  { %v3212_v43 = vmax.f32 %v3184_v19, %v3185_v38  ;;  %v3114_v25 = vadd.f32 %v3113_v20, %v8112_v3  ;;  %v3186_v46 = vmax.f32 %v3112_v60, 0.0 }
 0x3e3   :  { %v3117_v51 = vpop.f32.mrf.mxu0 }
 0x3e4   :  { %v3187_v57 = vmax.f32 %v3114_v25, 0.0  ;;  %v3118_v10 = vadd.f32 %v3117_v51, %v8108_v32  ;;  %3932 = vmatprep.mubr.f32.mxu1 %v3212_v43 }
 0x3e5   :  { %v3119_v42 = vpop.f32.mrf.mxu0 }
 0x3e6   :  { %v3213_v23 = vmax.f32 %v3186_v46, %v3187_v57  ;;  %v3120_v61 = vadd.f32 %v3119_v42, %v8112_v3  ;;  %v3188_v58 = vmax.f32 %v3118_v10, 0.0 }
 0x3e7   :  { %v3123_v1 = vpop.f32.mrf.mxu0 }
 0x3e8   :  { %v3189_v12 = vmax.f32 %v3120_v61, 0.0  ;;  %v3124_v26 = vadd.f32 %v3123_v1, %v8108_v32  ;;  %3933 = vmatmul.mubr.f32.gmra.mxu1 %v3213_v23 }
 0x3e9   :  { %v3125_v36 = vpop.f32.mrf.mxu0 }
 0x3ea   :  { %v3214_v54 = vmax.f32 %v3188_v58, %v3189_v12  ;;  %v3126_v7 = vadd.f32 %v3125_v36, %v8112_v3  ;;  %v3190_v55 = vmax.f32 %v3124_v26, 0.0  ;;  %v3461_v36 = vld [vmem:[%s8219_s6] ss:$0 sm:$0xff] }
 0x3eb   :  { %v3129_v56 = vpop.f32.mrf.mxu0 }
 0x3ec   :  { %v3191_v9 = vmax.f32 %v3126_v7, 0.0  ;;  %v3130_v27 = vadd.f32 %v3129_v56, %v8108_v32  ;;  %3935 = vmatprep.mubr.f32.mxu1 %v3214_v54 }
 0x3ed   :  { %v3131_v35 = vpop.f32.mrf.mxu0 }
 0x3ee   :  { %v3215_v40 = vmax.f32 %v3190_v55, %v3191_v9  ;;  %v3132_v33 = vadd.f32 %v3131_v35, %v8112_v3  ;;  %v3192_v53 = vmax.f32 %v3130_v27, 0.0 }
 0x3ef   :  { %v3135_v13 = vpop.f32.mrf.mxu0 }
 0x3f0   :  { %v3193_v8 = vmax.f32 %v3132_v33, 0.0  ;;  %v3136_v62 = vadd.f32 %v3135_v13, %v8108_v32  ;;  %3936 = vmatmul.mubr.f32.gmra.mxu1 %v3215_v40 }
 0x3f1   :  { %v3137_v15 = vpop.f32.mrf.mxu0 }
 0x3f2   :  { %v3216_v28 = vmax.f32 %v3192_v53, %v3193_v8  ;;  %v3138_v59 = vadd.f32 %v3137_v15, %v8112_v3  ;;  %v3194_v0 = vmax.f32 %v3136_v62, 0.0 }
 0x3f3   :  { %v3141_v29 = vpop.f32.mrf.mxu0 }
 0x3f4   :  { %v3195_v5 = vmax.f32 %v3138_v59, 0.0  ;;  %v3142_v18 = vadd.f32 %v3141_v29, %v8108_v32  ;;  %3938 = vmatprep.mubr.f32.mxu1 %v3216_v28 }
 0x3f5   :  { %v3143_v48 = vpop.f32.mrf.mxu0 }
 0x3f6   :  { %v3217_v6 = vmax.f32 %v3194_v0, %v3195_v5  ;;  %v3144_v4 = vadd.f32 %v3143_v48, %v8112_v3  ;;  %v3196_v11 = vmax.f32 %v3142_v18, 0.0 }
 0x3f7   :  { %v3147_v24 = vpop.f32.mrf.mxu0 }
 0x3f8   :  { %v3197_v17 = vmax.f32 %v3144_v4, 0.0  ;;  %v3148_v52 = vadd.f32 %v3147_v24, %v8108_v32  ;;  %3939 = vmatmul.mubr.f32.gmra.mxu1 %v3217_v6 }
 0x3f9   :  { %v3149_v50 = vpop.f32.mrf.mxu0 }
 0x3fa   :  { %v3218_v49 = vmax.f32 %v3196_v11, %v3197_v17  ;;  %v3150_v2 = vadd.f32 %v3149_v50, %v8112_v3  ;;  %v3198_v39 = vmax.f32 %v3148_v52, 0.0 }
 0x3fb   :  { %v3153_v14 = vpop.f32.mrf.mxu0 }
 0x3fc   :  { %v3199_v47 = vmax.f32 %v3150_v2, 0.0  ;;  %v3154_v22 = vadd.f32 %v3153_v14, %v8108_v32  ;;  %3941 = vmatprep.mubr.f32.mxu1 %v3218_v49 }
 0x3fd   :  { %v3155_v16 = vpop.f32.mrf.mxu0 }
 0x3fe   :  { %v3219_v34 = vmax.f32 %v3198_v39, %v3199_v47  ;;  %v3156_v31 = vadd.f32 %v3155_v16, %v8112_v3  ;;  %v3200_v45 = vmax.f32 %v3154_v22, 0.0 }
 0x3ff   :  { %v3159_v37 = vpop.f32.mrf.mxu0 }
 0x400   :  { %v3201_v41 = vmax.f32 %v3156_v31, 0.0  ;;  %v3160_v44 = vadd.f32 %v3159_v37, %v8108_v32  ;;  %3942 = vmatmul.mubr.f32.gmra.mxu1 %v3219_v34 }
 0x401   :  { %v3161_v21 = vpop.f32.mrf.mxu0 }
 0x402   :  { %v3220_v30 = vmax.f32 %v3200_v45, %v3201_v41  ;;  %v3162_v63 = vadd.f32 %v3161_v21, %v8112_v3  ;;  %v3202_v38 = vmax.f32 %v3160_v44, 0.0 }
 0x403   :  { %v3165_v19 = vpop.f32.mrf.mxu0 }
 0x404   :  { %v3203_v60 = vmax.f32 %v3162_v63, 0.0  ;;  %v3166_v20 = vadd.f32 %v3165_v19, %v8108_v32  ;;  %3944 = vmatprep.mubr.f32.mxu1 %v3220_v30 }
 0x405   :  { %v3167_v43 = vpop.f32.mrf.mxu0 }
 0x406   :  { %v3221_v25 = vmax.f32 %v3202_v38, %v3203_v60  ;;  %v3168_v51 = vadd.f32 %v3167_v43, %v8112_v3  ;;  %v3204_v57 = vmax.f32 %v3166_v20, 0.0 }
 0x407   :  { %v3171_v46 = vpop.f32.mrf.mxu0 }
 0x408   :  { %v3205_v10 = vmax.f32 %v3168_v51, 0.0  ;;  %v3172_v42 = vadd.f32 %v3171_v46, %v8108_v32  ;;  %3945 = vmatmul.mubr.f32.gmra.mxu1 %v3221_v25 }
 0x409   :  { %v3173_v23 = vpop.f32.mrf.mxu0 }
 0x40a   :  { %v3222_v61 = vmax.f32 %v3204_v57, %v3205_v10  ;;  %v3174_v1 = vadd.f32 %v3173_v23, %v8112_v3  ;;  %v3206_v58 = vmax.f32 %v3172_v42, 0.0 }
 0x40c   :  { %v3207_v12 = vmax.f32 %v3174_v1, 0.0  ;;  %3947 = vmatprep.mubr.f32.mxu1 %v3222_v61 }
 0x40e   :  { %v3223_v26 = vmax.f32 %v3206_v58, %v3207_v12 }
 0x410   :  { %3948 = vmatmul.mubr.f32.gmra.mxu1 %v3223_v26 }
 0x498   :  { %v3928_v54 = vpop.f32.mrf.mxu1 }
 0x499   :  { %v3319_v7 = vadd.f32 %v3928_v54, %v3461_v36 }
 0x49a   :  { %v3313_v56 = vpop.f32.mrf.mxu1 }
 0x49b   :  { %3394 = vst.msk [vmem:[%s8220_s7 + $0x8] sm:$0xff] %vm3392_vm3, %v3319_v7  ;;  %v3314_v32 = vadd.f32 %v3461_v36, %v3313_v56 }
 0x49d   :  { %3393 = vst.msk [vmem:[%s8220_s7] sm:$0xff] %vm3392_vm3, %v3314_v32 }
 0x4a0   :  { %v3931_v3 = vpop.f32.mrf.mxu1 }
 0x4a1   :  { %v3329_v55 = vadd.f32 %v3931_v3, %v3461_v36 }
 0x4a2   :  { %v3323_v9 = vpop.f32.mrf.mxu1 }
 0x4a3   :  { %3396 = vst.msk [vmem:[%s8220_s7 + $0x18] sm:$0xff] %vm3392_vm3, %v3329_v55  ;;  %v3324_v27 = vadd.f32 %v3461_v36, %v3323_v9 }
 0x4a5   :  { %3395 = vst.msk [vmem:[%s8220_s7 + $0x10] sm:$0xff] %vm3392_vm3, %v3324_v27 }
 0x4a8   :  { %v3934_v35 = vpop.f32.mrf.mxu1 }
 0x4a9   :  { %v3339_v40 = vadd.f32 %v3934_v35, %v3461_v36 }
 0x4aa   :  { %v3333_v33 = vpop.f32.mrf.mxu1 }
 0x4ab   :  { %3398 = vst.msk [vmem:[%s8220_s7 + $0x28] sm:$0xff] %vm3392_vm3, %v3339_v40  ;;  %v3334_v13 = vadd.f32 %v3461_v36, %v3333_v33 }
 0x4ad   :  { %3397 = vst.msk [vmem:[%s8220_s7 + $0x20] sm:$0xff] %vm3392_vm3, %v3334_v13 }
 0x4b0   :  { %v3937_v53 = vpop.f32.mrf.mxu1 }
 0x4b1   :  { %v3349_v8 = vadd.f32 %v3937_v53, %v3461_v36 }
 0x4b2   :  { %v3343_v62 = vpop.f32.mrf.mxu1 }
 0x4b3   :  { %3400 = vst.msk [vmem:[%s8220_s7 + $0x38] sm:$0xff] %vm3392_vm3, %v3349_v8  ;;  %v3344_v15 = vadd.f32 %v3461_v36, %v3343_v62 }
 0x4b5   :  { %3399 = vst.msk [vmem:[%s8220_s7 + $0x30] sm:$0xff] %vm3392_vm3, %v3344_v15 }
 0x4b8   :  { %v3940_v28 = vpop.f32.mrf.mxu1 }
 0x4b9   :  { %v3359_v59 = vadd.f32 %v3940_v28, %v3461_v36 }
 0x4ba   :  { %v3353_v29 = vpop.f32.mrf.mxu1 }
 0x4bb   :  { %3402 = vst.msk [vmem:[%s8220_s7 + $0x48] sm:$0xff] %vm3392_vm3, %v3359_v59  ;;  %v3354_v0 = vadd.f32 %v3461_v36, %v3353_v29 }
 0x4bd   :  { %3401 = vst.msk [vmem:[%s8220_s7 + $0x40] sm:$0xff] %vm3392_vm3, %v3354_v0 }
 0x4c0   :  { %v3943_v5 = vpop.f32.mrf.mxu1 }
 0x4c1   :  { %v3369_v18 = vadd.f32 %v3943_v5, %v3461_v36 }
 0x4c2   :  { %v3363_v48 = vpop.f32.mrf.mxu1 }
 0x4c3   :  { %3404 = vst.msk [vmem:[%s8220_s7 + $0x58] sm:$0xff] %vm3392_vm3, %v3369_v18  ;;  %v3364_v6 = vadd.f32 %v3461_v36, %v3363_v48 }
 0x4c5   :  { %3403 = vst.msk [vmem:[%s8220_s7 + $0x50] sm:$0xff] %vm3392_vm3, %v3364_v6 }
 0x4c8   :  { %v3946_v4 = vpop.f32.mrf.mxu1 }
 0x4c9   :  { %v3379_v24 = vadd.f32 %v3946_v4, %v3461_v36 }
 0x4ca   :  { %v3373_v11 = vpop.f32.mrf.mxu1 }
 0x4cb   :  { %3406 = vst.msk [vmem:[%s8220_s7 + $0x68] sm:$0xff] %vm3392_vm3, %v3379_v24  ;;  %v3374_v17 = vadd.f32 %v3461_v36, %v3373_v11 }
 0x4cd   :  { %3405 = vst.msk [vmem:[%s8220_s7 + $0x60] sm:$0xff] %vm3392_vm3, %v3374_v17 }
 0x4d0   :  { %v3949_v52 = vpop.f32.mrf.mxu1 }
 0x4d1   :  { %v3389_v50 = vadd.f32 %v3949_v52, %v3461_v36 }
 0x4d2   :  { %v3383_v49 = vpop.f32.mrf.mxu1 }
 0x4d3   :  { %3408 = vst.msk [vmem:[%s8220_s7 + $0x78] sm:$0xff] %vm3392_vm3, %v3389_v50  ;;  %v3384_v2 = vadd.f32 %v3461_v36, %v3383_v49 }
 0x4d5   :  { %3407 = vst.msk [vmem:[%s8220_s7 + $0x70] sm:$0xff] %vm3392_vm3, %v3384_v2 }

</bundles_post_ra>
